<compile_context>
chip_gen: v5e
topology: v5e:2x2
jax: 0.10.0
libtpu: 0.0.40
codegen_flags: <defaults>
</compile_context>

<pallas_src>
import math
from functools import partial

import jax
import jax.numpy as jnp
from jax.experimental import pallas as pl
from jax.experimental.pallas import tpu as pltpu

LANE = 128
SUBLANE = 8


def _round_up(x: int, m: int) -> int:
    return ((x + m - 1) // m) * m


def _shifted_softplus(v):
    # softplus(v) - log(2), single-branch stable form (one exp + one log1p).
    return jnp.maximum(v, 0.0) + jnp.log1p(jnp.exp(-jnp.abs(v))) - math.log(2.0)


# ---------------------------------------------------------------------------
# Pallas kernel (grid = edge tiles, reduction axis)
# ---------------------------------------------------------------------------
def cfconv_kernel(
    x_ref,      # [Np, Cip]  f32   node features (resident)
    ew_ref,     # [TE, 1]    f32   edge distances (tile)
    ea_ref,     # [TE, Gp]   f32   RBF edge attributes (tile)
    idx_ref,    # [2, TE]    i32   row 0 = src node, row 1 = dst node (tile)
    w1_ref,     # [Cip, Fp]  f32   lin1 (bias-free)
    mw1_ref,    # [Gp, Fp]   f32   filter MLP layer 1
    mb1_ref,    # [1, Fp]    f32
    mw2_ref,    # [Fp, Fp]   f32   filter MLP layer 2
    mb2_ref,    # [1, Fp]    f32
    w2_ref,     # [Fp, Cop]  f32   lin2
    b2_ref,     # [1, Cop]   f32
    out_ref,    # [Np, Cop]  f32   output (resident, written on last tile)
    h_ref,      # scratch [Np, Fp] f32 : lin1(x) for all nodes
    acc_ref,    # scratch [Np, Fp] f32 : message accumulator for all nodes
    *,
    cutoff: float,
):
    e = pl.program_id(0)                  # edge tile index ("arbitrary")
    n_edge_tiles = pl.num_programs(0)

    Np = x_ref.shape[0]
    TE = ea_ref.shape[0]

    @pl.when(e == 0)
    def _init():
        # lin1 over all nodes (needed by the gather); done exactly once.
        h_ref[...] = jnp.dot(x_ref[...], w1_ref[...],
                             preferred_element_type=jnp.float32)
        acc_ref[...] = jnp.zeros_like(acc_ref)

    # ---- filter network on this edge tile ----------------------------------
    ew = ew_ref[...]                                               # [TE, 1]
    C = 0.5 * (jnp.cos(ew * (math.pi / cutoff)) + 1.0)             # cosine cutoff

    h1 = jnp.dot(ea_ref[...], mw1_ref[...],
                 preferred_element_type=jnp.float32) + mb1_ref[...]
    h1 = _shifted_softplus(h1)
    W = jnp.dot(h1, mw2_ref[...],
                preferred_element_type=jnp.float32) + mb2_ref[...]
    W = W * C                                                      # [TE, Fp]

    # ---- gather h[src[e]] via exact one-hot matmul (MXU) -------------------
    src = idx_ref[0:1, :]                                          # [1, TE]
    dst = idx_ref[1:2, :]                                          # [1, TE]
    node_ids = jax.lax.broadcasted_iota(jnp.int32, (Np, TE), 0)    # [Np, TE]
    Sg = (node_ids == src).astype(jnp.float32)                     # Sg[n,e] = (src[e]==n)
    x_j = jnp.einsum("ne,nf->ef", Sg, h_ref[...],
                     preferred_element_type=jnp.float32)           # [TE, Fp]

    msg = x_j * W                                                  # [TE, Fp]

    # ---- scatter-add into the full-node accumulator ------------------------
    Dg = (node_ids == dst).astype(jnp.float32)                     # [Np, TE]
    acc_ref[...] += jnp.dot(Dg, msg, preferred_element_type=jnp.float32)

    # ---- finalize: lin2 + single lane-dense store ---------------------------
    @pl.when(e == n_edge_tiles - 1)
    def _fin():
        y = jnp.dot(acc_ref[...], w2_ref[...],
                    preferred_element_type=jnp.float32) + b2_ref[...]
        out_ref[...] = y.astype(out_ref.dtype)


# ---------------------------------------------------------------------------
# Wrapper: padding, tiling, BlockSpecs
# ---------------------------------------------------------------------------
def cfconv_forward(x, edge_index, edge_weight, edge_attr, params, cutoff,
                   *, edge_tile=256, dim_size=None):
    assert edge_tile % LANE == 0

    N_nodes, Cin = x.shape
    N_out = N_nodes if dim_size is None else int(dim_size)
    N = max(N_nodes, N_out)
    E, G = edge_attr.shape
    F = params["w_lin1"].shape[1]
    Cout = params["w_lin2"].shape[1]

    # ---- lane/sublane padding (exact: all padded rows/cols stay zero) -------
    Cip = _round_up(Cin, LANE)
    Gp = _round_up(G, LANE)
    Fp = _round_up(F, LANE)
    Cop = _round_up(Cout, LANE)

    Np = _round_up(N, SUBLANE)
    TE = min(edge_tile, _round_up(E, LANE))
    Ep = _round_up(E, TE)

    def pad2(a, r, c):
        return jnp.pad(a, ((0, r - a.shape[0]), (0, c - a.shape[1])))

    x_p = pad2(x.astype(jnp.float32), Np, Cip)
    ew_p = pad2(edge_weight.astype(jnp.float32).reshape(E, 1), Ep, 1)
    ea_p = pad2(edge_attr.astype(jnp.float32), Ep, Gp)

    # Padded edges: src = 0 (any valid node), dst = Np (out of range -> the
    # scatter one-hot never matches, so padded edges contribute nothing).
    src_p = jnp.pad(edge_index[0].astype(jnp.int32), (0, Ep - E), constant_values=0)
    dst_p = jnp.pad(edge_index[1].astype(jnp.int32), (0, Ep - E), constant_values=Np)
    eidx_p = jnp.stack([src_p, dst_p], axis=0)                      # [2, Ep]

    w1 = pad2(params["w_lin1"].astype(jnp.float32), Cip, Fp)
    mw1 = pad2(params["w_mlp1"].astype(jnp.float32), Gp, Fp)
    mb1 = pad2(params["b_mlp1"].astype(jnp.float32), 1, Fp)
    mw2 = pad2(params["w_mlp2"].astype(jnp.float32), Fp, Fp)
    mb2 = pad2(params["b_mlp2"].astype(jnp.float32), 1, Fp)
    w2 = pad2(params["w_lin2"].astype(jnp.float32), Fp, Cop)
    b2 = pad2(params["b_lin2"].astype(jnp.float32), 1, Cop)

    n_edge_tiles = Ep // TE

    # Constant index_map -> DMA'd once, stays VMEM-resident across the grid.
    def resident(shape):
        return pl.BlockSpec(shape, lambda e: (0, 0))

    in_specs = [
        resident((Np, Cip)),                       # x
        pl.BlockSpec((TE, 1), lambda e: (e, 0)),   # edge_weight tile
        pl.BlockSpec((TE, Gp), lambda e: (e, 0)),  # edge_attr tile
        pl.BlockSpec((2, TE), lambda e: (0, e)),   # edge_index tile
        resident((Cip, Fp)),                       # w_lin1
        resident((Gp, Fp)),                        # w_mlp1
        resident((1, Fp)),                         # b_mlp1
        resident((Fp, Fp)),                        # w_mlp2
        resident((1, Fp)),                         # b_mlp2
        resident((Fp, Cop)),                       # w_lin2
        resident((1, Cop)),                        # b_lin2
    ]
    out_spec = pl.BlockSpec((Np, Cop), lambda e: (0, 0))

    flops = (
        2 * Np * Cip * Fp                       # lin1
        + 2 * Ep * (Gp + Fp) * Fp               # filter MLP
        + 2 * Np * Ep * Fp                      # one-hot gather
        + 2 * Np * Ep * Fp                      # one-hot scatter
        + 2 * Np * Fp * Cop                     # lin2
    )
    bytes_accessed = 4 * (
        x_p.size + ew_p.size + ea_p.size + eidx_p.size + w1.size + mw1.size
        + mb1.size + mw2.size + mb2.size + w2.size + b2.size + Np * Cop
    )
    cost = pl.CostEstimate(
        flops=int(flops),
        transcendentals=int(2 * Ep * Fp + Ep),
        bytes_accessed=int(bytes_accessed),
    )

    out_p = pl.pallas_call(
        partial(cfconv_kernel, cutoff=float(cutoff)),
        out_shape=jax.ShapeDtypeStruct((Np, Cop), jnp.float32),
        grid_spec=pltpu.PrefetchScalarGridSpec(
            num_scalar_prefetch=0,
            grid=(n_edge_tiles,),
            in_specs=in_specs,
            out_specs=out_spec,
            scratch_shapes=[
                pltpu.VMEM((Np, Fp), jnp.float32),    # h = lin1(x), all nodes
                pltpu.VMEM((Np, Fp), jnp.float32),    # message accumulator
            ],
        ),
        compiler_params=pltpu.CompilerParams(
            dimension_semantics=("arbitrary",),
            vmem_limit_bytes=64 * 1024 * 1024,
        ),
        cost_estimate=cost,
    )(x_p, ew_p, ea_p, eidx_p, w1, mw1, mb1, mw2, mb2, w2, b2)

    return out_p[:N_out, :Cout]


# ---------------------------------------------------------------------------
# Deterministic parameter init (xavier-uniform weights, zero biases)
# ---------------------------------------------------------------------------
def _xavier(key, fan_in, fan_out):
    bound = math.sqrt(6.0 / (fan_in + fan_out))
    # stored as [in, out] so the kernel does y = x @ W
    return jax.random.uniform(key, (fan_in, fan_out), jnp.float32, -bound, bound)


def init_params(key, in_channels, out_channels, num_filters, num_gaussians):
    k1, k2, k3, k4 = jax.random.split(key, 4)
    return {
        "w_lin1": _xavier(k1, in_channels, num_filters),
        "w_mlp1": _xavier(k2, num_gaussians, num_filters),
        "b_mlp1": jnp.zeros((1, num_filters), jnp.float32),
        "w_mlp2": _xavier(k3, num_filters, num_filters),
        "b_mlp2": jnp.zeros((1, num_filters), jnp.float32),
        "w_lin2": _xavier(k4, num_filters, out_channels),
        "b_lin2": jnp.zeros((1, out_channels), jnp.float32),
    }


# ---------------------------------------------------------------------------
# Pure-JAX reference (same math) for a sanity check
# ---------------------------------------------------------------------------
def cfconv_reference(x, edge_index, edge_weight, edge_attr, params, cutoff):
    C = 0.5 * (jnp.cos(edge_weight.reshape(-1, 1) * (math.pi / cutoff)) + 1.0)
    h1 = edge_attr @ params["w_mlp1"] + params["b_mlp1"]
    h1 = jax.nn.softplus(h1) - math.log(2.0)
    W = (h1 @ params["w_mlp2"] + params["b_mlp2"]) * C
    h = x @ params["w_lin1"]
    msg = h[edge_index[0]] * W
    agg = jax.ops.segment_sum(msg, edge_index[1], num_segments=x.shape[0])
    return agg @ params["w_lin2"] + params["b_lin2"]


# ---------------------------------------------------------------------------
if __name__ == "__main__":
    # Small shapes consistent with the module; edge_tile=128 so the toy
    # problem exercises the edge-reduction grid axis (3 edge tiles).
    N, E = 32, 300
    IN_CH, NUM_FILTERS, OUT_CH = 32, 64, 32
    NUM_GAUSSIANS = 16
    CUTOFF = 5.0

    key = jax.random.PRNGKey(0)
    kx, kw, ka, ks, kd, kp = jax.random.split(key, 6)

    x = jax.random.normal(kx, (N, IN_CH), jnp.float32)
    edge_weight = jax.random.uniform(kw, (E,), jnp.float32, 0.1, CUTOFF)
    edge_attr = jax.random.normal(ka, (E, NUM_GAUSSIANS), jnp.float32)
    edge_src = jax.random.randint(ks, (E,), 0, N, jnp.int32)
    edge_dst = jax.random.randint(kd, (E,), 0, N, jnp.int32)
    edge_index = jnp.stack([edge_src, edge_dst], axis=0)          # [2, E]

    params = init_params(kp, IN_CH, OUT_CH, NUM_FILTERS, NUM_GAUSSIANS)

    out = cfconv_forward(x, edge_index, edge_weight, edge_attr, params, CUTOFF,
                         edge_tile=128)
    out = jax.block_until_ready(out)

    ref = cfconv_reference(x, edge_index, edge_weight, edge_attr, params, CUTOFF)
    if not jnp.allclose(out, ref, rtol=1e-3, atol=1e-3):
        err = jnp.max(jnp.abs(out - ref))
        raise AssertionError(f"Pallas CFConv does not match reference, max|err|={err}")

    print("KERNEL_OK")
</pallas_src>

<mosaic_0001>
module attributes {stable_mosaic.version = 11 : i64} {
  func.func @cfconv_kernel(%arg0: i32, %arg1: memref<32x128xf32, #tpu.memory_space<vmem>>, %arg2: memref<128x1xf32, #tpu.memory_space<vmem>>, %arg3: memref<128x128xf32, #tpu.memory_space<vmem>>, %arg4: memref<2x128xi32, #tpu.memory_space<vmem>>, %arg5: memref<128x128xf32, #tpu.memory_space<vmem>>, %arg6: memref<128x128xf32, #tpu.memory_space<vmem>>, %arg7: memref<1x128xf32, #tpu.memory_space<vmem>>, %arg8: memref<128x128xf32, #tpu.memory_space<vmem>>, %arg9: memref<1x128xf32, #tpu.memory_space<vmem>>, %arg10: memref<128x128xf32, #tpu.memory_space<vmem>>, %arg11: memref<1x128xf32, #tpu.memory_space<vmem>>, %arg12: memref<32x128xf32, #tpu.memory_space<vmem>>, %arg13: memref<32x128xf32, #tpu.memory_space<vmem>>, %arg14: memref<32x128xf32, #tpu.memory_space<vmem>>) attributes {dimension_semantics = [#tpu.dimension_semantics<arbitrary>], iteration_bounds = array<i64: 3>, scalar_prefetch = 0 : i64, scratch_operands = 2 : i64, tpu.core_type = #tpu.core_type<tc>, window_params = [{pipeline_mode = #tpu.pipeline_mode<synchronous>, transform_indices = @transform_0, window_bounds = array<i64: 32, 128>}, {transform_indices = @transform_1, window_bounds = array<i64: 128, 1>}, {transform_indices = @transform_2, window_bounds = array<i64: 128, 128>}, {transform_indices = @transform_3, window_bounds = array<i64: 2, 128>}, {pipeline_mode = #tpu.pipeline_mode<synchronous>, transform_indices = @transform_4, window_bounds = array<i64: 128, 128>}, {pipeline_mode = #tpu.pipeline_mode<synchronous>, transform_indices = @transform_5, window_bounds = array<i64: 128, 128>}, {pipeline_mode = #tpu.pipeline_mode<synchronous>, transform_indices = @transform_6, window_bounds = array<i64: 1, 128>}, {pipeline_mode = #tpu.pipeline_mode<synchronous>, transform_indices = @transform_7, window_bounds = array<i64: 128, 128>}, {pipeline_mode = #tpu.pipeline_mode<synchronous>, transform_indices = @transform_8, window_bounds = array<i64: 1, 128>}, {pipeline_mode = #tpu.pipeline_mode<synchronous>, transform_indices = @transform_9, window_bounds = array<i64: 128, 128>}, {pipeline_mode = #tpu.pipeline_mode<synchronous>, transform_indices = @transform_10, window_bounds = array<i64: 1, 128>}, {pipeline_mode = #tpu.pipeline_mode<synchronous>, transform_indices = @transform_11, window_bounds = array<i64: 32, 128>}]} {
    %c0_i32 = arith.constant 0 : i32
    %0 = arith.cmpi eq, %arg0, %c0_i32 : i32
    %1 = arith.extui %0 : i1 to i32
    %c0_i32_0 = arith.constant 0 : i32
    %2 = arith.cmpi ne, %1, %c0_i32_0 : i32
    scf.if %2 {
      %c0_31 = arith.constant 0 : index
      %c0_32 = arith.constant 0 : index
      %55 = vector.load %arg1[%c0_31, %c0_32] : memref<32x128xf32, #tpu.memory_space<vmem>>, vector<32x128xf32>
      %c0_33 = arith.constant 0 : index
      %c0_34 = arith.constant 0 : index
      %56 = vector.load %arg5[%c0_33, %c0_34] : memref<128x128xf32, #tpu.memory_space<vmem>>, vector<128x128xf32>
      %cst_35 = arith.constant dense<0.000000e+00> : vector<32x128xf32>
      %57 = tpu.matmul %55, %56, %cst_35 {dimension_numbers = #tpu.dot_dimension_numbers<[1], [0], [0], [1], [0, 0, 1, 1], [], []>} : vector<32x128xf32>, vector<128x128xf32>, vector<32x128xf32> -> vector<32x128xf32>
      %c0_36 = arith.constant 0 : index
      %c0_37 = arith.constant 0 : index
      %58 = vector.load %arg13[%c0_36, %c0_37] : memref<32x128xf32, #tpu.memory_space<vmem>>, vector<32x128xf32>
      tpu.vector_store %arg13[%c0_36, %c0_37], %57 {strides = array<i32>} : memref<32x128xf32, #tpu.memory_space<vmem>>, vector<32x128xf32>,
      %cst_38 = arith.constant 0.000000e+00 : f32
      %59 = vector.broadcast %cst_38 : f32 to vector<32x128xf32>
      %c0_39 = arith.constant 0 : index
      %c0_40 = arith.constant 0 : index
      %60 = vector.load %arg14[%c0_39, %c0_40] : memref<32x128xf32, #tpu.memory_space<vmem>>, vector<32x128xf32>
      tpu.vector_store %arg14[%c0_39, %c0_40], %59 {strides = array<i32>} : memref<32x128xf32, #tpu.memory_space<vmem>>, vector<32x128xf32>,
    } else {
    }
    %c0 = arith.constant 0 : index
    %c0_1 = arith.constant 0 : index
    %3 = vector.load %arg2[%c0, %c0_1] : memref<128x1xf32, #tpu.memory_space<vmem>>, vector<128x1xf32>
    %cst = arith.constant 0.628318548 : f32
    %4 = vector.broadcast %cst : f32 to vector<128x1xf32>
    %5 = arith.mulf %3, %4 : vector<128x1xf32>
    %6 = math.cos %5 : vector<128x1xf32>
    %cst_2 = arith.constant 1.000000e+00 : f32
    %7 = vector.broadcast %cst_2 : f32 to vector<128x1xf32>
    %8 = arith.addf %6, %7 : vector<128x1xf32>
    %cst_3 = arith.constant 5.000000e-01 : f32
    %9 = vector.broadcast %cst_3 : f32 to vector<128x1xf32>
    %10 = arith.mulf %9, %8 : vector<128x1xf32>
    %c0_4 = arith.constant 0 : index
    %c0_5 = arith.constant 0 : index
    %11 = vector.load %arg3[%c0_4, %c0_5] : memref<128x128xf32, #tpu.memory_space<vmem>>, vector<128x128xf32>
    %c0_6 = arith.constant 0 : index
    %c0_7 = arith.constant 0 : index
    %12 = vector.load %arg6[%c0_6, %c0_7] : memref<128x128xf32, #tpu.memory_space<vmem>>, vector<128x128xf32>
    %cst_8 = arith.constant dense<0.000000e+00> : vector<128x128xf32>
    %13 = tpu.matmul %11, %12, %cst_8 {dimension_numbers = #tpu.dot_dimension_numbers<[1], [0], [0], [1], [0, 0, 1, 1], [], []>} : vector<128x128xf32>, vector<128x128xf32>, vector<128x128xf32> -> vector<128x128xf32>
    %c0_9 = arith.constant 0 : index
    %c0_10 = arith.constant 0 : index
    %14 = vector.load %arg7[%c0_9, %c0_10] : memref<1x128xf32, #tpu.memory_space<vmem>>, vector<1x128xf32>
    %15 = vector.broadcast %14 : vector<1x128xf32> to vector<128x128xf32>
    %16 = arith.addf %13, %15 : vector<128x128xf32>
    %cst_11 = arith.constant 0.000000e+00 : f32
    %17 = vector.broadcast %cst_11 : f32 to vector<128x128xf32>
    %18 = arith.maximumf %16, %17 : vector<128x128xf32>
    %19 = math.absf %16 : vector<128x128xf32>
    %cst_12 = arith.constant 0.000000e+00 : f32
    %20 = vector.broadcast %cst_12 : f32 to vector<128x128xf32>
    %21 = arith.subf %20, %19 : vector<128x128xf32>
    %22 = math.exp %21 : vector<128x128xf32>
    %23 = math.log1p %22 : vector<128x128xf32>
    %24 = arith.addf %18, %23 : vector<128x128xf32>
    %cst_13 = arith.constant 0.693147182 : f32
    %25 = vector.broadcast %cst_13 : f32 to vector<128x128xf32>
    %26 = arith.subf %24, %25 : vector<128x128xf32>
    %c0_14 = arith.constant 0 : index
    %c0_15 = arith.constant 0 : index
    %27 = vector.load %arg8[%c0_14, %c0_15] : memref<128x128xf32, #tpu.memory_space<vmem>>, vector<128x128xf32>
    %cst_16 = arith.constant dense<0.000000e+00> : vector<128x128xf32>
    %28 = tpu.matmul %26, %27, %cst_16 {dimension_numbers = #tpu.dot_dimension_numbers<[1], [0], [0], [1], [0, 0, 1, 1], [], []>} : vector<128x128xf32>, vector<128x128xf32>, vector<128x128xf32> -> vector<128x128xf32>
    %c0_17 = arith.constant 0 : index
    %c0_18 = arith.constant 0 : index
    %29 = vector.load %arg9[%c0_17, %c0_18] : memref<1x128xf32, #tpu.memory_space<vmem>>, vector<1x128xf32>
    %30 = vector.broadcast %29 : vector<1x128xf32> to vector<128x128xf32>
    %31 = arith.addf %28, %30 : vector<128x128xf32>
    %32 = vector.broadcast %10 : vector<128x1xf32> to vector<128x128xf32>
    %33 = arith.mulf %31, %32 : vector<128x128xf32>
    %c0_19 = arith.constant 0 : index
    %c0_20 = arith.constant 0 : index
    %34 = vector.load %arg4[%c0_19, %c0_20] : memref<2x128xi32, #tpu.memory_space<vmem>>, vector<1x128xi32>
    %c1 = arith.constant 1 : index
    %c0_21 = arith.constant 0 : index
    %35 = vector.load %arg4[%c1, %c0_21] : memref<2x128xi32, #tpu.memory_space<vmem>>, vector<1x128xi32>
    %36 = tpu.iota {dimensions = array<i32: 0>} : vector<32x128xi32>
    %37 = vector.broadcast %34 : vector<1x128xi32> to vector<32x128xi32>
    %38 = arith.cmpi eq, %36, %37 : vector<32x128xi32>
    %39 = arith.extui %38 : vector<32x128xi1> to vector<32x128xi32>
    %40 = arith.sitofp %39 : vector<32x128xi32> to vector<32x128xf32>
    %c0_22 = arith.constant 0 : index
    %c0_23 = arith.constant 0 : index
    %41 = vector.load %arg13[%c0_22, %c0_23] : memref<32x128xf32, #tpu.memory_space<vmem>>, vector<32x128xf32>
    "tpu.trace_start"() <{level = 10 : i32, message = "ne,nf->ef"}> : () -> ()
    %cst_24 = arith.constant dense<0.000000e+00> : vector<128x128xf32>
    %42 = tpu.matmul %40, %41, %cst_24 {dimension_numbers = #tpu.dot_dimension_numbers<[0], [0], [1], [1], [0, 1, 1, 1], [], []>} : vector<32x128xf32>, vector<32x128xf32>, vector<128x128xf32> -> vector<128x128xf32>
    "tpu.trace_stop"() : () -> ()
    %43 = arith.mulf %42, %33 : vector<128x128xf32>
    %44 = vector.broadcast %35 : vector<1x128xi32> to vector<32x128xi32>
    %45 = arith.cmpi eq, %36, %44 : vector<32x128xi32>
    %46 = arith.extui %45 : vector<32x128xi1> to vector<32x128xi32>
    %47 = arith.sitofp %46 : vector<32x128xi32> to vector<32x128xf32>
    %c0_25 = arith.constant 0 : index
    %c0_26 = arith.constant 0 : index
    %48 = vector.load %arg14[%c0_25, %c0_26] : memref<32x128xf32, #tpu.memory_space<vmem>>, vector<32x128xf32>
    %cst_27 = arith.constant dense<0.000000e+00> : vector<32x128xf32>
    %49 = tpu.matmul %47, %43, %cst_27 {dimension_numbers = #tpu.dot_dimension_numbers<[1], [0], [0], [1], [0, 0, 1, 1], [], []>} : vector<32x128xf32>, vector<128x128xf32>, vector<32x128xf32> -> vector<32x128xf32>
    %50 = arith.addf %48, %49 : vector<32x128xf32>
    %c0_28 = arith.constant 0 : index
    %c0_29 = arith.constant 0 : index
    %51 = vector.load %arg14[%c0_28, %c0_29] : memref<32x128xf32, #tpu.memory_space<vmem>>, vector<32x128xf32>
    tpu.vector_store %arg14[%c0_28, %c0_29], %50 {strides = array<i32>} : memref<32x128xf32, #tpu.memory_space<vmem>>, vector<32x128xf32>,
    %c2_i32 = arith.constant 2 : i32
    %52 = arith.cmpi eq, %arg0, %c2_i32 : i32
    %53 = arith.extui %52 : i1 to i32
    %c0_i32_30 = arith.constant 0 : i32
    %54 = arith.cmpi ne, %53, %c0_i32_30 : i32
    scf.if %54 {
      %c0_31 = arith.constant 0 : index
      %c0_32 = arith.constant 0 : index
      %55 = vector.load %arg14[%c0_31, %c0_32] : memref<32x128xf32, #tpu.memory_space<vmem>>, vector<32x128xf32>
      %c0_33 = arith.constant 0 : index
      %c0_34 = arith.constant 0 : index
      %56 = vector.load %arg10[%c0_33, %c0_34] : memref<128x128xf32, #tpu.memory_space<vmem>>, vector<128x128xf32>
      %cst_35 = arith.constant dense<0.000000e+00> : vector<32x128xf32>
      %57 = tpu.matmul %55, %56, %cst_35 {dimension_numbers = #tpu.dot_dimension_numbers<[1], [0], [0], [1], [0, 0, 1, 1], [], []>} : vector<32x128xf32>, vector<128x128xf32>, vector<32x128xf32> -> vector<32x128xf32>
      %c0_36 = arith.constant 0 : index
      %c0_37 = arith.constant 0 : index
      %58 = vector.load %arg11[%c0_36, %c0_37] : memref<1x128xf32, #tpu.memory_space<vmem>>, vector<1x128xf32>
      %59 = vector.broadcast %58 : vector<1x128xf32> to vector<32x128xf32>
      %60 = arith.addf %57, %59 : vector<32x128xf32>
      %c0_38 = arith.constant 0 : index
      %c0_39 = arith.constant 0 : index
      %61 = vector.load %arg12[%c0_38, %c0_39] : memref<32x128xf32, #tpu.memory_space<vmem>>, vector<32x128xf32>
      tpu.vector_store %arg12[%c0_38, %c0_39], %60 {strides = array<i32>} : memref<32x128xf32, #tpu.memory_space<vmem>>, vector<32x128xf32>,
    } else {
    }
    return
  }
  func.func @transform_0(%arg0: i32) -> (i32, i32) {
    %c0_i32 = arith.constant 0 : i32
    %c0_i32_0 = arith.constant 0 : i32
    %c0_i32_1 = arith.constant 0 : i32
    return %c0_i32, %c0_i32_0 : i32, i32
  }
  func.func @transform_1(%arg0: i32) -> (i32, i32) {
    %c0_i32 = arith.constant 0 : i32
    %c0_i32_0 = arith.constant 0 : i32
    return %arg0, %c0_i32 : i32, i32
  }
  func.func @transform_2(%arg0: i32) -> (i32, i32) {
    %c0_i32 = arith.constant 0 : i32
    %c0_i32_0 = arith.constant 0 : i32
    return %arg0, %c0_i32 : i32, i32
  }
  func.func @transform_3(%arg0: i32) -> (i32, i32) {
    %c0_i32 = arith.constant 0 : i32
    %c0_i32_0 = arith.constant 0 : i32
    return %c0_i32, %arg0 : i32, i32
  }
  func.func @transform_4(%arg0: i32) -> (i32, i32) {
    %c0_i32 = arith.constant 0 : i32
    %c0_i32_0 = arith.constant 0 : i32
    %c0_i32_1 = arith.constant 0 : i32
    return %c0_i32, %c0_i32_0 : i32, i32
  }
  func.func @transform_5(%arg0: i32) -> (i32, i32) {
    %c0_i32 = arith.constant 0 : i32
    %c0_i32_0 = arith.constant 0 : i32
    %c0_i32_1 = arith.constant 0 : i32
    return %c0_i32, %c0_i32_0 : i32, i32
  }
  func.func @transform_6(%arg0: i32) -> (i32, i32) {
    %c0_i32 = arith.constant 0 : i32
    %c0_i32_0 = arith.constant 0 : i32
    %c0_i32_1 = arith.constant 0 : i32
    return %c0_i32, %c0_i32_0 : i32, i32
  }
  func.func @transform_7(%arg0: i32) -> (i32, i32) {
    %c0_i32 = arith.constant 0 : i32
    %c0_i32_0 = arith.constant 0 : i32
    %c0_i32_1 = arith.constant 0 : i32
    return %c0_i32, %c0_i32_0 : i32, i32
  }
  func.func @transform_8(%arg0: i32) -> (i32, i32) {
    %c0_i32 = arith.constant 0 : i32
    %c0_i32_0 = arith.constant 0 : i32
    %c0_i32_1 = arith.constant 0 : i32
    return %c0_i32, %c0_i32_0 : i32, i32
  }
  func.func @transform_9(%arg0: i32) -> (i32, i32) {
    %c0_i32 = arith.constant 0 : i32
    %c0_i32_0 = arith.constant 0 : i32
    %c0_i32_1 = arith.constant 0 : i32
    return %c0_i32, %c0_i32_0 : i32, i32
  }
  func.func @transform_10(%arg0: i32) -> (i32, i32) {
    %c0_i32 = arith.constant 0 : i32
    %c0_i32_0 = arith.constant 0 : i32
    %c0_i32_1 = arith.constant 0 : i32
    return %c0_i32, %c0_i32_0 : i32, i32
  }
  func.func @transform_11(%arg0: i32) -> (i32, i32) {
    %c0_i32 = arith.constant 0 : i32
    %c0_i32_0 = arith.constant 0 : i32
    %c0_i32_1 = arith.constant 0 : i32
    return %c0_i32, %c0_i32_0 : i32, i32
  }
}

</mosaic_0001>

<bundles_post_ra>
// kernel: tpu_custom_call.1
= control target key start
LH: loop header
LB: loop body
LE: loop exit
PB: predicated region body
PF: predicated region fallthrough
CT: control target
= control target key end

     0   :  { %s7314_s0 = inlined_call_operand.hbm [shape: f32[32,128], index: 0, kind: input, shape index: {}]   ;;  %s7315_s1 = inlined_call_operand.vmem [shape: f32[384,1], index: 1, kind: input, shape index: {}]   ;;  %s7316_s2 = inlined_call_operand.vmem [shape: f32[384,128], index: 2, kind: input, shape index: {}]   ;;  %s7317_s3 = inlined_call_operand.hbm [shape: s32[2,384], index: 3, kind: input, shape index: {}]   ;;  %s7318_s4 = inlined_call_operand.hbm [shape: f32[128,128], index: 4, kind: input, shape index: {}]   ;;  %s7319_s5 = inlined_call_operand.hbm [shape: f32[128,128], index: 5, kind: input, shape index: {}]   ;;  %s7320_s6 = inlined_call_operand.vmem [shape: f32[1,128], index: 6, kind: input, shape index: {}]   ;;  %s7321_s7 = inlined_call_operand.hbm [shape: f32[128,128], index: 7, kind: input, shape index: {}]   ;;  %s7322_s8 = inlined_call_operand.vmem [shape: f32[1,128], index: 8, kind: input, shape index: {}]   ;;  %s7323_s9 = inlined_call_operand.hbm [shape: f32[128,128], index: 9, kind: input, shape index: {}]   ;;  %s7324_s10 = inlined_call_operand.vmem [shape: f32[1,128], index: 10, kind: input, shape index: {}]   ;;  %s7325_s11 = inlined_call_operand.hbm [shape: f32[32,128], index: 11, kind: output, shape index: {}]  }
   0x1   :  { %7326 = sst [smem:[#allocation22_spill]] %s7314_s0 }
   0x2   :  { %7327 = sst [smem:[#allocation23_spill]] %s7318_s4 }
   0x3   :  { %7328 = sst [smem:[#allocation24_spill]] %s7319_s5 }
   0x4   :  { %16 = vsyncpa [#allocation5], 0 }
   0x5   :  { %17 = vsyncpa [#allocation8], 0 }
   0x6   :  { %19 = vsyncpa [#allocation8 + $0x1], 0 }
   0x7   :  { %20 = vsyncpa [#allocation11], 0 }
   0x8   :  { %21 = vsyncpa [#allocation14], 0 }
   0x9   :  { %22 = vsyncpa [#allocation6], 0  ;;  %s4826_s17 = smov 0   ;;  %s4828_s18 = smov 0  }
   0xa   :  { %s4830_s19 = smov 0   ;;  %s4832_s20 = smov 0  }
   0xb LB: > { %s4847_s21 = sadd.s32 4294967295, %s4744_s20   ;;  %p4083_p0 = scmp.ge.s32.totalorder %s4744_s20, 1  ;;  %s4744_s20 = sphi %s4832_s20, %s7383_s20   ;;  %s4740_s19 = sphi %s4830_s19, %s7382_s19   ;;  %s4736_s18 = sphi %s4828_s18, %s7381_s18   ;;  %s4732_s17 = sphi %s4826_s17, %s7380_s17  }
   0xc   : > { %p122_p1 = scmp.eq.s32.totalorder %s4847_s21, 0  ;;  %p300_p2 = scmp.lt.s32.totalorder %s4744_s20, 4 }
   0xd   : > { %p4084_p3 = scmp.ne.s32.totalorder %s4847_s21, 0  ;;  %s7329_s4 = sld [smem:[#allocation23_spill]] }
   0xe   : > { %p4856_p4 = pnand %p4083_p0, %p300_p2  ;;  %s4746_s26 = smov [#allocation9]  }
   0xf   : > { %s327_s27 = sshll.u32 %s4746_s26, 4  ;;  %s7331_s5 = sld [smem:[#allocation24_spill]]  ;;  %s328_s27 = int_to_ptr.vmem [resolvable:$true] %s327_s27 }
  0x10   : > { %p4323_p5 = pneg %p4856_p4  ;;  %s7333_s0 = sld [smem:[#allocation22_spill]] }
  0x11   : > { %s4747_s16 = smov [#allocation10]   ;;  %s4748_s23 = smov 128  }
  0x12   : > { %p4867_p6 = pnand %p4323_p5, %p122_p1  ;;  %s341_s22 = sshll.u32 %s4747_s16, 4  ;;  %s342_s22 = int_to_ptr.vmem [resolvable:$true] %s341_s22 }
  0x13   : > { %s325_s24 = sshll.u32 %s7329_s4, 4  ;;  %s4749_s26 = smov 8   ;;  %s326_s24 = int_to_ptr.hbm [resolvable:$true] %s325_s24 }
  0x14   : > { %4329 = dma.hbm_to_vmem [thread:$0]  (!%p4867_p6), %s326_s24, 2048, %s328_s27, [#allocation8], %s4748_s23, %s4748_s23, %s4749_s26  }
  0x15   : > { %s339_s30 = sshll.u32 %s7331_s5, 4  ;;  %s356_s4 = sshll.u32 %s7321_s7, 4  ;;  %s340_s30 = int_to_ptr.hbm [resolvable:$true] %s339_s30  ;;  %s357_s4 = int_to_ptr.hbm [resolvable:$true] %s356_s4 }
  0x16   : > { %s311_s15 = sshll.u32 %s7333_s0, 4  ;;  %s4750_s5 = smov [#allocation4]   ;;  %s312_s15 = int_to_ptr.hbm [resolvable:$true] %s311_s15 }
  0x17   : > { %4332 = dma.hbm_to_vmem [thread:$0]  (!%p4867_p6), %s340_s30, 2048, %s342_s22, [#allocation11], %s4748_s23, %s4748_s23, %s4749_s26  }
  0x18   : > { %s313_s13 = sshll.u32 %s4750_s5, 4  ;;  %s4751_s24 = smov [#allocation12]   ;;  %s314_s13 = int_to_ptr.vmem [resolvable:$true] %s313_s13 }
  0x19   : > { %4326 = dma.hbm_to_vmem [thread:$0]  (!%p4867_p6), %s312_s15, 512, %s314_s13, [#allocation5], %s4748_s23, %s4748_s23, %s4749_s26  }
  0x1a   : > { %s358_s27 = sshll.u32 %s4751_s24, 4  ;;  %s373_s16 = sshll.u32 %s7323_s9, 4  ;;  %s359_s27 = int_to_ptr.vmem [resolvable:$true] %s358_s27  ;;  %s374_s16 = int_to_ptr.hbm [resolvable:$true] %s373_s16 }
  0x1b   : > { %4335 = dma.hbm_to_vmem [thread:$0]  (!%p4867_p6), %s357_s4, 2048, %s359_s27, [#allocation11], %s4748_s23, %s4748_s23, %s4749_s26  }
  0x1c   : > { %s4752_s5 = smov [#allocation13]   ;;  %s4891_s22 = sadd.s32 1, %s4744_s20  }
  0x1d   : > { %s375_s15 = sshll.u32 %s4752_s5, 4  ;;  %s105_s28 = ssub.s32 %s4744_s20, %s4891_s22  ;;  %s376_s15 = int_to_ptr.vmem [resolvable:$true] %s375_s15 }
  0x1e   : > { %4338 = dma.hbm_to_vmem [thread:$0]  (!%p4867_p6), %s374_s16, 2048, %s376_s15, [#allocation14], %s4748_s23, %s4748_s23, %s4749_s26  }
  0x1f   : > { %s108_s29 = sadd.s32 1, %s4740_s19  ;;  %p106_p7 = scmp.eq.s32.totalorder %s105_s28, 0 }
  0x20   : > { %p115_p8 = scmp.ne.s32.totalorder %s4740_s19, %s4736_s18  ;;  %p116_p9 = scmp.eq.s32.totalorder %s4744_s20, 0 }
  0x21   : > { %p121_p10 = scmp.ne.s32.totalorder %s4736_s18, %s4732_s17  ;;  %p4348_p13 = scmp.lt.s32.totalorder %s4744_s20, 3 }
  0x22   : > { %s4902_s13 = scalar_select %p106_p7, %s4740_s19, %s108_s29  }
  0x23   : > { %p4906_p11 = por %p122_p1, %p121_p10  ;;  %p117_p12 = por %p116_p9, %p115_p8 }
  0x24   : > { %s410_s12 = sand.u32 1, %s4744_s20   ;;  %s412_s23 = sand.u32 1, %s4740_s19  }
  0x25   : > { %s4090_s26 = sshll.u32 %s412_s23, 1  ;;  %s4091_s24 = sshll.u32 %s4744_s20, 1 }
  0x26   : > { %s418_s14 = scalar_lea.hbm %s7317_s3, %s4091_s24  ;;  %s414_s5 = scalar_lea.vmem [#allocation7], %s4090_s26 }
  0x27   : > { %s420_s16 = sshll.u32 %s418_s14, 4  ;;  %s422_s17 = sshll.u32 %s414_s5, 4  ;;  %s421_s16 = int_to_ptr.hbm [resolvable:$true] %s420_s16  ;;  %s423_s17 = int_to_ptr.vmem [resolvable:$true] %s422_s17 }
  0x28   : > { %p4917_p0 = pnand %p4348_p13, %p117_p12  ;;  %s411_s28 = scalar_lea.sflag [#allocation8], %s410_s12 }
  0x29   : > { %s4632_s29 = sshra.s32 %s421_s16, 4  ;;  %s4639_s26 = scalar_lea.hbm %s7317_s3, 6  ;;  %s4633_s29 = int_to_ptr.hbm [resolvable:$true] %s4632_s29 }
  0x2a   : > { %s4634_s0 = scalar_lea.hbm %s4633_s29, 2  ;;  %p4636_p5 = pneg %p4917_p0 }
  0x2b   : > { %p4635_p2 = scmp.ne.s32.totalorder %s4633_s29, %s4634_s0  ;;  %p4640_p8 = scmp.lt.s32.totalorder %s4633_s29, %s7317_s3 }
  0x2c   : > { %p4641_p9 = scmp.lt.s32.totalorder %s4639_s26, %s4634_s0 }
  0x2d   : > { %p4637_p6 = pnand %p4636_p5, %p4635_p2 }
  0x2e   : > { %p4642_p10 = por %p4641_p9, %p4640_p8 }
  0x2f   : > { %p4638_p7 = pneg %p4637_p6 }
  0x31   : > { %p4643_p12 = pnand %p4642_p10, %p4638_p7 }
  0x33   : > { %4646 = shalt.err (!%p4643_p12)
}
  0x34   : > { %4342 = dma.hbm_to_vmem [thread:$0]  (!%p4917_p0), %s421_s16, 32, %s423_s17, %s411_s28  }
  0x35   : > { %431 = sbr.rel (%p4856_p4) target bundleno = 1459 (0x5b3), region = 64 }
  0x3a   : > { %4707 = dma.done.wait (%p122_p1), [#allocation5], 512  }
  0x3b   : > { %4709 = vsyncadd (%p122_p1), [#allocation5], 4294966784  ;;  %s438_s12 = sand.u32 1, %s4847_s21   ;;  %s440_s0 = sand.u32 1, %s4736_s18  }
  0x3c   : > { %s4939_s30 = sshll.u32 %s440_s0, 1  ;;  %s439_s14 = scalar_lea.sflag [#allocation8], %s438_s12 }
  0x3d   : > { %s442_s5 = scalar_lea.vmem [#allocation7], %s4939_s30 }
  0x3e   : > { %4711 = dma.done.wait (%p4906_p11), %s439_s14, 32  }
  0x3f   : > { %4713 = vsyncadd (%p4906_p11), %s439_s14, 4294967264 }
  0x40   : > { %4715 = dma.done.wait (%p122_p1), [#allocation8], 2048  }
  0x41   : > { %4717 = vsyncadd (%p122_p1), [#allocation8], 4294965248 }
  0x42   : > { %4719 = dma.done.wait (%p122_p1), [#allocation11], 4096  }
  0x43   : > { %4721 = vsyncadd (%p122_p1), [#allocation11], 4294963200 }
  0x44   : > { %4723 = dma.done.wait (%p122_p1), [#allocation14], 2048  }
  0x45   : > { %4725 = vsyncadd (%p122_p1), [#allocation14], 4294965248  ;;  %s4099_s25 = sshll.u32 %s4847_s21, 4 }
  0x46   : > { %p508_p4 = scmp.lt.s32.totalorder %s4099_s25, 47  ;;  %522 = sbr.rel (%p4084_p3) target bundleno = 241 (0xf1), region = 92 }
  0x48   : > { %s7385_s25 = smov (!%p508_p4, %s4099_s25), 47 }
  0x49   : > { %s4100_s4 = sshll.u32 %s7385_s25, 3 }
  0x4a   : > { %s4962_s15 = scalar_lea.vmem %s7315_s1, %s4100_s4  ;;  %s4967_s20 = scalar_lea.vmem %s7316_s2, %s4100_s4 }
  0x4b   : > { %v542_v0 = vld [vmem:[#allocation9 + $0x78] sm:$0xff]  ;;  %v541_v1 = vld [vmem:[#allocation9 + $0x70] sm:$0xff]  ;;  %v540_v2 = vld [vmem:[#allocation9 + $0x68] sm:$0xff]  ;;  %v4753_v20 = vmov 0.0  }
  0x4c   : > { %4202 = vmatpush.msra.mxu2 %v542_v0  ;;  %4203 = vmatpush.msra.mxu3 %v542_v0  ;;  %v539_v3 = vld [vmem:[#allocation9 + $0x60] sm:$0xff]  ;;  %v538_v4 = vld [vmem:[#allocation9 + $0x58] sm:$0xff]  ;;  %v537_v5 = vld [vmem:[#allocation9 + $0x50] sm:$0xff]  ;;  %576 = vst [vmem:[#allocation3] sm:$0xff] %v4753_v20 }
  0x4d   : > { %543 = vmatpush.msra.mxu0 %v542_v0  ;;  %4201 = vmatpush.msra.mxu1 %v542_v0  ;;  %v536_v6 = vld [vmem:[#allocation9 + $0x48] sm:$0xff]  ;;  %v535_v7 = vld [vmem:[#allocation9 + $0x40] sm:$0xff]  ;;  %v534_v8 = vld [vmem:[#allocation9 + $0x38] sm:$0xff]  ;;  %577 = vst [vmem:[#allocation3 + $0x18] sm:$0xff] %v4753_v20 }
  0x4e   : > { %4205 = vmatpush.msra.mxu2 %v541_v1  ;;  %4206 = vmatpush.msra.mxu3 %v541_v1  ;;  %v533_v9 = vld [vmem:[#allocation9 + $0x30] sm:$0xff]  ;;  %v532_v10 = vld [vmem:[#allocation9 + $0x28] sm:$0xff]  ;;  %v531_v11 = vld [vmem:[#allocation9 + $0x20] sm:$0xff]  ;;  %578 = vst [vmem:[#allocation3 + $0x8] sm:$0xff] %v4753_v20 }
  0x4f   : > { %544 = vmatpush.msra.mxu0 %v541_v1  ;;  %4204 = vmatpush.msra.mxu1 %v541_v1  ;;  %v530_v12 = vld [vmem:[#allocation9 + $0x18] sm:$0xff]  ;;  %v529_v13 = vld [vmem:[#allocation9 + $0x10] sm:$0xff]  ;;  %v528_v14 = vld [vmem:[#allocation9 + $0x8] sm:$0xff]  ;;  %579 = vst [vmem:[#allocation3 + $0x10] sm:$0xff] %v4753_v20 }
  0x50   : > { %4208 = vmatpush.msra.mxu2 %v540_v2  ;;  %4209 = vmatpush.msra.mxu3 %v540_v2  ;;  %v527_v15 = vld [vmem:[#allocation9] sm:$0xff]  ;;  %v525_v16 = vld [vmem:[#allocation4 + $0x10] sm:$0xff]  ;;  %v526_v17 = vld [vmem:[#allocation4 + $0x18] sm:$0xff] }
  0x51   : > { %545 = vmatpush.msra.mxu0 %v540_v2  ;;  %4207 = vmatpush.msra.mxu1 %v540_v2  ;;  %v523_v18 = vld [vmem:[#allocation4] sm:$0xff]  ;;  %v524_v19 = vld [vmem:[#allocation4 + $0x8] sm:$0xff] }
  0x52   : > { %4211 = vmatpush.msra.mxu2 %v539_v3  ;;  %4212 = vmatpush.msra.mxu3 %v539_v3 }
  0x53   : > { %546 = vmatpush.msra.mxu0 %v539_v3  ;;  %4210 = vmatpush.msra.mxu1 %v539_v3 }
  0x54   : > { %4214 = vmatpush.msra.mxu2 %v538_v4  ;;  %4215 = vmatpush.msra.mxu3 %v538_v4 }
  0x55   : > { %547 = vmatpush.msra.mxu0 %v538_v4  ;;  %4213 = vmatpush.msra.mxu1 %v538_v4 }
  0x56   : > { %4217 = vmatpush.msra.mxu2 %v537_v5  ;;  %4218 = vmatpush.msra.mxu3 %v537_v5 }
  0x57   : > { %548 = vmatpush.msra.mxu0 %v537_v5  ;;  %4216 = vmatpush.msra.mxu1 %v537_v5 }
  0x58   : > { %4220 = vmatpush.msra.mxu2 %v536_v6  ;;  %4221 = vmatpush.msra.mxu3 %v536_v6 }
  0x59   : > { %549 = vmatpush.msra.mxu0 %v536_v6  ;;  %4219 = vmatpush.msra.mxu1 %v536_v6 }
  0x5a   : > { %4223 = vmatpush.msra.mxu2 %v535_v7  ;;  %4224 = vmatpush.msra.mxu3 %v535_v7 }
  0x5b   : > { %550 = vmatpush.msra.mxu0 %v535_v7  ;;  %4222 = vmatpush.msra.mxu1 %v535_v7 }
  0x5c   : > { %4226 = vmatpush.msra.mxu2 %v534_v8  ;;  %4227 = vmatpush.msra.mxu3 %v534_v8 }
  0x5d   : > { %551 = vmatpush.msra.mxu0 %v534_v8  ;;  %4225 = vmatpush.msra.mxu1 %v534_v8 }
  0x5e   : > { %4229 = vmatpush.msra.mxu2 %v533_v9  ;;  %4230 = vmatpush.msra.mxu3 %v533_v9 }
  0x5f   : > { %552 = vmatpush.msra.mxu0 %v533_v9  ;;  %4228 = vmatpush.msra.mxu1 %v533_v9 }
  0x60   : > { %4232 = vmatpush.msra.mxu2 %v532_v10  ;;  %4233 = vmatpush.msra.mxu3 %v532_v10 }
  0x61   : > { %553 = vmatpush.msra.mxu0 %v532_v10  ;;  %4231 = vmatpush.msra.mxu1 %v532_v10 }
  0x62   : > { %4235 = vmatpush.msra.mxu2 %v531_v11  ;;  %4236 = vmatpush.msra.mxu3 %v531_v11 }
  0x63   : > { %554 = vmatpush.msra.mxu0 %v531_v11  ;;  %4234 = vmatpush.msra.mxu1 %v531_v11 }
  0x64   : > { %4238 = vmatpush.msra.mxu2 %v530_v12  ;;  %4239 = vmatpush.msra.mxu3 %v530_v12 }
  0x65   : > { %555 = vmatpush.msra.mxu0 %v530_v12  ;;  %4237 = vmatpush.msra.mxu1 %v530_v12 }
  0x66   : > { %4241 = vmatpush.msra.mxu2 %v529_v13  ;;  %4242 = vmatpush.msra.mxu3 %v529_v13 }
  0x67   : > { %556 = vmatpush.msra.mxu0 %v529_v13  ;;  %4240 = vmatpush.msra.mxu1 %v529_v13 }
  0x68   : > { %4244 = vmatpush.msra.mxu2 %v528_v14  ;;  %4245 = vmatpush.msra.mxu3 %v528_v14 }
  0x69   : > { %557 = vmatpush.msra.mxu0 %v528_v14  ;;  %4243 = vmatpush.msra.mxu1 %v528_v14 }
  0x6a   : > { %4247 = vmatpush.msra.mxu2 %v527_v15  ;;  %4248 = vmatpush.msra.mxu3 %v527_v15 }
  0x6b   : > { %565 = vmatmul.f32.vlgmr.msra.gmra.mxu2 %v525_v16  ;;  %568 = vmatmul.f32.vlgmr.msra.gmra.mxu3 %v526_v17 }
  0x6c   : > { %558 = vmatpush.msra.mxu0 %v527_v15  ;;  %4246 = vmatpush.msra.mxu1 %v527_v15 }
  0x6d   : > { %559 = vmatmul.f32.vlgmr.msra.gmra.mxu0 %v523_v18  ;;  %562 = vmatmul.f32.vlgmr.msra.gmra.mxu1 %v524_v19 }
  0xea   : > { %v560_v21 = vpop.f32.mrf.mxu0  ;;  %v563_v22 = vpop.f32.mrf.mxu1 }
  0xeb   : > { %572 = vst [vmem:[#allocation2 + $0x10] sm:$0xff] %v560_v21 }
  0xec   : > { %573 = vst [vmem:[#allocation2] sm:$0xff] %v563_v22 }
  0xee   : > { %v566_v23 = vpop.f32.mrf.mxu2  ;;  %v569_v24 = vpop.f32.mrf.mxu3 }
  0xef   : > { %574 = vst [vmem:[#allocation2 + $0x18] sm:$0xff] %v566_v23 }
  0xf0   : > { %575 = vst [vmem:[#allocation2 + $0x8] sm:$0xff] %v569_v24 }
  0xf1 PF: > { %v3139_v25 = vld [vmem:[#allocation10 + $0x78] sm:$0xff]  ;;  %v3138_v26 = vld [vmem:[#allocation10 + $0x70] sm:$0xff]  ;;  %v3648_v27 = vlaneseq  ;;  %v3137_v28 = vld [vmem:[#allocation10 + $0x68] sm:$0xff]  ;;  %v4754_v34 = vmov 0.0   ;;  %v4755_v3 = vmov 2102212464  }
  0xf2   : > { %3144 = vmatpush.msra.mxu0 %v3139_v25  ;;  %v3136_v30 = vld [vmem:[#allocation10 + $0x60] sm:$0xff]  ;;  %v4411_v31 = vld [vmem:[%s442_s5] ss:$0 sm:$0xff]  ;;  %v3134_v36 = vld [vmem:[#allocation10 + $0x50] sm:$0xff]  ;;  %v4756_v8 = vmov 683565275  }
  0xf3   : > { %v4971_v29 = vshrl.u32 %v3648_v27, 7  ;;  %v3135_v32 = vld [vmem:[#allocation10 + $0x58] sm:$0xff]  ;;  %v3133_v37 = vld [vmem:[#allocation10 + $0x48] sm:$0xff]  ;;  %v3132_v39 = vld [vmem:[#allocation10 + $0x40] sm:$0xff]  ;;  %v4757_v10 = vmov 2475754826  }
  0xf4   : > { %3145 = vmatpush.msra.mxu0 %v3138_v26  ;;  %v595_v38 = vld [vmem:[%s4962_s15 + $0x78] sm:$0xff]  ;;  %v3129_v47 = vld [vmem:[#allocation10 + $0x28] sm:$0xff]  ;;  %v3128_v51 = vld [vmem:[#allocation10 + $0x20] sm:$0xff]  ;;  %v4758_v13 = vmov 2131351028   ;;  %p4196_p1 = scmp.ne.s32.totalorder %s4847_s21, 2 }
  0xf5   : > { %vm3654_vm0 = vcmp.eq.s32.totalorder %v4971_v29, %v4411_v31  ;;  %v4977_v33 = vadd.s32 8, %v4971_v29  ;;  %v4981_v40 = vmul.f32 0.62831855, %v595_v38  ;;  %v3131_v42 = vld [vmem:[#allocation10 + $0x38] sm:$0xff]  ;;  %v4984_v43 = vadd.s32 16, %v4971_v29  ;;  %v3130_v45 = vld [vmem:[#allocation10 + $0x30] sm:$0xff] }
  0xf6   : > { %3146 = vmatpush.msra.mxu0 %v3137_v28  ;;  %v4168_v35 = vsel %vm3654_vm0, 1.0, %v4754_v34  ;;  %v4989_v49 = vadd.s32 24, %v4971_v29  ;;  %v594_v50 = vld [vmem:[%s4962_s15 + $0x70] sm:$0xff]  ;;  %v3127_v55 = vld [vmem:[#allocation10 + $0x18] sm:$0xff]  ;;  %v3124_v62 = vld [vmem:[#allocation10] sm:$0xff] }
  0xf7   : > { %3670 = vxpose.xlu0.b32.start [1/4] (short) %v4168_v35, 128  ;;  %vm3655_vm1 = vcmp.eq.s32.totalorder %v4977_v33, %v4411_v31  ;;  %v2925_v44 = vand.u32 2139095040, %v4981_v40  ;;  %vm3656_vm2 = vcmp.eq.s32.totalorder %v4984_v43, %v4411_v31  ;;  %v4992_v53 = vmul.f32 0.62831855, %v594_v50  ;;  %v3126_v58 = vld [vmem:[#allocation10 + $0x10] sm:$0xff]  ;;  %v3125_v61 = vld [vmem:[#allocation10 + $0x8] sm:$0xff]  ;;  %v3108_v5 = vld [vmem:[%s4967_s20] sm:$0xff] }
  0xf8   : > { %3147 = vmatpush.msra.mxu0 %v3136_v30  ;;  %v4169_v41 = vsel %vm3655_vm1, 1.0, %v4754_v34  ;;  %v4170_v54 = vsel %vm3656_vm2, 1.0, %v4754_v34  ;;  %vm3657_vm4 = vcmp.eq.s32.totalorder %v4989_v49, %v4411_v31  ;;  %v2922_v2 = vand.u32 2147483647, %v4981_v40 }
  0xf9   : > { %v2926_v46 = vshrl.u32 %v2925_v44, 23  ;;  %v2771_v56 = vand.u32 2139095040, %v4992_v53  ;;  %v4171_v63 = vsel %vm3657_vm4, 1.0, %v4754_v34  ;;  %v4759_v18 = vmov 920167782  }
  0xfa   : > { %3148 = vmatpush.msra.mxu0 %v3135_v32  ;;  %v2929_v6 = vand.u32 8388607, %v2922_v2  ;;  %v4760_v23 = vmov 1326507024   ;;  %v2768_v34 = vand.u32 2147483647, %v4992_v53 }
  0xfb   : > { %v4149_v48 = vadd.s32 4294967169, %v2926_v46  ;;  %v2772_v60 = vshrl.u32 %v2771_v56, 23 }
  0xfc   : > { %3149 = vmatpush.msra.mxu0 %v3134_v36  ;;  %v2930_v16 = vor.u32 8388608, %v2929_v6 }
  0xfd   : > { %v2932_v52 = vadd.s32 1, %v4149_v48  ;;  %v4146_v1 = vadd.s32 4294967169, %v2772_v60  ;;  %v4761_v60 = vmov 0  }
  0xfe   : > { %3150 = vmatpush.msra.mxu0 %v3133_v37  ;;  %v5033_v30 = vshll.u32 %v2930_v16, 8  ;;  %4408 = vset.pattern.permute.xlu1 %v4761_v60 }
  0xff   : > { %3671 = vxpose.xlu0.b32.cont [2/4] (short) %v4169_v41, 128  ;;  %vm2933_vm3 = vcmp.gt.s32.totalorder %v2932_v52, 0  ;;  %v2778_v35 = vadd.s32 1, %v4146_v1  ;;  %4409 = vset.pattern.permute.xlu2 %v4761_v60 }
 0x100   : > { %3151 = vmatpush.msra.mxu0 %v3132_v39  ;;  %v2934_v57 = vsel %vm2933_vm3, %v2932_v52, 0  ;;  %v2971_v38 = vand.u32 65535, %v5033_v30  ;;  %v3109_v39 = vld [vmem:[%s4967_s20 + $0x8] sm:$0xff]  ;;  %v2972_v44 = vshrl.u32 %v5033_v30, 16 }
 0x101   : > { %v2936_v59 = vand.u32 31, %v2934_v57  ;;  %v5003_v7 = vshrl.u32 %v2934_v57, 5  ;;  %vm2779_vm9 = vcmp.gt.s32.totalorder %v2778_v35, 0 }
 0x102   : > { %3152 = vmatpush.msra.mxu0 %v3131_v42  ;;  %v2780_v56 = vsel %vm2779_vm9, %v2778_v35, 0 }
 0x103   : > { %v4996_v0 = vsub.s32 32, %v2936_v59  ;;  %v2948_v4 = vshll.u32 %v4755_v3, %v2936_v59  ;;  %v2939_v9 = vshll.u32 %v4756_v8, %v2936_v59  ;;  %v2942_v12 = vshll.u32 %v4757_v10, %v2936_v59 }
 0x104   : > { %3153 = vmatpush.msra.mxu0 %v3130_v45  ;;  %v2945_v15 = vshll.u32 %v4758_v13, %v2936_v59  ;;  %v2951_v20 = vshll.u32 %v4759_v18, %v2936_v59  ;;  %vm2954_vm5 = vcmp.lt.s32.totalorder %v5003_v7, 1  ;;  %vm2955_vm6 = vcmp.lt.s32.totalorder %v5003_v7, 2 }
 0x105   : > { %v2940_v11 = vshrl.u32 %v4757_v10, %v4996_v0  ;;  %v2943_v14 = vshrl.u32 %v4758_v13, %v4996_v0  ;;  %v2946_v17 = vshrl.u32 %v4755_v3, %v4996_v0  ;;  %v2949_v19 = vshrl.u32 %v4759_v18, %v4996_v0 }
 0x106   : > { %3154 = vmatpush.msra.mxu0 %v3129_v47  ;;  %v2952_v24 = vshrl.u32 %v4760_v23, %v4996_v0  ;;  %vm2956_vm7 = vcmp.lt.s32.totalorder %v5003_v7, 3  ;;  %vm2957_vm8 = vcmp.lt.s32.totalorder %v5003_v7, 4  ;;  %v5061_v1 = vshrl.u32 %v2780_v56, 5 }
 0x107   : > { %3672 = vxpose.xlu0.b32.cont [3/4] (short) %v4170_v54, 128  ;;  %v5017_v21 = vor.u32 %v2940_v11, %v2939_v9  ;;  %v5019_v22 = vor.u32 %v2943_v14, %v2942_v12  ;;  %v5024_v25 = vor.u32 %v2946_v17, %v2945_v15  ;;  %v2950_v26 = vor.u32 %v2949_v19, %v2948_v4  ;;  %v3110_v14 = vld [vmem:[%s4967_s20 + $0x10] sm:$0xff] }
 0x108   : > { %3155 = vmatpush.msra.mxu0 %v3128_v51  ;;  %v2953_v27 = vor.u32 %v2952_v24, %v2951_v20  ;;  %v5058_v51 = vand.u32 8388607, %v2768_v34  ;;  %v2782_v12 = vand.u32 31, %v2780_v56  ;;  %vm2800_vm13 = vcmp.lt.s32.totalorder %v5061_v1, 1 }
 0x109   : > { %v2962_v28 = vsel %vm2954_vm5, %v5017_v21, %v5019_v22  ;;  %v2963_v31 = vsel %vm2957_vm8, %v2950_v26, 920167782  ;;  %v2966_v32 = vsel %vm2954_vm5, %v5019_v22, %v5024_v25  ;;  %vm2803_vm0 = vcmp.lt.s32.totalorder %v5061_v1, 4 }
 0x10a   : > { %3156 = vmatpush.msra.mxu0 %v3127_v55  ;;  %v2964_v36 = vsel %vm2956_vm7, %v5024_v25, %v2963_v31  ;;  %v2967_v37 = vsel %vm2957_vm8, %v2953_v27, 1326507024  ;;  %v2776_v11 = vor.u32 8388608, %v5058_v51  ;;  %v2938_v31 = vshrl.u32 %v4756_v8, %v4996_v0 }
 0x10b   : > { %v2965_v41 = vsel %vm2955_vm6, %v2962_v28, %v2964_v36  ;;  %v2968_v42 = vsel %vm2956_vm7, %v2950_v26, %v2967_v37  ;;  %v2959_v37 = vsel %vm2957_vm8, %v5024_v25, 2102212464  ;;  %v2794_v7 = vshll.u32 %v4755_v3, %v2782_v12 }
 0x10c   : > { %3157 = vmatpush.msra.mxu0 %v3126_v58  ;;  %v2969_v45 = vsel %vm2955_vm6, %v2966_v32, %v2968_v42  ;;  %v2995_v46 = vand.u32 65535, %v2965_v41  ;;  %v2996_v47 = vshrl.u32 %v2965_v41, 16  ;;  %v2785_v41 = vshll.u32 %v4756_v8, %v2782_v12 }
 0x10d   : > { %v2973_v48 = vand.u32 65535, %v2969_v45  ;;  %v2974_v50 = vshrl.u32 %v2969_v45, 16  ;;  %v2958_v42 = vsel %vm2954_vm5, %v2938_v31, %v5017_v21  ;;  %v2960_v0 = vsel %vm2956_vm7, %v5019_v22, %v2959_v37  ;;  %v3112_v31 = vld [vmem:[%s4967_s20 + $0x20] sm:$0xff] }
 0x10e   : > { %3158 = vmatpush.msra.mxu0 %v3125_v61  ;;  %v2997_v52 = vmul.u32 %v2995_v46, %v2971_v38  ;;  %v2998_v54 = vmul.u32 %v2996_v47, %v2971_v38  ;;  %v2999_v55 = vmul.u32 %v2995_v46, %v2972_v44  ;;  %v3000_v61 = vmul.u32 %v2996_v47, %v2972_v44 }
 0x10f   : > { %3673 = vxpose.xlu0.b32.end [4/4] (short) %v4171_v63, 128  ;;  %v2975_v57 = vmul.u32 %v2973_v48, %v2971_v38  ;;  %v2976_v58 = vmul.u32 %v2974_v50, %v2971_v38  ;;  %v2977_v59 = vmul.u32 %v2973_v48, %v2972_v44  ;;  %v2978_v4 = vmul.u32 %v2974_v50, %v2972_v44 }
 0x110   : > { %3159 = vmatpush.msra.mxu0 %v3124_v62  ;;  %v3001_v62 = vshll.u32 %v2998_v54, 16  ;;  %v3003_v63 = vshll.u32 %v2999_v55, 16  ;;  %v3002_v16 = vshrl.u32 %v2998_v54, 16  ;;  %v3004_v27 = vshrl.u32 %v2999_v55, 16  ;;  %v3111_v54 = vld [vmem:[%s4967_s20 + $0x18] sm:$0xff] }
 0x111   : > { %3160 = vmatmul.f32.vlgmr.msra.gmra.mxu0 %v3108_v5  ;;  %v2979_v5 = vshll.u32 %v2976_v58, 16  ;;  %v2981_v6 = vshll.u32 %v2977_v59, 16  ;;  %v2980_v19 = vshrl.u32 %v2976_v58, 16  ;;  %v2982_v32 = vshrl.u32 %v2977_v59, 16 }
 0x112   : > { %vm3005_vm10 = vc.u32 %v2997_v52, %v3001_v62  ;;  %v3007_v9 = vadd.s32 %v3001_v62, %v2997_v52  ;;  %v2961_v46 = vsel %vm2955_vm6, %v2958_v42, %v2960_v0  ;;  %v2788_v48 = vshll.u32 %v4757_v10, %v2782_v12 }
 0x113   : > { %vm2983_vm11 = vc.u32 %v2975_v57, %v2979_v5  ;;  %v2985_v15 = vadd.s32 %v2979_v5, %v2975_v57  ;;  %v3006_v17 = vsel %vm3005_vm10, 1, %v4761_v60  ;;  %v3015_v51 = vmul.u32 %v5033_v30, %v2961_v46 }
 0x114   : > { %v2984_v20 = vsel %vm2983_vm11, 1, %v4761_v60  ;;  %v3008_v24 = vadd.s32 %v3006_v17, %v3000_v61  ;;  %vm3009_vm12 = vc.u32 %v3007_v9, %v3003_v63  ;;  %v5083_v44 = vadd.s32 %v3007_v9, %v3003_v63 }
 0x115   : > { %v2986_v26 = vadd.s32 %v2984_v20, %v2978_v4  ;;  %vm2987_vm14 = vc.u32 %v2985_v15, %v2981_v6  ;;  %v3010_v28 = vsel %vm3009_vm12, 1, %v4761_v60  ;;  %v2791_v52 = vshll.u32 %v4758_v13, %v2782_v12 }
 0x116   : > { %v2988_v35 = vsel %vm2987_vm14, 1, %v4761_v60  ;;  %v3012_v36 = vadd.s32 %v3010_v28, %v3008_v24  ;;  %v2797_v61 = vshll.u32 %v4759_v18, %v2782_v12  ;;  %vm2802_vm1 = vcmp.lt.s32.totalorder %v5061_v1, 3  ;;  %v591_v28 = vld [vmem:[%s4962_s15 + $0x58] sm:$0xff] }
 0x117   : > { %v2990_v38 = vadd.s32 %v2988_v35, %v2986_v26  ;;  %vm2801_vm2 = vcmp.lt.s32.totalorder %v5061_v1, 2  ;;  %v5111_v15 = vshll.u32 %v2776_v11, 8  ;;  %v5133_v46 = vmul.f32 0.62831855, %v591_v28 }
 0x118   : > { %v3013_v45 = vadd.s32 %v3012_v36, %v3002_v16  ;;  %vm2924_vm11 = vcmp.lt.s32.totalorder %v4981_v40, 0  ;;  %vm5178_vm12 = vcmp.le.f32.partialorder %v2922_v2, 0.7853982 }
 0x119   : > { %3163 = vmatmul.f32.gmra.mxu0 %v3109_v39  ;;  %v2783_v39 = vsub.s32 32, %v2782_v12  ;;  %v2991_v25 = vadd.s32 %v2990_v38, %v2980_v19  ;;  %v2818_v11 = vshrl.u32 %v5111_v15, 16 }
 0x11a   : > { %v3014_v50 = vadd.s32 %v3013_v45, %v3004_v27  ;;  %v2817_v27 = vand.u32 65535, %v5111_v15 }
 0x11b   : > { %v2786_v47 = vshrl.u32 %v4757_v10, %v2783_v39  ;;  %v2789_v21 = vshrl.u32 %v4758_v13, %v2783_v39  ;;  %v5093_v22 = vadd.s32 %v2991_v25, %v2982_v32  ;;  %v2792_v56 = vshrl.u32 %v4755_v3, %v2783_v39 }
 0x11c   : > { %v3018_v57 = vadd.s32 1, %v3014_v50  ;;  %v2795_v59 = vshrl.u32 %v4759_v18, %v2783_v39  ;;  %v2798_v62 = vshrl.u32 %v4760_v23, %v2783_v39  ;;  %v2784_v17 = vshrl.u32 %v4756_v8, %v2783_v39 }
 0x11d   : > { %v2787_v55 = vor.u32 %v2786_v47, %v2785_v41  ;;  %v2790_v58 = vor.u32 %v2789_v21, %v2788_v48  ;;  %vm3017_vm15 = vc.u32 %v5093_v22, %v5083_v44  ;;  %v2793_v30 = vor.u32 %v2792_v56, %v2791_v52 }
 0x11e   : > { %v3019_v63 = vsel %vm3017_vm15, %v3018_v57, %v3014_v50  ;;  %v2796_v4 = vor.u32 %v2795_v59, %v2794_v7  ;;  %v2799_v6 = vor.u32 %v2798_v62, %v2797_v61 }
 0x11f   : > { %v3020_v5 = vadd.s32 %v3019_v63, %v3015_v51  ;;  %v2808_v9 = vsel %vm2800_vm13, %v2787_v55, %v2790_v58  ;;  %v2805_v38 = vsel %vm2803_vm0, %v2793_v30, 2102212464  ;;  %v2804_v21 = vsel %vm2800_vm13, %v2784_v17, %v2787_v55 }
 0x120   : > { %v2809_v12 = vsel %vm2803_vm0, %v2796_v4, 920167782  ;;  %v2813_v20 = vsel %vm2803_vm0, %v2799_v6, 1326507024  ;;  %v2806_v52 = vsel %vm2802_vm1, %v2790_v58, %v2805_v38 }
 0x121   : > { %3166 = vmatmul.f32.gmra.mxu0 %v3110_v14  ;;  %v2812_v14 = vsel %vm2800_vm13, %v2790_v58, %v2793_v30  ;;  %v3021_v16 = vadd.s32 536870912, %v3020_v5  ;;  %v2810_v19 = vsel %vm2802_vm1, %v2793_v30, %v2809_v12  ;;  %v2814_v26 = vsel %vm2802_vm1, %v2796_v4, %v2813_v20 }
 0x122   : > { %v2811_v24 = vsel %vm2801_vm2, %v2808_v9, %v2810_v19  ;;  %v2815_v35 = vsel %vm2801_vm2, %v2812_v14, %v2814_v26  ;;  %v2309_v58 = vand.u32 2139095040, %v5133_v46  ;;  %v2807_v28 = vsel %vm2801_vm2, %v2804_v21, %v2806_v52 }
 0x123   : > { %v5126_v32 = vshrl.u32 %v3021_v16, 30  ;;  %v2841_v36 = vand.u32 65535, %v2811_v24  ;;  %v2842_v37 = vshrl.u32 %v2811_v24, 16  ;;  %v2819_v39 = vand.u32 65535, %v2815_v35 }
 0x124   : > { %v2820_v41 = vshrl.u32 %v2815_v35, 16  ;;  %v2310_v20 = vshrl.u32 %v2309_v58, 23  ;;  %v2861_v1 = vmul.u32 %v5111_v15, %v2807_v28  ;;  %v2306_v52 = vand.u32 2147483647, %v5133_v46 }
 0x125   : > { %v3023_v42 = vshll.u32 %v5126_v32, 30  ;;  %v2844_v0 = vmul.u32 %v2842_v37, %v2817_v27  ;;  %v2845_v45 = vmul.u32 %v2841_v36, %v2818_v11  ;;  %v2821_v25 = vmul.u32 %v2819_v39, %v2817_v27 }
 0x126   : > { %v2822_v47 = vmul.u32 %v2820_v41, %v2817_v27  ;;  %v2823_v48 = vmul.u32 %v2819_v39, %v2818_v11  ;;  %v2843_v50 = vmul.u32 %v2841_v36, %v2817_v27  ;;  %v2824_v56 = vmul.u32 %v2820_v41, %v2818_v11 }
 0x127   : > { %v3024_v51 = vsub.s32 %v3020_v5, %v3023_v42  ;;  %v2846_v59 = vmul.u32 %v2842_v37, %v2818_v11  ;;  %v2849_v62 = vshll.u32 %v2845_v45, 16  ;;  %v3113_v5 = vld [vmem:[%s4967_s20 + $0x28] sm:$0xff]  ;;  %v2848_v19 = vshrl.u32 %v2844_v0, 16 }
 0x128   : > { %v2825_v7 = vshll.u32 %v2822_v47, 16  ;;  %v2827_v57 = vshll.u32 %v2823_v48, 16  ;;  %v2826_v30 = vshrl.u32 %v2822_v47, 16  ;;  %v2828_v26 = vshrl.u32 %v2823_v48, 16 }
 0x129   : > { %3169 = vmatmul.f32.gmra.mxu0 %v3111_v54  ;;  %v2847_v54 = vshll.u32 %v2844_v0, 16  ;;  %vm3025_vm3 = vcmp.lt.s32.totalorder %v3024_v51, 0  ;;  %v3026_v61 = vsub.s32 0, %v3024_v51  ;;  %v4137_v36 = vadd.s32 4294967169, %v2310_v20 }
 0x12a   : > { %vm2829_vm4 = vc.u32 %v2821_v25, %v2825_v7  ;;  %v2831_v63 = vadd.s32 %v2825_v7, %v2821_v25  ;;  %v3016_v39 = vadd.s32 %v5083_v44, %v5093_v22 }
 0x12b   : > { %vm2851_vm5 = vc.u32 %v2843_v50, %v2847_v54  ;;  %v2853_v4 = vadd.s32 %v2847_v54, %v2843_v50  ;;  %v3027_v6 = vsel %vm3025_vm3, %v3026_v61, %v3024_v51  ;;  %v2830_v55 = vsel %vm2829_vm4, 1, %v4761_v60  ;;  %v3114_v50 = vld [vmem:[%s4967_s20 + $0x30] sm:$0xff] }
 0x12c   : > { %v2852_v9 = vsel %vm2851_vm5, 1, %v4761_v60  ;;  %v3028_v12 = vclz %v3027_v6  ;;  %v2832_v14 = vadd.s32 %v2830_v55, %v2824_v56  ;;  %vm2833_vm6 = vc.u32 %v2831_v63, %v2827_v57 }
 0x12d   : > { %v2854_v16 = vadd.s32 %v2852_v9, %v2846_v59  ;;  %v2834_v17 = vsel %vm2833_vm6, 1, %v4761_v60  ;;  %vm2855_vm7 = vc.u32 %v2853_v4, %v2849_v62  ;;  %v5147_v38 = vadd.s32 %v2853_v4, %v2849_v62 }
 0x12e   : > { %v4150_v24 = vadd.s32 4294967294, %v3028_v12  ;;  %v2836_v27 = vadd.s32 %v2834_v17, %v2832_v14  ;;  %v2856_v11 = vsel %vm2855_vm7, 1, %v4761_v60  ;;  %v2316_v0 = vadd.s32 1, %v4137_v36 }
 0x12f   : > { %v2858_v35 = vadd.s32 %v2856_v11, %v2854_v16  ;;  %v2313_v63 = vand.u32 8388607, %v2306_v52  ;;  %v3115_v16 = vld [vmem:[%s4967_s20 + $0x38] sm:$0xff]  ;;  %vm2770_vm3 = vcmp.lt.s32.totalorder %v4992_v53, 0  ;;  %vm3065_vm7 = vweird.f32 %v4981_v40 }
 0x130   : > { %vm4151_vm8 = vcmp.lt.s32.totalorder %v4150_v24, 0  ;;  %v2837_v37 = vadd.s32 %v2836_v27, %v2826_v30  ;;  %vm2317_vm9 = vcmp.gt.s32.totalorder %v2316_v0, 0 }
 0x131   : > { %3172 = vmatmul.f32.gmra.mxu0 %v3112_v31  ;;  %v2850_v31 = vshrl.u32 %v2845_v45, 16  ;;  %v3031_v41 = vsel %vm4151_vm8, 0, %v4150_v24  ;;  %v2859_v42 = vadd.s32 %v2858_v35, %v2848_v19  ;;  %v2318_v44 = vsel %vm2317_vm9, %v2316_v0, 0 }
 0x132   : > { %v3032_v25 = vsub.s32 32, %v3031_v41  ;;  %v3036_v47 = vsub.s32 4294967266, %v3031_v41  ;;  %v5151_v48 = vadd.s32 %v2837_v37, %v2828_v26  ;;  %v3033_v45 = vshll.u32 %v3024_v51, %v3031_v41 }
 0x133   : > { %v2860_v21 = vadd.s32 %v2859_v42, %v2850_v31  ;;  %v2320_v7 = vand.u32 31, %v2318_v44  ;;  %v5160_v4 = vshrl.u32 %v2318_v44, 5  ;;  %v2314_v11 = vor.u32 8388608, %v2313_v63  ;;  %v589_v42 = vld [vmem:[%s4962_s15 + $0x48] sm:$0xff]  ;;  %v3116_v44 = vld [vmem:[%s4967_s20 + $0x40] sm:$0xff] }
 0x134   : > { %v3034_v54 = vshrl.u32 %v3016_v39, %v3032_v25  ;;  %v3037_v56 = vadd.s32 127, %v3036_v47  ;;  %vm2863_vm10 = vc.u32 %v5151_v48, %v5147_v38  ;;  %vm5282_vm9 = vcmp.le.f32.partialorder %v2768_v34, 0.7853982 }
 0x135   : > { %v2864_v22 = vadd.s32 1, %v2860_v21  ;;  %v2321_v15 = vsub.s32 32, %v2320_v7  ;;  %v2326_v55 = vshll.u32 %v4757_v10, %v2320_v7  ;;  %v2332_v14 = vshll.u32 %v4755_v3, %v2320_v7 }
 0x136   : > { %v3035_v57 = vor.u32 %v3034_v54, %v3033_v45  ;;  %v3038_v59 = vshll.u32 %v3037_v56, 23  ;;  %v2329_v17 = vshll.u32 %v4758_v13, %v2320_v7  ;;  %v2335_v24 = vshll.u32 %v4759_v18, %v2320_v7 }
 0x137   : > { %v2865_v61 = vsel %vm2863_vm10, %v2864_v22, %v2860_v21  ;;  %v2324_v6 = vshrl.u32 %v4757_v10, %v2321_v15  ;;  %v2327_v12 = vshrl.u32 %v4758_v13, %v2321_v15  ;;  %v2330_v19 = vshrl.u32 %v4755_v3, %v2321_v15 }
 0x138   : > { %v3039_v30 = vor.u32 4788187, %v3038_v59  ;;  %v3042_v51 = vcvt.s32.f32 %v3035_v57  ;;  %v2866_v62 = vadd.s32 %v2865_v61, %v2861_v1  ;;  %v2333_v20 = vshrl.u32 %v4759_v18, %v2321_v15 }
 0x139   : > { %3175 = vmatmul.f32.gmra.mxu0 %v3113_v5  ;;  %v2323_v5 = vshll.u32 %v4756_v8, %v2320_v7  ;;  %v2336_v35 = vshrl.u32 %v4760_v23, %v2321_v15  ;;  %v5183_v41 = vor.u32 %v2327_v12, %v2326_v55  ;;  %v2331_v0 = vor.u32 %v2330_v19, %v2329_v17 }
 0x13a   : > { %v3040_v9 = vand.u32 2147483647, %v3039_v30  ;;  %v2867_v58 = vadd.s32 536870912, %v2866_v62  ;;  %v2334_v31 = vor.u32 %v2333_v20, %v2332_v14  ;;  %vm2338_vm13 = vcmp.lt.s32.totalorder %v5160_v4, 1 }
 0x13b   : > { %v2325_v28 = vor.u32 %v2324_v6, %v2323_v5  ;;  %v2337_v25 = vor.u32 %v2336_v35, %v2335_v24  ;;  %vm2341_vm14 = vcmp.lt.s32.totalorder %v5160_v4, 4  ;;  %vm2340_vm15 = vcmp.lt.s32.totalorder %v5160_v4, 3 }
 0x13c   : > { %v3043_v26 = vmul.f32 %v3042_v51, %v3040_v9  ;;  %v5172_v27 = vshrl.u32 %v2867_v58, 30  ;;  %v2347_v1 = vsel %vm2341_vm14, %v2334_v31, 920167782  ;;  %v5200_v45 = vshll.u32 %v2314_v11, 8 }
 0x13d   : > { %v5202_v21 = vmul.f32 0.62831855, %v589_v42  ;;  %vm2339_vm1 = vcmp.lt.s32.totalorder %v5160_v4, 2  ;;  %v2346_v22 = vsel %vm2338_vm13, %v2325_v28, %v5183_v41  ;;  %v2348_v7 = vsel %vm2340_vm15, %v2331_v0, %v2347_v1 }
 0x13e   : > { %v3044_v37 = vxor.u32 2147483648, %v3043_v26  ;;  %v2869_v39 = vshll.u32 %v5172_v27, 30  ;;  %v2350_v57 = vsel %vm2338_vm13, %v5183_v41, %v2331_v0  ;;  %v2351_v59 = vsel %vm2341_vm14, %v2337_v25, 1326507024  ;;  %v3117_v25 = vld [vmem:[%s4967_s20 + $0x48] sm:$0xff] }
 0x13f   : > { %v2352_v5 = vsel %vm2340_vm15, %v2334_v31, %v2351_v59  ;;  %v2355_v6 = vand.u32 65535, %v5200_v45  ;;  %v2001_v55 = vand.u32 2139095040, %v5202_v21  ;;  %v5228_v12 = vsel %vm2339_vm1, %v2346_v22, %v2348_v7 }
 0x140   : > { %v3045_v47 = vsel %vm2924_vm11, %v3044_v37, %v3043_v26  ;;  %v5190_v2 = vsub.s32 %v2866_v62, %v2869_v39  ;;  %v2322_v62 = vshrl.u32 %v4756_v8, %v2321_v15  ;;  %v2353_v14 = vsel %vm2339_vm1, %v2350_v57, %v2352_v5 }
 0x141   : > { %3178 = vmatmul.f32.gmra.mxu0 %v3114_v50  ;;  %v5198_v50 = vsel %vm5178_vm12, %v4981_v40, %v3045_v47  ;;  %v2862_v15 = vadd.s32 %v5147_v38, %v5151_v48  ;;  %v5235_v17 = vshrl.u32 %v5200_v45, 16  ;;  %v2358_v19 = vshrl.u32 %v2353_v14, 16 }
 0x142   : > { %v3050_v54 = vmul.f32 %v5198_v50, %v5198_v50  ;;  %vm2871_vm0 = vcmp.lt.s32.totalorder %v5190_v2, 0  ;;  %v2872_v56 = vsub.s32 0, %v5190_v2  ;;  %v5239_v26 = vsel %vm2338_vm13, %v2322_v62, %v2325_v28 }
 0x143   : > { %v2379_v11 = vand.u32 65535, %v5228_v12  ;;  %v5244_v31 = vsel %vm2341_vm14, %v2331_v0, 2102212464  ;;  %v2357_v38 = vand.u32 65535, %v2353_v14  ;;  %v2380_v48 = vshrl.u32 %v5228_v12, 16 }
 0x144   : > { %v3051_v61 = vmul.f32 -0.001358992, %v3050_v54  ;;  %v3058_v30 = vmul.f32 -0.00019511016, %v3050_v54  ;;  %v2873_v51 = vsel %vm2871_vm0, %v2872_v56, %v5190_v2  ;;  %v3046_v35 = vsub.s32 4, %v5126_v32 }
 0x145   : > { %v2874_v63 = vclz %v2873_v51  ;;  %v5251_v56 = vmul.u32 %v2358_v19, %v2355_v6  ;;  %v5256_v7 = vmul.u32 %v2379_v11, %v2355_v6  ;;  %v2362_v12 = vmul.u32 %v2358_v19, %v5235_v17 }
 0x146   : > { %v3052_v9 = vadd.f32 0.041655596, %v3051_v61  ;;  %v3059_v58 = vadd.f32 0.008332121, %v3058_v30  ;;  %v3047_v0 = vsel %vm2924_vm11, %v3046_v35, %v5126_v32  ;;  %v5261_v30 = vmul.u32 %v2357_v38, %v5235_v17 }
 0x147   : > { %v3049_v57 = vsel %vm5178_vm12, 0, %v3047_v0  ;;  %v2892_v35 = vsub.s32 4, %v5172_v27  ;;  %v2344_v34 = vsel %vm2340_vm15, %v5183_v41, %v5244_v31 }
 0x148   : > { %v3053_v20 = vmul.f32 %v3052_v9, %v3050_v54  ;;  %v3060_v24 = vmul.f32 %v3059_v58, %v3050_v54  ;;  %v3066_v62 = vand.u32 3, %v3049_v57  ;;  %v2363_v9 = vshll.u32 %v5251_v56, 16 }
 0x149   : > { %3181 = vmatmul.f32.gmra.mxu0 %v3115_v16  ;;  %v4147_v16 = vadd.s32 4294967294, %v2874_v63  ;;  %v5263_v63 = vmul.u32 %v2380_v48, %v2355_v6  ;;  %v2893_v19 = vsel %vm2770_vm3, %v2892_v35, %v5172_v27  ;;  %v2364_v27 = vshrl.u32 %v5251_v56, 16 }
 0x14a   : > { %v3054_v37 = vadd.f32 -0.4999988, %v3053_v20  ;;  %v3061_v39 = vadd.f32 -0.16666654, %v3060_v24  ;;  %vm3071_vm4 = vcmp.eq.s32.totalorder %v3066_v62, 2  ;;  %vm3068_vm5 = vcmp.eq.s32.totalorder %v3066_v62, 0 }
 0x14b   : > { %vm4148_vm2 = vcmp.lt.s32.totalorder %v4147_v16, 0  ;;  %vm3067_vm6 = vcmp.lt.s32.totalorder %v3066_v62, 2  ;;  %v2384_v57 = vmul.u32 %v2380_v48, %v5235_v17  ;;  %v2002_v56 = vshrl.u32 %v2001_v55, 23 }
 0x14c   : > { %v2877_v42 = vsel %vm4148_vm2, 0, %v4147_v16  ;;  %v3062_v22 = vmul.f32 %v3061_v39, %v3050_v54  ;;  %v2365_v16 = vshll.u32 %v5261_v30, 16  ;;  %v2366_v48 = vshrl.u32 %v5261_v30, 16 }
 0x14d   : > { %v2878_v28 = vsub.s32 32, %v2877_v42  ;;  %v2879_v47 = vshll.u32 %v5190_v2, %v2877_v42  ;;  %v2882_v1 = vsub.s32 4294967266, %v2877_v42  ;;  %v5277_v42 = vmul.u32 %v2379_v11, %v5235_v17 }
 0x14e   : > { %v3063_v51 = vadd.f32 1.0, %v3062_v22  ;;  %v4131_v30 = vadd.s32 4294967169, %v2002_v56  ;;  %vm2911_vm2 = vweird.f32 %v4992_v53 }
 0x14f   : > { %v2880_v59 = vshrl.u32 %v2862_v15, %v2878_v28  ;;  %v2883_v61 = vadd.s32 127, %v2882_v1  ;;  %v2385_v1 = vshll.u32 %v5263_v63, 16  ;;  %v2387_v62 = vshll.u32 %v5277_v42, 16 }
 0x150   : > { %v3064_v36 = vmul.f32 %v3063_v51, %v5198_v50 }
 0x151   : > { %3184 = vmatmul.f32.gmra.mxu0 %v3116_v44  ;;  %v3055_v44 = vmul.f32 %v3054_v37, %v3050_v54  ;;  %v2881_v5 = vor.u32 %v2880_v59, %v2879_v47  ;;  %v2884_v32 = vshll.u32 %v2883_v61, 23  ;;  %v2359_v54 = vmul.u32 %v2357_v38, %v2355_v6  ;;  %v3118_v37 = vld [vmem:[%s4967_s20 + $0x50] sm:$0xff] }
 0x152   : > { %v3069_v20 = vxor.u32 2147483648, %v3064_v36  ;;  %v2895_v59 = vsel %vm5282_vm9, 0, %v2893_v19  ;;  %vm2389_vm11 = vc.u32 %v5256_v7, %v2385_v1 }
 0x153   : > { %v3056_v2 = vadd.f32 1.0, %v3055_v44  ;;  %v2885_v14 = vor.u32 4788187, %v2884_v32  ;;  %v2888_v15 = vcvt.s32.f32 %v2881_v5  ;;  %vm2367_vm8 = vc.u32 %v2359_v54, %v2363_v9  ;;  %v3119_v5 = vld [vmem:[%s4967_s20 + $0x58] sm:$0xff] }
 0x154   : > { %v2369_v50 = vadd.s32 %v2363_v9, %v2359_v54  ;;  %v2368_v39 = vsel %vm2367_vm8, 1, %v4761_v60  ;;  %v2390_v31 = vsel %vm2389_vm11, 1, %v4761_v60  ;;  %v2391_v32 = vadd.s32 %v2385_v1, %v5256_v7  ;;  %v3480_v1 = vld [vmem:[#allocation12 + $0x78] sm:$0xff] }
 0x155   : > { %v3072_v58 = vxor.u32 2147483648, %v3056_v2  ;;  %v2886_v6 = vand.u32 2147483647, %v2885_v14  ;;  %v3070_v38 = vsel %vm3068_vm5, %v3056_v2, %v3069_v20  ;;  %v2370_v47 = vadd.s32 %v2368_v39, %v2362_v12  ;;  %3485 = vmatpush.msra.mxu1 %v3480_v1 }
 0x156   : > { %vm2371_vm10 = vc.u32 %v2369_v50, %v2365_v16  ;;  %v2392_v54 = vadd.s32 %v2390_v31, %v2384_v57  ;;  %v5312_v9 = vand.u32 3, %v2895_v59  ;;  %vm2393_vm12 = vc.u32 %v2391_v32, %v2387_v62  ;;  %v3479_v57 = vld [vmem:[#allocation12 + $0x70] sm:$0xff] }
 0x157   : > { %v3073_v24 = vsel %vm3071_vm4, %v3072_v58, %v3064_v36  ;;  %v2889_v28 = vmul.f32 %v2888_v15, %v2886_v6  ;;  %v2372_v22 = vsel %vm2371_vm10, 1, %v4761_v60  ;;  %v2345_v36 = vsel %vm2339_vm1, %v5239_v26, %v2344_v34  ;;  %3486 = vmatpush.msra.mxu1 %v3479_v57 }
 0x158   : > { %v2374_v61 = vadd.s32 %v2372_v22, %v2370_v47  ;;  %v1998_v58 = vand.u32 2147483647, %v5202_v21  ;;  %v2386_v15 = vshrl.u32 %v5263_v63, 16  ;;  %v2388_v7 = vshrl.u32 %v5277_v42, 16 }
 0x159   : > { %3187 = vmatmul.f32.gmra.mxu0 %v3117_v25  ;;  %v3074_v25 = vsel %vm3067_vm6, %v3070_v38, %v3073_v24  ;;  %v2890_v11 = vxor.u32 2147483648, %v2889_v28  ;;  %v2394_v20 = vsel %vm2393_vm12, 1, %v4761_v60  ;;  %v2008_v24 = vadd.s32 1, %v4131_v30 }
 0x15a   : > { %v3075_v40 = vsel %vm3065_vm7, nan, %v3074_v25  ;;  %v2375_v41 = vadd.s32 %v2374_v61, %v2364_v27  ;;  %v5323_v26 = vadd.s32 %v2391_v32, %v2387_v62  ;;  %vm2914_vm14 = vcmp.eq.s32.totalorder %v5312_v9, 0  ;;  %v3120_v25 = vld [vmem:[%s4967_s20 + $0x60] sm:$0xff] }
 0x15b   : > { %v3091_v44 = vadd.f32 1.0, %v3075_v40  ;;  %v2891_v51 = vsel %vm2770_vm3, %v2890_v11, %v2889_v28  ;;  %vm2009_vm13 = vcmp.gt.s32.totalorder %v2008_v24, 0  ;;  %vm2917_vm15 = vcmp.eq.s32.totalorder %v5312_v9, 2 }
 0x15c   : > { %v5304_v17 = vsel %vm5282_vm9, %v4992_v53, %v2891_v51  ;;  %v5319_v16 = vadd.s32 %v2375_v41, %v2366_v48  ;;  %v2010_v63 = vsel %vm2009_vm13, %v2008_v24, 0  ;;  %v2399_v19 = vmul.u32 %v5200_v45, %v2345_v36  ;;  %v3478_v48 = vld [vmem:[#allocation12 + $0x68] sm:$0xff] }
 0x15d   : > { %v3107_v2 = vmul.f32 0.5, %v3091_v44  ;;  %v2896_v55 = vmul.f32 %v5304_v17, %v5304_v17  ;;  %v2005_v39 = vand.u32 8388607, %v1998_v58  ;;  %v2012_v42 = vand.u32 31, %v2010_v63  ;;  %3487 = vmatpush.msra.mxu1 %v3478_v48 }
 0x15e   : > { %vm2913_vm0 = vcmp.lt.s32.totalorder %v5312_v9, 2  ;;  %vm2401_vm1 = vc.u32 %v5319_v16, %v5323_v26  ;;  %v5334_v0 = vshrl.u32 %v2010_v63, 5 }
 0x15f   : > { %3627 = vperm.xlu1 %4408, %v3107_v2   ;;  %v2897_v12 = vmul.f32 -0.001358992, %v2896_v55  ;;  %v2904_v14 = vmul.f32 -0.00019511016, %v2896_v55  ;;  %v5336_v27 = vsub.s32 32, %v2012_v42  ;;  %v2015_v45 = vshll.u32 %v4756_v8, %v2012_v42 }
 0x160   : > { %v2018_v44 = vshll.u32 %v4757_v10, %v2012_v42  ;;  %v2021_v34 = vshll.u32 %v4758_v13, %v2012_v42  ;;  %v2024_v2 = vshll.u32 %v4755_v3, %v2012_v42  ;;  %vm2030_vm3 = vcmp.lt.s32.totalorder %v5334_v0, 1 }
 0x161   : > { %3190 = vmatmul.f32.gmra.mxu0 %v3118_v37  ;;  %v2898_v35 = vadd.f32 0.041655596, %v2897_v12  ;;  %v2905_v4 = vadd.f32 0.008332121, %v2904_v14  ;;  %v2396_v37 = vadd.s32 %v2394_v20, %v2392_v54  ;;  %v2016_v61 = vshrl.u32 %v4757_v10, %v5336_v27  ;;  %v586_v14 = vld [vmem:[%s4962_s15 + $0x30] sm:$0xff] }
 0x162   : > { %v2019_v56 = vshrl.u32 %v4758_v13, %v5336_v27  ;;  %v2022_v31 = vshrl.u32 %v4755_v3, %v5336_v27  ;;  %v2025_v32 = vshrl.u32 %v4759_v18, %v5336_v27  ;;  %v2027_v12 = vshll.u32 %v4759_v18, %v2012_v42 }
 0x163   : > { %v2899_v6 = vmul.f32 %v2898_v35, %v2896_v55  ;;  %v2906_v50 = vmul.f32 %v2905_v4, %v2896_v55  ;;  %v2397_v38 = vadd.s32 %v2396_v37, %v2386_v15  ;;  %v2017_v30 = vor.u32 %v2016_v61, %v2015_v45  ;;  %v3121_v35 = vld [vmem:[%s4967_s20 + $0x68] sm:$0xff] }
 0x164   : > { %v2026_v20 = vor.u32 %v2025_v32, %v2024_v2  ;;  %v2028_v24 = vshrl.u32 %v4760_v23, %v5336_v27  ;;  %vm2033_vm4 = vcmp.lt.s32.totalorder %v5334_v0, 4  ;;  %vm2032_vm5 = vcmp.lt.s32.totalorder %v5334_v0, 3  ;;  %v3122_v2 = vld [vmem:[%s4967_s20 + $0x70] sm:$0xff] }
 0x165   : > { %v2900_v28 = vadd.f32 -0.4999988, %v2899_v6  ;;  %v2907_v47 = vadd.f32 -0.16666654, %v2906_v50  ;;  %v2398_v40 = vadd.s32 %v2397_v38, %v2388_v7  ;;  %v5358_v7 = vor.u32 %v2019_v56, %v2018_v44 }
 0x166   : > { %v2023_v6 = vor.u32 %v2022_v31, %v2021_v34  ;;  %v2029_v50 = vor.u32 %v2028_v24, %v2027_v12  ;;  %v5369_v38 = vmul.f32 0.62831855, %v586_v14  ;;  %vm2031_vm6 = vcmp.lt.s32.totalorder %v5334_v0, 2 }
 0x167   : > { %v2901_v11 = vmul.f32 %v2900_v28, %v2896_v55  ;;  %v2908_v22 = vmul.f32 %v2907_v47, %v2896_v55  ;;  %v2402_v59 = vadd.s32 1, %v2398_v40  ;;  %v2006_v55 = vor.u32 8388608, %v2005_v39 }
 0x168   : > { %v2038_v28 = vsel %vm2030_vm3, %v2017_v30, %v5358_v7  ;;  %v2042_v9 = vsel %vm2030_vm3, %v5358_v7, %v2023_v6 }
 0x169   : > { %3193 = vmatmul.f32.gmra.mxu0 %v3119_v5  ;;  %v2902_v51 = vadd.f32 1.0, %v2901_v11  ;;  %v2909_v62 = vadd.f32 1.0, %v2908_v22  ;;  %v2403_v41 = vsel %vm2401_vm1, %v2402_v59, %v2398_v40  ;;  %v5375_v39 = vshll.u32 %v2006_v55, 8 }
 0x16a   : > { %v2404_v5 = vadd.s32 %v2403_v41, %v2399_v19  ;;  %v2039_v19 = vsel %vm2033_vm4, %v2026_v20, 920167782  ;;  %v2043_v40 = vsel %vm2033_vm4, %v2029_v50, 1326507024  ;;  %v1539_v11 = vand.u32 2139095040, %v5369_v38 }
 0x16b   : > { %v2910_v54 = vmul.f32 %v2909_v62, %v5304_v17  ;;  %v2918_v36 = vxor.u32 2147483648, %v2902_v51  ;;  %v2040_v1 = vsel %vm2032_vm5, %v2023_v6, %v2039_v19  ;;  %v2044_v53 = vsel %vm2032_vm5, %v2026_v20, %v2043_v40 }
 0x16c   : > { %v2405_v15 = vadd.s32 536870912, %v2404_v5  ;;  %v2041_v22 = vsel %vm2031_vm6, %v2038_v28, %v2040_v1  ;;  %v2047_v57 = vand.u32 65535, %v5375_v39  ;;  %v2048_v59 = vshrl.u32 %v5375_v39, 16  ;;  %v3123_v28 = vld [vmem:[%s4967_s20 + $0x78] sm:$0xff] }
 0x16d   : > { %v2915_v4 = vxor.u32 2147483648, %v2910_v54  ;;  %v2919_v37 = vsel %vm2917_vm15, %v2918_v36, %v2910_v54  ;;  %v2045_v56 = vsel %vm2031_vm6, %v2042_v9, %v2044_v53  ;;  %v2072_v41 = vshrl.u32 %v2041_v22, 16 }
 0x16e   : > { %v5366_v17 = vshrl.u32 %v2405_v15, 30  ;;  %v2049_v62 = vand.u32 65535, %v2045_v56  ;;  %v2050_v48 = vshrl.u32 %v2045_v56, 16  ;;  %v1540_v55 = vshrl.u32 %v1539_v11, 23 }
 0x16f   : > { %v2916_v63 = vsel %vm2914_vm14, %v2902_v51, %v2915_v4  ;;  %v2014_v51 = vshrl.u32 %v4756_v8, %v5336_v27  ;;  %v2074_v14 = vmul.u32 %v2072_v41, %v2047_v57  ;;  %v2400_v15 = vadd.s32 %v5323_v26, %v5319_v16 }
 0x170   : > { %v2920_v42 = vsel %vm2913_vm0, %v2916_v63, %v2919_v37  ;;  %v2051_v54 = vmul.u32 %v2049_v62, %v2047_v57  ;;  %v2052_v36 = vmul.u32 %v2050_v48, %v2047_v57  ;;  %v2053_v12 = vmul.u32 %v2049_v62, %v2048_v59 }
 0x171   : > { %3196 = vmatmul.f32.gmra.mxu0 %v3120_v25  ;;  %v2407_v25 = vshll.u32 %v5366_v17, 30  ;;  %v2921_v47 = vsel %vm2911_vm2, nan, %v2920_v42  ;;  %v2034_v27 = vsel %vm2030_vm3, %v2014_v51, %v2017_v30  ;;  %v2054_v4 = vmul.u32 %v2050_v48, %v2048_v59 }
 0x172   : > { %v3090_v45 = vadd.f32 1.0, %v2921_v47  ;;  %v2055_v24 = vshll.u32 %v2052_v36, 16  ;;  %v2057_v37 = vshll.u32 %v2053_v12, 16  ;;  %v4122_v19 = vadd.s32 4294967169, %v1540_v55 }
 0x173   : > { %v2408_v44 = vsub.s32 %v2404_v5, %v2407_v25  ;;  %v2071_v5 = vand.u32 65535, %v2041_v22  ;;  %v2077_v26 = vshll.u32 %v2074_v14, 16  ;;  %v2056_v9 = vshrl.u32 %v2052_v36, 16 }
 0x174   : > { %v3106_v34 = vmul.f32 0.5, %v3090_v45  ;;  %vm2059_vm9 = vc.u32 %v2051_v54, %v2055_v24  ;;  %v2061_v16 = vadd.s32 %v2055_v24, %v2051_v54  ;;  %v1546_v62 = vadd.s32 1, %v4122_v19  ;;  %v3477_v24 = vld [vmem:[#allocation12 + $0x60] sm:$0xff]  ;;  %v3475_v19 = vld [vmem:[#allocation12 + $0x50] sm:$0xff] }
 0x175   : > { %vm2409_vm7 = vcmp.lt.s32.totalorder %v2408_v44, 0  ;;  %v2410_v61 = vsub.s32 0, %v2408_v44  ;;  %v2075_v50 = vmul.u32 %v2071_v5, %v2048_v59  ;;  %v2073_v63 = vmul.u32 %v2071_v5, %v2047_v57  ;;  %3488 = vmatpush.msra.mxu1 %v3477_v24 }
 0x176   : > { %4410 = vset.pattern.permute.xlu0 %v4761_v60  ;;  %3622 = vperm.xlu1 %4408, %v3106_v34   ;;  %v2060_v25 = vsel %vm2059_vm9, 1, %v4761_v60  ;;  %vm2063_vm10 = vc.u32 %v2061_v16, %v2057_v37  ;;  %v2058_v34 = vshrl.u32 %v2053_v12, 16  ;;  %v2078_v48 = vshrl.u32 %v2074_v14, 16 }
 0x177   : > { %v2411_v31 = vsel %vm2409_vm7, %v2410_v61, %v2408_v44  ;;  %v2062_v40 = vadd.s32 %v2060_v25, %v2054_v4  ;;  %v2079_v45 = vshll.u32 %v2075_v50, 16  ;;  %v2064_v57 = vsel %vm2063_vm10, 1, %v4761_v60 }
 0x178   : > { %v2412_v32 = vclz %v2411_v31  ;;  %vm2081_vm11 = vc.u32 %v2073_v63, %v2077_v26  ;;  %v2083_v56 = vadd.s32 %v2077_v26, %v2073_v63  ;;  %vm1547_vm13 = vcmp.gt.s32.totalorder %v1546_v62, 0  ;;  %v3474_v26 = vld [vmem:[#allocation12 + $0x48] sm:$0xff] }
 0x179   : > { %3199 = vmatmul.f32.gmra.mxu0 %v3121_v35  ;;  %v2035_v35 = vsel %vm2033_vm4, %v2023_v6, 2102212464  ;;  %v2076_v6 = vmul.u32 %v2072_v41, %v2048_v59  ;;  %v2066_v61 = vadd.s32 %v2064_v57, %v2062_v40  ;;  %v2082_v51 = vsel %vm2081_vm11, 1, %v4761_v60 }
 0x17a   : > { %v4138_v20 = vadd.s32 4294967294, %v2412_v32  ;;  %v2036_v53 = vsel %vm2032_vm5, %v5358_v7, %v2035_v35  ;;  %vm2085_vm12 = vc.u32 %v2083_v56, %v2079_v45  ;;  %v2080_v55 = vshrl.u32 %v2075_v50, 16  ;;  %v3476_v35 = vld [vmem:[#allocation12 + $0x58] sm:$0xff] }
 0x17b   : > { %v2067_v59 = vadd.s32 %v2066_v61, %v2056_v9  ;;  %v2084_v41 = vadd.s32 %v2082_v51, %v2076_v6  ;;  %v2086_v7 = vsel %vm2085_vm12, 1, %v4761_v60  ;;  %v1548_v54 = vsel %vm1547_vm13, %v1546_v62, 0  ;;  %3489 = vmatpush.msra.mxu1 %v3476_v35 }
 0x17c   : > { %vm4139_vm8 = vcmp.lt.s32.totalorder %v4138_v20, 0  ;;  %v2037_v14 = vsel %vm2031_vm6, %v2034_v27, %v2036_v53  ;;  %v2430_v63 = vsub.s32 4, %v5366_v17  ;;  %vm5429_vm14 = vcmp.le.f32.partialorder %v2306_v52, 0.7853982 }
 0x17d   : > { %v2415_v42 = vsel %vm4139_vm8, 0, %v4138_v20  ;;  %v2088_v32 = vadd.s32 %v2086_v7, %v2084_v41  ;;  %v5420_v12 = vadd.s32 %v2067_v59, %v2058_v34  ;;  %v1550_v20 = vand.u32 31, %v1548_v54  ;;  %3490 = vmatpush.msra.mxu1 %v3475_v19 }
 0x17e   : > { %v2416_v47 = vsub.s32 32, %v2415_v42  ;;  %v2417_v1 = vshll.u32 %v2408_v44, %v2415_v42  ;;  %v2420_v30 = vsub.s32 4294967266, %v2415_v42  ;;  %vm2308_vm15 = vcmp.lt.s32.totalorder %v5133_v46, 0 }
 0x17f   : > { %v2089_v4 = vadd.s32 %v2088_v32, %v2078_v48  ;;  %v1536_v25 = vand.u32 2147483647, %v5369_v38  ;;  %v2091_v0 = vmul.u32 %v5375_v39, %v2037_v14  ;;  %v5438_v27 = vsub.s32 32, %v1550_v20  ;;  %3491 = vmatpush.msra.mxu1 %v3474_v26 }
 0x180   : > { %v2418_v11 = vshrl.u32 %v2400_v15, %v2416_v47  ;;  %v2421_v22 = vadd.s32 127, %v2420_v30  ;;  %v5422_v15 = vadd.s32 %v2083_v56, %v2079_v45  ;;  %v2431_v47 = vsel %vm2308_vm15, %v2430_v63, %v5366_v17 }
 0x181   : > { %3202 = vmatmul.f32.gmra.mxu0 %v3122_v2  ;;  %v2090_v42 = vadd.s32 %v2089_v4, %v2080_v55  ;;  %v1543_v9 = vand.u32 8388607, %v1536_v25  ;;  %v5446_v39 = vshrl.u32 %v1548_v54, 5  ;;  %v1562_v45 = vshll.u32 %v4755_v3, %v1550_v20 }
 0x182   : > { %v2419_v44 = vor.u32 %v2418_v11, %v2417_v1  ;;  %v2422_v2 = vshll.u32 %v2421_v22, 23  ;;  %vm2093_vm0 = vc.u32 %v5420_v12, %v5422_v15  ;;  %v1563_v11 = vshrl.u32 %v4759_v18, %v5438_v27 }
 0x183   : > { %v2094_v52 = vadd.s32 1, %v2090_v42  ;;  %v1553_v17 = vshll.u32 %v4756_v8, %v1550_v20  ;;  %v1554_v22 = vshrl.u32 %v4757_v10, %v5438_v27  ;;  %v1556_v53 = vshll.u32 %v4757_v10, %v1550_v20 }
 0x184   : > { %v2423_v31 = vor.u32 4788187, %v2422_v2  ;;  %v2426_v5 = vcvt.s32.f32 %v2419_v44  ;;  %v1557_v57 = vshrl.u32 %v4758_v13, %v5438_v27  ;;  %v2433_v34 = vsel %vm5429_vm14, 0, %v2431_v47 }
 0x185   : > { %v2095_v30 = vsel %vm2093_vm0, %v2094_v52, %v2090_v42  ;;  %v1559_v2 = vshll.u32 %v4758_v13, %v1550_v20  ;;  %v1560_v51 = vshrl.u32 %v4755_v3, %v5438_v27  ;;  %v1565_v62 = vshll.u32 %v4759_v18, %v1550_v20 }
 0x186   : > { %v2424_v36 = vand.u32 2147483647, %v2423_v31  ;;  %v2096_v6 = vadd.s32 %v2095_v30, %v2091_v0  ;;  %v1566_v59 = vshrl.u32 %v4760_v23, %v5438_v27  ;;  %v1544_v7 = vor.u32 8388608, %v1543_v9 }
 0x187   : > { %v5467_v55 = vor.u32 %v1554_v22, %v1553_v17  ;;  %v5469_v32 = vor.u32 %v1557_v57, %v1556_v53  ;;  %vm1571_vm1 = vcmp.lt.s32.totalorder %v5446_v39, 4  ;;  %vm1568_vm2 = vcmp.lt.s32.totalorder %v5446_v39, 1 }
 0x188   : > { %v2427_v37 = vmul.f32 %v2426_v5, %v2424_v36  ;;  %v2097_v44 = vadd.s32 536870912, %v2096_v6  ;;  %v1564_v5 = vor.u32 %v1563_v11, %v1562_v45  ;;  %v2450_v20 = vand.u32 3, %v2433_v34 }
 0x189   : > { %3205 = vmatmul.f32.gmra.mxu0 %v3123_v28  ;;  %v5474_v35 = vor.u32 %v1560_v51, %v1559_v2  ;;  %v1567_v14 = vor.u32 %v1566_v59, %v1565_v62  ;;  %vm1570_vm3 = vcmp.lt.s32.totalorder %v5446_v39, 3  ;;  %vm1569_vm4 = vcmp.lt.s32.totalorder %v5446_v39, 2 }
 0x18a   : > { %v2428_v16 = vxor.u32 2147483648, %v2427_v37  ;;  %v5465_v31 = vshrl.u32 %v2097_v44, 30  ;;  %v1577_v50 = vsel %vm1571_vm1, %v1564_v5, 920167782  ;;  %v1576_v19 = vsel %vm1568_vm2, %v5467_v55, %v5469_v32 }
 0x18b   : > { %v5484_v42 = vshll.u32 %v1544_v7, 8  ;;  %vm2449_vm6 = vweird.f32 %v5133_v46  ;;  %v1578_v52 = vsel %vm1570_vm3, %v5474_v35, %v1577_v50  ;;  %v1581_v47 = vsel %vm1571_vm1, %v1567_v14, 1326507024 }
 0x18c   : > { %v2429_v28 = vsel %vm2308_vm15, %v2428_v16, %v2427_v37  ;;  %v2099_v24 = vshll.u32 %v5465_v31, 30  ;;  %vm2455_vm7 = vcmp.eq.s32.totalorder %v2450_v20, 2  ;;  %v1579_v45 = vsel %vm1569_vm4, %v1576_v19, %v1578_v52 }
 0x18d   : > { %v2432_v1 = vsel %vm5429_vm14, %v5133_v46, %v2429_v28  ;;  %v1580_v28 = vsel %vm1568_vm2, %v5469_v32, %v5474_v35  ;;  %v1582_v11 = vsel %vm1570_vm3, %v1564_v5, %v1581_v47  ;;  %v1585_v17 = vand.u32 65535, %v5484_v42 }
 0x18e   : > { %v2434_v40 = vmul.f32 %v2432_v1, %v2432_v1  ;;  %v2100_v63 = vsub.s32 %v2096_v6, %v2099_v24  ;;  %v1583_v57 = vsel %vm1569_vm4, %v1580_v28, %v1582_v11  ;;  %v1586_v34 = vshrl.u32 %v5484_v42, 16 }
 0x18f   : > { %vm2452_vm8 = vcmp.eq.s32.totalorder %v2450_v20, 0  ;;  %v1587_v44 = vand.u32 65535, %v1583_v57  ;;  %v1588_v2 = vshrl.u32 %v1583_v57, 16  ;;  %vm2451_vm9 = vcmp.lt.s32.totalorder %v2450_v20, 2 }
 0x190   : > { %v2435_v61 = vmul.f32 -0.001358992, %v2434_v40  ;;  %v2442_v56 = vmul.f32 -0.00019511016, %v2434_v40  ;;  %vm2101_vm5 = vcmp.lt.s32.totalorder %v2100_v63, 0  ;;  %v2102_v26 = vsub.s32 0, %v2100_v63 }
 0x191   : > { %v1610_v59 = vshrl.u32 %v1579_v45, 16  ;;  %v1552_v50 = vshrl.u32 %v4756_v8, %v5438_v27  ;;  %vm2000_vm11 = vcmp.lt.s32.totalorder %v5202_v21, 0  ;;  %v1592_v52 = vmul.u32 %v1588_v2, %v1586_v34 }
 0x192   : > { %v2436_v48 = vadd.f32 0.041655596, %v2435_v61  ;;  %v2443_v41 = vadd.f32 0.008332121, %v2442_v56  ;;  %v593_v61 = vld [vmem:[%s4962_s15 + $0x68] sm:$0xff] }
 0x193   : > { %v1573_v27 = vsel %vm1571_vm1, %v5474_v35, 2102212464  ;;  %vm5539_vm0 = vcmp.le.f32.partialorder %v1998_v58, 0.7853982 }
 0x194   : > { %v2437_v54 = vmul.f32 %v2436_v48, %v2434_v40  ;;  %v2444_v36 = vmul.f32 %v2443_v41, %v2434_v40  ;;  %v2092_v48 = vadd.s32 %v5422_v15, %v5420_v12  ;;  %v5508_v41 = vmul.f32 0.62831855, %v593_v61 }
 0x195   : > { %v1589_v12 = vmul.u32 %v1587_v44, %v1585_v17  ;;  %v1612_v15 = vmul.u32 %v1610_v59, %v1585_v17 }
 0x196   : > { %v2438_v4 = vadd.f32 -0.4999988, %v2437_v54  ;;  %v2445_v37 = vadd.f32 -0.16666654, %v2444_v36  ;;  %v1590_v54 = vmul.u32 %v1588_v2, %v1585_v17  ;;  %v5510_v36 = vmul.u32 %v1587_v44, %v1586_v34 }
 0x198   : > { %v2439_v16 = vmul.f32 %v2438_v4, %v2434_v40  ;;  %v2446_v0 = vmul.f32 %v2445_v37, %v2434_v40  ;;  %v2103_v40 = vsel %vm2101_vm5, %v2102_v26, %v2100_v63  ;;  %v1593_v28 = vshll.u32 %v1590_v54, 16 }
 0x199   : > { %v2104_v6 = vclz %v2103_v40  ;;  %v1594_v61 = vshrl.u32 %v1590_v54, 16  ;;  %v1616_v54 = vshrl.u32 %v1612_v15, 16 }
 0x19a   : > { %v2440_v30 = vadd.f32 1.0, %v2439_v16  ;;  %v2447_v9 = vadd.f32 1.0, %v2446_v0  ;;  %vm1597_vm12 = vc.u32 %v1589_v12, %v1593_v28  ;;  %v1599_v40 = vadd.s32 %v1593_v28, %v1589_v12 }
 0x19b   : > { %v4132_v56 = vadd.s32 4294967294, %v2104_v6  ;;  %v1614_v6 = vmul.u32 %v1610_v59, %v1586_v34  ;;  %v1596_v59 = vshrl.u32 %v5510_v36, 16 }
 0x19c   : > { %v2448_v22 = vmul.f32 %v2447_v9, %v2432_v1  ;;  %v2456_v53 = vxor.u32 2147483648, %v2440_v30  ;;  %v1609_v1 = vand.u32 65535, %v1579_v45  ;;  %v1615_v45 = vshll.u32 %v1612_v15, 16  ;;  %v3470_v15 = vld [vmem:[#allocation12 + $0x28] sm:$0xff] }
 0x19d   : > { %vm4133_vm10 = vcmp.lt.s32.totalorder %v4132_v56, 0 }
 0x19e   : > { %v2453_v51 = vxor.u32 2147483648, %v2448_v22  ;;  %v2457_v62 = vsel %vm2455_vm7, %v2456_v53, %v2448_v22  ;;  %v2107_v7 = vsel %vm4133_vm10, 0, %v4132_v56  ;;  %v5516_v26 = vmul.u32 %v1609_v1, %v1586_v34 }
 0x19f   : > { %v2108_v14 = vsub.s32 32, %v2107_v7  ;;  %v2109_v4 = vshll.u32 %v2100_v63, %v2107_v7  ;;  %v2112_v37 = vsub.s32 4294967266, %v2107_v7  ;;  %v1595_v63 = vshll.u32 %v5510_v36, 16 }
 0x1a0   : > { %v2454_v5 = vsel %vm2452_vm8, %v2440_v30, %v2453_v51  ;;  %v1611_v47 = vmul.u32 %v1609_v1, %v1585_v17  ;;  %v1598_v53 = vsel %vm1597_vm12, 1, %v4761_v60  ;;  %v1617_v57 = vshll.u32 %v5516_v26, 16  ;;  %v3473_v51 = vld [vmem:[#allocation12 + $0x40] sm:$0xff] }
 0x1a1   : > { %v2458_v24 = vsel %vm2451_vm9, %v2454_v5, %v2457_v62  ;;  %v2110_v16 = vshrl.u32 %v2092_v48, %v2108_v14  ;;  %v2113_v0 = vadd.s32 127, %v2112_v37  ;;  %v1600_v17 = vadd.s32 %v1598_v53, %v1592_v52  ;;  %v3472_v62 = vld [vmem:[#allocation12 + $0x38] sm:$0xff]  ;;  %3492 = vmatpush.msra.mxu1 %v3473_v51 }
 0x1a2   : > { %v2459_v20 = vsel %vm2449_vm6, nan, %v2458_v24  ;;  %vm1601_vm13 = vc.u32 %v1599_v40, %v1595_v63  ;;  %vm1619_vm14 = vc.u32 %v1611_v47, %v1615_v45  ;;  %v1621_v2 = vadd.s32 %v1615_v45, %v1611_v47  ;;  %v3471_v24 = vld [vmem:[#allocation12 + $0x30] sm:$0xff] }
 0x1a3   : > { %v3087_v19 = vadd.f32 1.0, %v2459_v20  ;;  %v2111_v46 = vor.u32 %v2110_v16, %v2109_v4  ;;  %v2114_v9 = vshll.u32 %v2113_v0, 23  ;;  %v1602_v44 = vsel %vm1601_vm13, 1, %v4761_v60  ;;  %3493 = vmatpush.msra.mxu1 %v3472_v62 }
 0x1a4   : > { %v1620_v35 = vsel %vm1619_vm14, 1, %v4761_v60  ;;  %v2122_v34 = vsub.s32 4, %v5465_v31  ;;  %v1604_v48 = vadd.s32 %v1602_v44, %v1600_v17  ;;  %v1572_v7 = vsel %vm1568_vm2, %v1552_v50, %v5467_v55 }
 0x1a5   : > { %v3103_v30 = vmul.f32 0.5, %v3087_v19  ;;  %v2115_v11 = vor.u32 4788187, %v2114_v9  ;;  %v2118_v22 = vcvt.s32.f32 %v2111_v46  ;;  %v1622_v1 = vadd.s32 %v1620_v35, %v1614_v6  ;;  %3494 = vmatpush.msra.mxu1 %v3471_v24 }
 0x1a6   : > { %vm1623_vm15 = vc.u32 %v1621_v2, %v1617_v57  ;;  %v1574_v14 = vsel %vm1570_vm3, %v5469_v32, %v1573_v27  ;;  %v1605_v4 = vadd.s32 %v1604_v48, %v1594_v61  ;;  %v2617_v36 = vand.u32 2139095040, %v5508_v41 }
 0x1a7   : > { %3607 = vperm.xlu1 %4408, %v3103_v30   ;;  %v2116_v56 = vand.u32 2147483647, %v2115_v11  ;;  %v1624_v37 = vsel %vm1623_vm15, 1, %v4761_v60  ;;  %v1618_v55 = vshrl.u32 %v5516_v26, 16  ;;  %v2123_v32 = vsel %vm2000_vm11, %v2122_v34, %v5465_v31  ;;  %3495 = vmatpush.msra.mxu1 %v3470_v15 }
 0x1a8   : > { %v1626_v50 = vadd.s32 %v1624_v37, %v1622_v1  ;;  %v5547_v19 = vadd.s32 %v1605_v4, %v1596_v59  ;;  %v5549_v16 = vadd.s32 %v1621_v2, %v1617_v57  ;;  %v2618_v0 = vshrl.u32 %v2617_v36, 23 }
 0x1a9   : > { %v2119_v5 = vmul.f32 %v2118_v22, %v2116_v56  ;;  %v1575_v52 = vsel %vm1569_vm4, %v1572_v7, %v1574_v14  ;;  %v2125_v31 = vsel %vm5539_vm0, 0, %v2123_v32  ;;  %v2614_v45 = vand.u32 2147483647, %v5508_v41 }
 0x1aa   : > { %v1627_v28 = vadd.s32 %v1626_v50, %v1616_v54  ;;  %v4143_v63 = vadd.s32 4294967169, %v2618_v0  ;;  %v1629_v46 = vmul.u32 %v5484_v42, %v1575_v52  ;;  %vm1631_vm1 = vc.u32 %v5547_v19, %v5549_v16  ;;  %v584_v54 = vld [vmem:[%s4962_s15 + $0x20] sm:$0xff] }
 0x1ab   : > { %v2120_v12 = vxor.u32 2147483648, %v2119_v5  ;;  %v5563_v6 = vand.u32 3, %v2125_v31  ;;  %v2621_v35 = vand.u32 8388607, %v2614_v45  ;;  %vm2141_vm6 = vweird.f32 %v5202_v21 }
 0x1ac   : > { %v1628_v30 = vadd.s32 %v1627_v28, %v1618_v55  ;;  %v2624_v9 = vadd.s32 1, %v4143_v63  ;;  %v5594_v0 = vmul.f32 0.62831855, %v584_v54  ;;  %vm1538_vm13 = vcmp.lt.s32.totalorder %v5369_v38, 0 }
 0x1ad   : > { %v2121_v58 = vsel %vm2000_vm11, %v2120_v12, %v2119_v5  ;;  %vm2144_vm3 = vcmp.eq.s32.totalorder %v5563_v6, 0  ;;  %vm2147_vm4 = vcmp.eq.s32.totalorder %v5563_v6, 2  ;;  %vm2143_vm5 = vcmp.lt.s32.totalorder %v5563_v6, 2 }
 0x1ae   : > { %v2124_v26 = vsel %vm5539_vm0, %v5202_v21, %v2121_v58  ;;  %v1632_v40 = vadd.s32 1, %v1628_v30  ;;  %vm2625_vm2 = vcmp.gt.s32.totalorder %v2624_v9, 0  ;;  %v2622_v20 = vor.u32 8388608, %v2621_v35 }
 0x1af   : > { %v2126_v47 = vmul.f32 %v2124_v26, %v2124_v26  ;;  %v2626_v57 = vsel %vm2625_vm2, %v2624_v9, 0  ;;  %vm5668_vm2 = vcmp.le.f32.partialorder %v1536_v25, 0.7853982 }
 0x1b0   : > { %v1633_v53 = vsel %vm1631_vm1, %v1632_v40, %v1628_v30  ;;  %v2628_v17 = vand.u32 31, %v2626_v57  ;;  %v5573_v62 = vshrl.u32 %v2626_v57, 5 }
 0x1b1   : > { %v2127_v39 = vmul.f32 -0.001358992, %v2126_v47  ;;  %v2134_v27 = vmul.f32 -0.00019511016, %v2126_v47  ;;  %v1634_v61 = vadd.s32 %v1633_v53, %v1629_v46 }
 0x1b2   : > { %v5570_v2 = vsub.s32 32, %v2628_v17  ;;  %v2631_v59 = vshll.u32 %v4756_v8, %v2628_v17  ;;  %v2634_v5 = vshll.u32 %v4757_v10, %v2628_v17  ;;  %v2640_v4 = vshll.u32 %v4755_v3, %v2628_v17 }
 0x1b3   : > { %v2128_v11 = vadd.f32 0.041655596, %v2127_v39  ;;  %v2135_v22 = vadd.f32 0.008332121, %v2134_v27  ;;  %v1635_v44 = vadd.s32 536870912, %v1634_v61  ;;  %v2637_v12 = vshll.u32 %v4758_v13, %v2628_v17 }
 0x1b4   : > { %v2632_v1 = vshrl.u32 %v4757_v10, %v5570_v2  ;;  %v2635_v7 = vshrl.u32 %v4758_v13, %v5570_v2  ;;  %v2641_v37 = vshrl.u32 %v4759_v18, %v5570_v2  ;;  %v2638_v55 = vshrl.u32 %v4755_v3, %v5570_v2 }
 0x1b5   : > { %v2129_v56 = vmul.f32 %v2128_v11, %v2126_v47  ;;  %v2136_v42 = vmul.f32 %v2135_v22, %v2126_v47  ;;  %v5577_v48 = vshrl.u32 %v1635_v44, 30  ;;  %v2643_v28 = vshll.u32 %v4759_v18, %v2628_v17 }
 0x1b6   : > { %v5592_v15 = vor.u32 %v2632_v1, %v2631_v59  ;;  %v5596_v52 = vor.u32 %v2635_v7, %v2634_v5  ;;  %v2644_v63 = vshrl.u32 %v4760_v23, %v5570_v2  ;;  %v2642_v30 = vor.u32 %v2641_v37, %v2640_v4 }
 0x1b7   : > { %v2130_v34 = vadd.f32 -0.4999988, %v2129_v56  ;;  %v2137_v51 = vadd.f32 -0.16666654, %v2136_v42  ;;  %v1637_v36 = vshll.u32 %v5577_v48, 30  ;;  %vm2646_vm7 = vcmp.lt.s32.totalorder %v5573_v62, 1 }
 0x1b8   : > { %v2639_v9 = vor.u32 %v2638_v55, %v2637_v12  ;;  %v5602_v39 = vshll.u32 %v2622_v20, 8  ;;  %vm2648_vm9 = vcmp.lt.s32.totalorder %v5573_v62, 3  ;;  %vm2649_vm10 = vcmp.lt.s32.totalorder %v5573_v62, 4 }
 0x1b9   : > { %v2131_v24 = vmul.f32 %v2130_v34, %v2126_v47  ;;  %v2138_v14 = vmul.f32 %v2137_v51, %v2126_v47  ;;  %v1638_v58 = vsub.s32 %v1634_v61, %v1637_v36  ;;  %v2645_v22 = vor.u32 %v2644_v63, %v2643_v28 }
 0x1ba   : > { %vm2647_vm11 = vcmp.lt.s32.totalorder %v5573_v62, 2  ;;  %v2655_v61 = vsel %vm2649_vm10, %v2642_v30, 920167782  ;;  %v1231_v17 = vand.u32 2139095040, %v5594_v0  ;;  %v1630_v42 = vadd.s32 %v5549_v16, %v5547_v19 }
 0x1bb   : > { %v2132_v50 = vadd.f32 1.0, %v2131_v24  ;;  %v2139_v32 = vadd.f32 1.0, %v2138_v14  ;;  %vm1639_vm8 = vcmp.lt.s32.totalorder %v1638_v58, 0  ;;  %v1640_v46 = vsub.s32 0, %v1638_v58 }
 0x1bc   : > { %v2656_v44 = vsel %vm2648_vm9, %v2639_v9, %v2655_v61  ;;  %v2658_v59 = vsel %vm2646_vm7, %v5596_v52, %v2639_v9  ;;  %v2659_v6 = vsel %vm2649_vm10, %v2645_v22, 1326507024  ;;  %v2663_v19 = vand.u32 65535, %v5602_v39 }
 0x1bd   : > { %v2140_v31 = vmul.f32 %v2139_v32, %v2124_v26  ;;  %v2148_v47 = vxor.u32 2147483648, %v2132_v50  ;;  %v1641_v11 = vsel %vm1639_vm8, %v1640_v46, %v1638_v58  ;;  %v2654_v26 = vsel %vm2646_vm7, %v5592_v15, %v5596_v52 }
 0x1be   : > { %v1642_v57 = vclz %v1641_v11  ;;  %v2657_v51 = vsel %vm2647_vm11, %v2654_v26, %v2656_v44  ;;  %v2664_v16 = vshrl.u32 %v5602_v39, 16  ;;  %v1660_v21 = vsub.s32 4, %v5577_v48 }
 0x1bf   : > { %v2145_v27 = vxor.u32 2147483648, %v2140_v31  ;;  %v2149_v40 = vsel %vm2147_vm4, %v2148_v47, %v2140_v31  ;;  %v2660_v5 = vsel %vm2648_vm9, %v2642_v30, %v2659_v6  ;;  %v1232_v7 = vshrl.u32 %v1231_v17, 23  ;;  %v3669_v6 = vld [vmem:[#allocation2 + $0x8] sm:$0xff] }
 0x1c0   : > { %v4123_v34 = vadd.s32 4294967294, %v1642_v57  ;;  %v2661_v14 = vsel %vm2647_vm11, %v2658_v59, %v2660_v5  ;;  %v2688_v4 = vshrl.u32 %v2657_v51, 16  ;;  %v2687_v12 = vand.u32 65535, %v2657_v51  ;;  %3763 = vmatpush.msra.mxu2 %v3669_v6 }
 0x1c1   : > { %v2146_v53 = vsel %vm2144_vm3, %v2132_v50, %v2145_v27  ;;  %v2630_v55 = vshrl.u32 %v4756_v8, %v5570_v2  ;;  %v2665_v50 = vand.u32 65535, %v2661_v14  ;;  %v2666_v32 = vshrl.u32 %v2661_v14, 16 }
 0x1c2   : > { %v2150_v56 = vsel %vm2143_vm5, %v2146_v53, %v2149_v40  ;;  %vm4124_vm12 = vcmp.lt.s32.totalorder %v4123_v34, 0  ;;  %v5643_v31 = vmul.u32 %v2688_v4, %v2663_v19  ;;  %v4116_v47 = vadd.s32 4294967169, %v1232_v7 }
 0x1c3   : > { %v2151_v35 = vsel %vm2141_vm6, nan, %v2150_v56  ;;  %v1645_v24 = vsel %vm4124_vm12, 0, %v4123_v34  ;;  %v5648_v30 = vsel %vm1538_vm13, %v1660_v21, %v5577_v48  ;;  %v2668_v46 = vmul.u32 %v2666_v32, %v2663_v19 }
 0x1c4   : > { %v3085_v1 = vadd.f32 1.0, %v2151_v35  ;;  %v1646_v37 = vsub.s32 32, %v1645_v24  ;;  %v1647_v36 = vshll.u32 %v1638_v58, %v1645_v24  ;;  %v1650_v20 = vsub.s32 4294967266, %v1645_v24 }
 0x1c5   : > { %v2667_v58 = vmul.u32 %v2665_v50, %v2663_v19  ;;  %v2669_v27 = vmul.u32 %v2665_v50, %v2664_v16  ;;  %v2689_v22 = vmul.u32 %v2687_v12, %v2663_v19  ;;  %v5650_v26 = vmul.u32 %v2687_v12, %v2664_v16  ;;  %v3468_v19 = vld [vmem:[#allocation12 + $0x18] sm:$0xff] }
 0x1c6   : > { %v3101_v54 = vmul.f32 0.5, %v3085_v1  ;;  %v1648_v28 = vshrl.u32 %v1630_v42, %v1646_v37  ;;  %v1651_v63 = vadd.s32 127, %v1650_v20  ;;  %v2650_v2 = vsel %vm2646_vm7, %v2630_v55, %v5592_v15  ;;  %v3469_v1 = vld [vmem:[#allocation12 + $0x20] sm:$0xff] }
 0x1c7   : > { %v2670_v53 = vmul.u32 %v2666_v32, %v2664_v16  ;;  %v2671_v57 = vshll.u32 %v2668_v46, 16  ;;  %v2673_v61 = vshll.u32 %v2669_v27, 16  ;;  %v2692_v42 = vmul.u32 %v2688_v4, %v2664_v16  ;;  %3496 = vmatpush.msra.mxu1 %v3469_v1  ;;  %v3467_v4 = vld [vmem:[#allocation12 + $0x10] sm:$0xff]  ;;  %v3667_v37 = vld [vmem:[#allocation2] sm:$0xff] }
 0x1c8   : > { %3597 = vperm.xlu1 %4408, %v3101_v54   ;;  %v1649_v40 = vor.u32 %v1648_v28, %v1647_v36  ;;  %v1652_v11 = vshll.u32 %v1651_v63, 23  ;;  %v2693_v48 = vshll.u32 %v5643_v31, 16  ;;  %v2651_v44 = vsel %vm2649_vm10, %v2639_v9, 2102212464  ;;  %v3668_v9 = vld [vmem:[#allocation2 + $0x18] sm:$0xff]  ;;  %v3666_v28 = vld [vmem:[#allocation2 + $0x10] sm:$0xff] }
 0x1c9   : > { %vm2675_vm14 = vc.u32 %v2667_v58, %v2671_v57  ;;  %v2677_v35 = vadd.s32 %v2671_v57, %v2667_v58  ;;  %v2695_v34 = vshll.u32 %v5650_v26, 16  ;;  %v2672_v21 = vshrl.u32 %v2668_v46, 16  ;;  %3497 = vmatpush.msra.mxu1 %v3468_v19  ;;  %3764 = vmatpush.msra.mxu2 %v3668_v9  ;;  %v3466_v63 = vld [vmem:[#allocation12 + $0x8] sm:$0xff]  ;;  %v5692_v57 = vld [vmem:[%s7320_s6] ss:$0 sm:$0xff] }
 0x1ca   : > { %v1653_v17 = vor.u32 4788187, %v1652_v11  ;;  %v1656_v56 = vcvt.s32.f32 %v1649_v40  ;;  %v2676_v59 = vsel %vm2675_vm14, 1, %v4761_v60  ;;  %vm2697_vm15 = vc.u32 %v2689_v22, %v2693_v48 }
 0x1cb   : > { %v2699_v15 = vadd.s32 %v2693_v48, %v2689_v22  ;;  %v2678_v5 = vadd.s32 %v2676_v59, %v2670_v53  ;;  %vm2679_vm0 = vc.u32 %v2677_v35, %v2673_v61  ;;  %v2698_v16 = vsel %vm2697_vm15, 1, %v4761_v60  ;;  %3498 = vmatpush.msra.mxu1 %v3467_v4  ;;  %3765 = vmatpush.msra.mxu2 %v3667_v37 }
 0x1cc   : > { %v1654_v51 = vand.u32 2147483647, %v1653_v17  ;;  %v2652_v54 = vsel %vm2648_vm9, %v5596_v52, %v2651_v44  ;;  %v2680_v24 = vsel %vm2679_vm0, 1, %v4761_v60  ;;  %v2700_v14 = vadd.s32 %v2698_v16, %v2692_v42 }
 0x1cd   : > { %v2674_v36 = vshrl.u32 %v2669_v27, 16  ;;  %v2682_v20 = vadd.s32 %v2680_v24, %v2678_v5  ;;  %v2694_v12 = vshrl.u32 %v5643_v31, 16  ;;  %vm2701_vm1 = vc.u32 %v2699_v15, %v2695_v34  ;;  %3766 = vmatpush.msra.mxu2 %v3666_v28  ;;  %3499 = vmatpush.msra.mxu1 %v3466_v63 }
 0x1ce   : > { %v1657_v7 = vmul.f32 %v1656_v56, %v1654_v51  ;;  %v2702_v52 = vsel %vm2701_vm1, 1, %v4761_v60  ;;  %v1228_v32 = vand.u32 2147483647, %v5594_v0  ;;  %v2696_v46 = vshrl.u32 %v5650_v26, 16 }
 0x1cf   : > { %v2683_v58 = vadd.s32 %v2682_v20, %v2672_v21  ;;  %v2704_v31 = vadd.s32 %v2702_v52, %v2700_v14  ;;  %v1238_v27 = vadd.s32 1, %v4116_v47  ;;  %v1663_v40 = vsel %vm5668_vm2, 0, %v5648_v30 }
 0x1d0   : > { %v1658_v50 = vxor.u32 2147483648, %v1657_v7  ;;  %v2653_v11 = vsel %vm2647_vm11, %v2650_v2, %v2652_v54  ;;  %v5682_v22 = vadd.s32 %v2699_v15, %v2695_v34  ;;  %v3161_v2 = vpop.f32.mrf.mxu0  ;;  %v5694_v61 = vand.u32 3, %v1663_v40 }
 0x1d1   : > { %v5687_v53 = vadd.s32 %v2683_v58, %v2674_v36  ;;  %v2705_v47 = vadd.s32 %v2704_v31, %v2694_v12  ;;  %vm1239_vm3 = vcmp.gt.s32.totalorder %v1238_v27, 0  ;;  %v2707_v56 = vmul.u32 %v5602_v39, %v2653_v11 }
 0x1d2   : > { %v1659_v25 = vsel %vm1538_vm13, %v1658_v50, %v1657_v7  ;;  %v1240_v62 = vsel %vm1239_vm3, %v1238_v27, 0  ;;  %v1235_v42 = vand.u32 8388607, %v1228_v32  ;;  %v5702_v51 = vadd.f32 %v5692_v57, %v3161_v2 }
 0x1d3   : > { %v1662_v26 = vsel %vm5668_vm2, %v5369_v38, %v1659_v25  ;;  %v2706_v17 = vadd.s32 %v2705_v47, %v2696_v46  ;;  %vm2709_vm4 = vc.u32 %v5687_v53, %v5682_v22  ;;  %v1242_v35 = vand.u32 31, %v1240_v62 }
 0x1d4   : > { %v1664_v30 = vmul.f32 %v1662_v26, %v1662_v26  ;;  %vm1685_vm5 = vcmp.eq.s32.totalorder %v5694_v61, 2  ;;  %v1236_v6 = vor.u32 8388608, %v1235_v42  ;;  %v5707_v19 = vshrl.u32 %v1240_v62, 5 }
 0x1d5   : > { %v2710_v34 = vadd.s32 1, %v2706_v17  ;;  %v5704_v1 = vsub.s32 32, %v1242_v35  ;;  %v1245_v21 = vshll.u32 %v4756_v8, %v1242_v35  ;;  %v1248_v9 = vshll.u32 %v4757_v10, %v1242_v35 }
 0x1d6   : > { %v1665_v48 = vmul.f32 -0.001358992, %v1664_v30  ;;  %v1672_v44 = vmul.f32 -0.00019511016, %v1664_v30  ;;  %v1251_v14 = vshll.u32 %v4758_v13, %v1242_v35  ;;  %v1254_v4 = vshll.u32 %v4755_v3, %v1242_v35 }
 0x1d7   : > { %v2711_v39 = vsel %vm2709_vm4, %v2710_v34, %v2706_v17  ;;  %v1246_v54 = vshrl.u32 %v4757_v10, %v5704_v1  ;;  %v1249_v24 = vshrl.u32 %v4758_v13, %v5704_v1  ;;  %v1252_v12 = vshrl.u32 %v4755_v3, %v5704_v1 }
 0x1d8   : > { %v1666_v59 = vadd.f32 0.041655596, %v1665_v48  ;;  %v1673_v15 = vadd.f32 0.008332121, %v1672_v44  ;;  %v2712_v7 = vadd.s32 %v2711_v39, %v2707_v56  ;;  %v1255_v50 = vshrl.u32 %v4759_v18, %v5704_v1 }
 0x1d9   : > { %v5719_v55 = vor.u32 %v1246_v54, %v1245_v21  ;;  %v1257_v52 = vshll.u32 %v4759_v18, %v1242_v35  ;;  %vm1260_vm6 = vcmp.lt.s32.totalorder %v5707_v19, 1  ;;  %v5727_v46 = vor.u32 %v1249_v24, %v1248_v9 }
 0x1da   : > { %v1667_v5 = vmul.f32 %v1666_v59, %v1664_v30  ;;  %v1674_v16 = vmul.f32 %v1673_v15, %v1664_v30  ;;  %v2713_v20 = vadd.s32 536870912, %v2712_v7  ;;  %v1253_v31 = vor.u32 %v1252_v12, %v1251_v14  ;;  %v592_v14 = vld [vmem:[%s4962_s15 + $0x60] sm:$0xff] }
 0x1db   : > { %v1256_v27 = vor.u32 %v1255_v50, %v1254_v4  ;;  %v1258_v25 = vshrl.u32 %v4760_v23, %v5704_v1  ;;  %vm1263_vm7 = vcmp.lt.s32.totalorder %v5707_v19, 4  ;;  %vm1262_vm8 = vcmp.lt.s32.totalorder %v5707_v19, 3 }
 0x1dc   : > { %v1668_v37 = vadd.f32 -0.4999988, %v1667_v5  ;;  %v1675_v36 = vadd.f32 -0.16666654, %v1674_v16  ;;  %v5725_v58 = vshrl.u32 %v2713_v20, 30  ;;  %vm1261_vm9 = vcmp.lt.s32.totalorder %v5707_v19, 2 }
 0x1dd   : > { %v1259_v62 = vor.u32 %v1258_v25, %v1257_v52  ;;  %v5737_v2 = vshll.u32 %v1236_v6, 8  ;;  %v1268_v48 = vsel %vm1260_vm6, %v5719_v55, %v5727_v46  ;;  %vm1681_vm10 = vcmp.lt.s32.totalorder %v5694_v61, 2 }
 0x1de   : > { %v1669_v28 = vmul.f32 %v1668_v37, %v1664_v30  ;;  %v1676_v63 = vmul.f32 %v1675_v36, %v1664_v30  ;;  %v2715_v47 = vshll.u32 %v5725_v58, 30  ;;  %v1269_v30 = vsel %vm1263_vm7, %v1256_v27, 920167782 }
 0x1df   : > { %vm1682_vm11 = vcmp.eq.s32.totalorder %v5694_v61, 0  ;;  %v1270_v44 = vsel %vm1262_vm8, %v1253_v31, %v1269_v30  ;;  %v1272_v35 = vsel %vm1260_vm6, %v5727_v46, %v1253_v31  ;;  %vm1679_vm13 = vweird.f32 %v5369_v38 }
 0x1e0   : > { %v1670_v40 = vadd.f32 1.0, %v1669_v28  ;;  %v1677_v11 = vadd.f32 1.0, %v1676_v63  ;;  %v2716_v42 = vsub.s32 %v2712_v7, %v2715_v47  ;;  %v1271_v15 = vsel %vm1261_vm9, %v1268_v48, %v1270_v44 }
 0x1e1   : > { %v1273_v39 = vsel %vm1263_vm7, %v1259_v62, 1326507024  ;;  %v1277_v6 = vand.u32 65535, %v5737_v2  ;;  %v1278_v7 = vshrl.u32 %v5737_v2, 16  ;;  %v1302_v24 = vshrl.u32 %v1271_v15, 16 }
 0x1e2   : > { %v1678_v17 = vmul.f32 %v1677_v11, %v1662_v26  ;;  %v1686_v56 = vxor.u32 2147483648, %v1670_v40  ;;  %vm2717_vm12 = vcmp.lt.s32.totalorder %v2716_v42, 0  ;;  %v2718_v59 = vsub.s32 0, %v2716_v42 }
 0x1e3   : > { %v1274_v16 = vsel %vm1262_vm8, %v1256_v27, %v1273_v39  ;;  %v1301_v20 = vand.u32 65535, %v1271_v15  ;;  %v3225_v12 = vand.u32 2147483647, %v5702_v51  ;;  %v5767_v25 = vmul.f32 0.62831855, %v592_v14 }
 0x1e4   : > { %v1683_v34 = vxor.u32 2147483648, %v1678_v17  ;;  %v1687_v26 = vsel %vm1685_vm5, %v1686_v56, %v1678_v17  ;;  %v2719_v5 = vsel %vm2717_vm12, %v2718_v59, %v2716_v42  ;;  %v1275_v38 = vsel %vm1261_vm9, %v1272_v35, %v1274_v16 }
 0x1e5   : > { %v2720_v54 = vclz %v2719_v5  ;;  %v1279_v37 = vand.u32 65535, %v1275_v38  ;;  %v1280_v36 = vshrl.u32 %v1275_v38, 16  ;;  %v1304_v11 = vmul.u32 %v1302_v24, %v1277_v6 }
 0x1e6   : > { %v1684_v21 = vsel %vm1682_vm11, %v1670_v40, %v1683_v34  ;;  %v2708_v40 = vadd.s32 %v5682_v22, %v5687_v53  ;;  %v1305_v17 = vmul.u32 %v1301_v20, %v1278_v7  ;;  %v1244_v34 = vshrl.u32 %v4756_v8, %v5704_v1 }
 0x1e7   : > { %v1688_v9 = vsel %vm1681_vm10, %v1684_v21, %v1687_v26  ;;  %v4144_v52 = vadd.s32 4294967294, %v2720_v54  ;;  %v1281_v28 = vmul.u32 %v1279_v37, %v1277_v6  ;;  %v1282_v63 = vmul.u32 %v1280_v36, %v1277_v6 }
 0x1e8   : > { %v1689_v4 = vsel %vm1679_vm13, nan, %v1688_v9  ;;  %v1283_v27 = vmul.u32 %v1279_v37, %v1278_v7  ;;  %v1284_v62 = vmul.u32 %v1280_v36, %v1278_v7  ;;  %v1265_v26 = vsel %vm1263_vm7, %v1253_v31, 2102212464 }
 0x1e9   : > { %v3082_v50 = vadd.f32 1.0, %v1689_v4  ;;  %vm4145_vm14 = vcmp.lt.s32.totalorder %v4144_v52, 0  ;;  %v1285_v30 = vshll.u32 %v1282_v63, 16  ;;  %v1303_v59 = vmul.u32 %v1301_v20, %v1277_v6 }
 0x1ea   : > { %v2723_v47 = vsel %vm4145_vm14, 0, %v4144_v52  ;;  %v1287_v35 = vshll.u32 %v1283_v27, 16  ;;  %v1286_v21 = vshrl.u32 %v1282_v63, 16  ;;  %v1306_v16 = vmul.u32 %v1302_v24, %v1278_v7 }
 0x1eb   : > { %v3098_v61 = vmul.f32 0.5, %v3082_v50  ;;  %v2724_v56 = vsub.s32 32, %v2723_v47  ;;  %v2725_v48 = vshll.u32 %v2716_v42, %v2723_v47  ;;  %v2728_v44 = vsub.s32 4294967266, %v2723_v47 }
 0x1ec   : > { %vm1289_vm15 = vc.u32 %v1281_v28, %v1285_v30  ;;  %v1291_v39 = vadd.s32 %v1285_v30, %v1281_v28  ;;  %v1307_v9 = vshll.u32 %v1304_v11, 16  ;;  %v1309_v38 = vshll.u32 %v1305_v17, 16 }
 0x1ed   : > { %3582 = vperm.xlu1 %4408, %v3098_v61   ;;  %v2726_v22 = vshrl.u32 %v2708_v40, %v2724_v56  ;;  %v2729_v53 = vadd.s32 127, %v2728_v44  ;;  %v1290_v15 = vsel %vm1289_vm15, 1, %v4761_v60  ;;  %v1288_v14 = vshrl.u32 %v1283_v27, 16 }
 0x1ee   : > { %v1292_v5 = vadd.s32 %v1290_v15, %v1284_v62  ;;  %vm1293_vm0 = vc.u32 %v1291_v39, %v1287_v35  ;;  %vm1311_vm1 = vc.u32 %v1303_v59, %v1307_v9  ;;  %v1313_v31 = vadd.s32 %v1307_v9, %v1303_v59  ;;  %v582_v35 = vld [vmem:[%s4962_s15 + $0x10] sm:$0xff] }
 0x1ef   : > { %v2727_v42 = vor.u32 %v2726_v22, %v2725_v48  ;;  %v2730_v54 = vshll.u32 %v2729_v53, 23  ;;  %v1294_v1 = vsel %vm1293_vm0, 1, %v4761_v60  ;;  %v1312_v36 = vsel %vm1311_vm1, 1, %v4761_v60 }
 0x1f0   : > { %v1296_v37 = vadd.s32 %v1294_v1, %v1292_v5  ;;  %v1264_v20 = vsel %vm1260_vm6, %v1244_v34, %v5719_v55  ;;  %v1308_v7 = vshrl.u32 %v1304_v11, 16  ;;  %v1314_v24 = vadd.s32 %v1312_v36, %v1306_v16 }
 0x1f1   : > { %v2731_v4 = vor.u32 4788187, %v2730_v54  ;;  %v2734_v6 = vcvt.s32.f32 %v2727_v42  ;;  %vm1315_vm2 = vc.u32 %v1313_v31, %v1309_v38  ;;  %v1266_v52 = vsel %vm1262_vm8, %v5727_v46, %v1265_v26 }
 0x1f2   : > { %v1297_v28 = vadd.s32 %v1296_v37, %v1286_v21  ;;  %v1316_v63 = vsel %vm1315_vm2, 1, %v4761_v60  ;;  %v2738_v27 = vsub.s32 4, %v5725_v58  ;;  %v1310_v61 = vshrl.u32 %v1305_v17, 16 }
 0x1f3   : > { %v2732_v50 = vand.u32 2147483647, %v2731_v4  ;;  %v1318_v40 = vadd.s32 %v1316_v63, %v1314_v24  ;;  %v2463_v47 = vand.u32 2139095040, %v5767_v25  ;;  %v1317_v11 = vadd.s32 %v1313_v31, %v1309_v38 }
 0x1f4   : > { %v1298_v55 = vadd.s32 %v1297_v28, %v1288_v14  ;;  %vm2616_vm3 = vcmp.lt.s32.totalorder %v5508_v41, 0  ;;  %v1267_v30 = vsel %vm1261_vm9, %v1264_v20, %v1266_v52  ;;  %vm5792_vm4 = vcmp.le.f32.partialorder %v2614_v45, 0.7853982 }
 0x1f5   : > { %v2735_v62 = vmul.f32 %v2734_v6, %v2732_v50  ;;  %v1319_v56 = vadd.s32 %v1318_v40, %v1308_v7  ;;  %v2464_v46 = vshrl.u32 %v2463_v47, 23  ;;  %v2460_v44 = vand.u32 2147483647, %v5767_v25 }
 0x1f6   : > { %v3241_v34 = vsub.f32 0.0, %v3225_v12  ;;  %v2739_v26 = vsel %vm2616_vm3, %v2738_v27, %v5725_v58  ;;  %v1321_v53 = vmul.u32 %v5737_v2, %v1267_v30  ;;  %vm1323_vm5 = vc.u32 %v1298_v55, %v1317_v11 }
 0x1f7   : > { %v2736_v17 = vxor.u32 2147483648, %v2735_v62  ;;  %v1320_v59 = vadd.s32 %v1319_v56, %v1310_v61  ;;  %v4140_v19 = vadd.s32 4294967169, %v2464_v46  ;;  %v5805_v21 = vmul.f32 0.62831855, %v582_v35 }
 0x1f8   : > { %v2741_v5 = vsel %vm5792_vm4, 0, %v2739_v26  ;;  %v2467_v58 = vand.u32 8388607, %v2460_v44  ;;  %v3257_v16 = vmul.f32 1.442695, %v3241_v34  ;;  %v3209_v7 = vmax.f32 %v5702_v51, 0.0 }
 0x1f9   : > { %v2737_v22 = vsel %vm2616_vm3, %v2736_v17, %v2735_v62  ;;  %v1324_v15 = vadd.s32 1, %v1320_v59  ;;  %v2470_v39 = vadd.s32 1, %v4140_v19  ;;  %v5811_v14 = vand.u32 3, %v2741_v5 }
 0x1fa   : > { %v2740_v45 = vsel %vm5792_vm4, %v5508_v41, %v2737_v22  ;;  %v920_v31 = vand.u32 2147483647, %v5805_v21  ;;  %v923_v4 = vand.u32 2139095040, %v5805_v21  ;;  %v2468_v20 = vor.u32 8388608, %v2467_v58 }
 0x1fb   : > { %v2742_v12 = vmul.f32 %v2740_v45, %v2740_v45  ;;  %v1325_v9 = vsel %vm1323_vm5, %v1324_v15, %v1320_v59  ;;  %vm2471_vm6 = vcmp.gt.s32.totalorder %v2470_v39, 0  ;;  %4415 = vpow2.f32 %v3257_v16 }
 0x1fc   : > { %v1326_v54 = vadd.s32 %v1325_v9, %v1321_v53  ;;  %v2472_v38 = vsel %vm2471_vm6, %v2470_v39, 0  ;;  %vm2760_vm7 = vcmp.eq.s32.totalorder %v5811_v14, 0  ;;  %vm2763_vm8 = vcmp.eq.s32.totalorder %v5811_v14, 2 }
 0x1fd   : > { %v2743_v2 = vmul.f32 -0.001358992, %v2742_v12  ;;  %v2750_v42 = vmul.f32 -0.00019511016, %v2742_v12  ;;  %v2474_v1 = vand.u32 31, %v2472_v38  ;;  %v5822_v63 = vadd.s32 %v1317_v11, %v1298_v55 }
 0x1fe   : > { %v1327_v36 = vadd.s32 536870912, %v1326_v54  ;;  %v924_v27 = vshrl.u32 %v923_v4, 23  ;;  %v5826_v61 = vand.u32 8388607, %v920_v31  ;;  %vm2759_vm9 = vcmp.lt.s32.totalorder %v5811_v14, 2 }
 0x1ff   : > { %v2744_v6 = vadd.f32 0.041655596, %v2743_v2  ;;  %v2751_v37 = vadd.f32 0.008332121, %v2750_v42  ;;  %v5816_v24 = vsub.s32 32, %v2474_v1  ;;  %v5830_v30 = vshll.u32 %v2468_v20, 8 }
 0x200   : > { %v5818_v28 = vshrl.u32 %v1327_v36, 30  ;;  %vm2757_vm10 = vweird.f32 %v5508_v41  ;;  %v5833_v56 = vshrl.u32 %v2472_v38, 5  ;;  %v2477_v55 = vshll.u32 %v4756_v8, %v2474_v1 }
 0x201   : > { %v2745_v50 = vmul.f32 %v2744_v6, %v2742_v12  ;;  %v2752_v52 = vmul.f32 %v2751_v37, %v2742_v12  ;;  %v2486_v11 = vshll.u32 %v4755_v3, %v2474_v1  ;;  %v2487_v46 = vshrl.u32 %v4759_v18, %v5816_v24  ;;  %v5849_v53 = vpop.eup %4415 }
 0x202   : > { %v1329_v62 = vshll.u32 %v5818_v28, 30  ;;  %v2480_v34 = vshll.u32 %v4757_v10, %v2474_v1  ;;  %v2478_v26 = vshrl.u32 %v4757_v10, %v5816_v24  ;;  %v2481_v59 = vshrl.u32 %v4758_v13, %v5816_v24 }
 0x203   : > { %v2746_v40 = vadd.f32 -0.4999988, %v2745_v50  ;;  %v2753_v47 = vadd.f32 -0.16666654, %v2752_v52  ;;  %v2483_v19 = vshll.u32 %v4758_v13, %v2474_v1  ;;  %v2484_v22 = vshrl.u32 %v4755_v3, %v5816_v24 }
 0x204   : > { %v5839_v35 = vsub.s32 %v1326_v54, %v1329_v62  ;;  %v2489_v58 = vshll.u32 %v4759_v18, %v2474_v1  ;;  %v2490_v16 = vshrl.u32 %v4760_v23, %v5816_v24  ;;  %v4110_v9 = vadd.s32 4294967169, %v924_v27 }
 0x205   : > { %v2747_v48 = vmul.f32 %v2746_v40, %v2742_v12  ;;  %v2754_v17 = vmul.f32 %v2753_v47, %v2742_v12  ;;  %v2488_v12 = vor.u32 %v2487_v46, %v2486_v11  ;;  %vm2495_vm12 = vcmp.lt.s32.totalorder %v5833_v56, 4 }
 0x206   : > { %vm1331_vm11 = vcmp.lt.s32.totalorder %v5839_v35, 0  ;;  %v1332_v5 = vsub.s32 0, %v5839_v35  ;;  %v5858_v4 = vor.u32 %v2478_v26, %v2477_v55  ;;  %v5860_v6 = vor.u32 %v2481_v59, %v2480_v34 }
 0x207   : > { %v2748_v15 = vadd.f32 1.0, %v2747_v48  ;;  %v2755_v39 = vadd.f32 1.0, %v2754_v17  ;;  %v5863_v37 = vand.u32 65535, %v5830_v30  ;;  %v5867_v20 = vor.u32 %v2484_v22, %v2483_v19 }
 0x208   : > { %v1333_v54 = vsel %vm1331_vm11, %v1332_v5, %v5839_v35  ;;  %vm2492_vm13 = vcmp.lt.s32.totalorder %v5833_v56, 1  ;;  %v3289_v50 = vadd.f32 1.0, %v5849_v53  ;;  %vm2494_vm14 = vcmp.lt.s32.totalorder %v5833_v56, 3 }
 0x209   : > { %v2756_v2 = vmul.f32 %v2755_v39, %v2740_v45  ;;  %v2764_v42 = vxor.u32 2147483648, %v2748_v15  ;;  %v1334_v38 = vclz %v1333_v54  ;;  %v2501_v52 = vsel %vm2495_vm12, %v2488_v12, 920167782 }
 0x20a   : > { %v3292_v40 = vmul.f32 -0.5, %v5849_v53  ;;  %v2491_v47 = vor.u32 %v2490_v16, %v2489_v58  ;;  %v930_v62 = vadd.s32 1, %v4110_v9  ;;  %vm1230_vm15 = vcmp.lt.s32.totalorder %v5594_v0, 0 }
 0x20b   : > { %v2761_v36 = vxor.u32 2147483648, %v2756_v2  ;;  %v2765_v1 = vsel %vm2763_vm8, %v2764_v42, %v2756_v2  ;;  %v4117_v45 = vadd.s32 4294967294, %v1334_v38  ;;  %vm2493_vm1 = vcmp.lt.s32.totalorder %v5833_v56, 2 }
 0x20c   : > { %v2500_v11 = vsel %vm2492_vm13, %v5858_v4, %v5860_v6  ;;  %4417 = vlog2.f32 %v3289_v50  ;;  %v2502_v14 = vsel %vm2494_vm14, %v5867_v20, %v2501_v52  ;;  %v3293_v19 = vadd.f32 1.0, %v3292_v40 }
 0x20d   : > { %v2762_v27 = vsel %vm2760_vm7, %v2748_v15, %v2761_v36  ;;  %vm4118_vm0 = vcmp.lt.s32.totalorder %v4117_v45, 0  ;;  %v2510_v22 = vshrl.u32 %v5830_v30, 16  ;;  %v928_v15 = vor.u32 8388608, %v5826_v61 }
 0x20e   : > { %v2766_v55 = vsel %vm2759_vm9, %v2762_v27, %v2765_v1  ;;  %v1337_v48 = vsel %vm4118_vm0, 0, %v4117_v45  ;;  %vm931_vm2 = vcmp.gt.s32.totalorder %v930_v62, 0  ;;  %v2504_v58 = vsel %vm2492_vm13, %v5860_v6, %v5867_v20  ;;  %v3686_v1 = vpop.trf.xlu0 }
 0x20f   : > { %v2767_v46 = vsel %vm2757_vm10, nan, %v2766_v55  ;;  %v1338_v34 = vsub.s32 32, %v1337_v48  ;;  %v1339_v26 = vshll.u32 %v5839_v35, %v1337_v48  ;;  %v1342_v59 = vsub.s32 4294967266, %v1337_v48 }
 0x210   : > { %v3089_v17 = vadd.f32 1.0, %v2767_v46  ;;  %vm5900_vm3 = vcmp.le.f32.partialorder %v1228_v32, 0.7853982  ;;  %v1352_v16 = vsub.s32 4, %v5818_v28  ;;  %v3295_v9 = vand.u32 2147483647, %v5849_v53 }
 0x211   : > { %v1340_v41 = vshrl.u32 %v5822_v63, %v1338_v34  ;;  %v1343_v5 = vadd.s32 127, %v1342_v59  ;;  %v2503_v2 = vsel %vm2493_vm1, %v2500_v11, %v2502_v14  ;;  %v2505_v63 = vsel %vm2495_vm12, %v2491_v47, 1326507024  ;;  %v3465_v34 = vld [vmem:[#allocation12] sm:$0xff] }
 0x212   : > { %v3105_v39 = vmul.f32 0.5, %v3089_v17  ;;  %v2506_v38 = vsel %vm2494_vm14, %v2488_v12, %v2505_v63  ;;  %v5912_v32 = vsel %vm931_vm2, %v930_v62, 0  ;;  %v4418_v36 = vpop.eup %4417  ;;  %v3294_v45 = vmul.f32 %v5849_v53, %v3293_v19  ;;  %3500 = vmatpush.msra.mxu1 %v3465_v34 }
 0x213   : > { %v1341_v42 = vor.u32 %v1340_v41, %v1339_v26  ;;  %v1344_v54 = vshll.u32 %v1343_v5, 23  ;;  %v2507_v50 = vsel %vm2493_vm1, %v2504_v58, %v2506_v38  ;;  %v2533_v52 = vand.u32 65535, %v2503_v2 }
 0x214   : > { %3617 = vperm.xlu2 %4409, %v3105_v39   ;;  %v2534_v27 = vshrl.u32 %v2503_v2, 16  ;;  %v3291_v47 = vmul.f32 0.6931472, %v4418_v36  ;;  %v2511_v11 = vand.u32 65535, %v2507_v50  ;;  %v1353_v46 = vsel %vm1230_vm15, %v1352_v16, %v5818_v28 }
 0x215   : > { %v1345_v40 = vor.u32 4788187, %v1344_v54  ;;  %v1348_v55 = vcvt.s32.f32 %v1341_v42  ;;  %vm3296_vm4 = vcmp.lt.f32.partialorder %v3295_v9, 0.0004427343  ;;  %v2476_v12 = vshrl.u32 %v4756_v8, %v5816_v24 }
 0x216   : > { %v2512_v62 = vshrl.u32 %v2507_v50, 16  ;;  %v3297_v53 = vsel %vm3296_vm4, %v3294_v45, %v3291_v47  ;;  %v2515_v14 = vmul.u32 %v2511_v11, %v2510_v22  ;;  %v5923_v17 = vmul.u32 %v2534_v27, %v5863_v37  ;;  %v3687_v45 = vpop.trf.xlu0 }
 0x217   : > { %v1346_v48 = vand.u32 2147483647, %v1345_v40  ;;  %vm3702_vm5 = vcmask 261120   ;;  %v3433_v26 = vadd.f32 %v3297_v53, %v3209_v7  ;;  %v2513_v59 = vmul.u32 %v2511_v11, %v5863_v37 }
 0x218   : > { %v2514_v28 = vmul.u32 %v2512_v62, %v5863_v37  ;;  %4172 = vmatmul.msk.f32.vlgmr.msra.gmra.mxu2 %vm3702_vm5, %v3686_v1  ;;  %v2497_v24 = vsel %vm2495_vm12, %v5867_v20, 2102212464  ;;  %v2535_v39 = vmul.u32 %v2533_v52, %v5863_v37  ;;  %v2537_v41 = vmul.u32 %v2533_v52, %v2510_v22 }
 0x219   : > { %v1349_v19 = vmul.f32 %v1348_v55, %v1346_v48  ;;  %v4152_v5 = vadd.f32 -0.6931472, %v3433_v26  ;;  %v2516_v58 = vmul.u32 %v2512_v62, %v2510_v22  ;;  %v2519_v51 = vshll.u32 %v2515_v14, 16 }
 0x21a   : > { %v2517_v16 = vshll.u32 %v2514_v28, 16  ;;  %v1355_v9 = vsel %vm5900_vm3, 0, %v1353_v46  ;;  %v2496_v2 = vsel %vm2492_vm13, %v2476_v12, %v5858_v4  ;;  %v2539_v63 = vshll.u32 %v5923_v17, 16 }
 0x21b   : > { %v1350_v7 = vxor.u32 2147483648, %v1349_v19  ;;  %3501 = vmatmul.f32.vlgmr.msra.gmra.mxu1 %v4152_v5  ;;  %v2498_v37 = vsel %vm2494_vm14, %v5860_v6, %v2497_v24  ;;  %v2538_v42 = vmul.u32 %v2534_v27, %v2510_v22  ;;  %v2518_v38 = vshrl.u32 %v2514_v28, 16 }
 0x21c   : > { %vm2521_vm6 = vc.u32 %v2513_v59, %v2517_v16  ;;  %v2523_v20 = vadd.s32 %v2517_v16, %v2513_v59  ;;  %v2541_v1 = vshll.u32 %v2537_v41, 16  ;;  %vm2543_vm8 = vc.u32 %v2535_v39, %v2539_v63 }
 0x21d   : > { %v1351_v54 = vsel %vm1230_vm15, %v1350_v7, %v1349_v19  ;;  %v2522_v36 = vsel %vm2521_vm6, 1, %v4761_v60  ;;  %v2520_v22 = vshrl.u32 %v2515_v14, 16  ;;  %v2544_v27 = vsel %vm2543_vm8, 1, %v4761_v60 }
 0x21e   : > { %v5949_v4 = vsel %vm5900_vm3, %v5594_v0, %v1351_v54  ;;  %v2524_v50 = vadd.s32 %v2522_v36, %v2516_v58  ;;  %vm2525_vm7 = vc.u32 %v2523_v20, %v2519_v51  ;;  %v2545_v55 = vadd.s32 %v2539_v63, %v2535_v39 }
 0x21f   : > { %v1356_v6 = vmul.f32 %v5949_v4, %v5949_v4  ;;  %v2526_v52 = vsel %vm2525_vm7, 1, %v4761_v60  ;;  %v2546_v47 = vadd.s32 %v2544_v27, %v2538_v42  ;;  %v934_v11 = vand.u32 31, %v5912_v32 }
 0x220   : > { %v2528_v40 = vadd.s32 %v2526_v52, %v2524_v50  ;;  %v5956_v12 = vand.u32 3, %v1355_v9  ;;  %v2499_v62 = vsel %vm2493_vm1, %v2496_v2, %v2498_v37  ;;  %4173 = vmatmul.msk.f32.gmra.mxu2 %vm3702_vm5, %v3687_v45  ;;  %v2540_v53 = vshrl.u32 %v5923_v17, 16 }
 0x221   : > { %v1357_v35 = vmul.f32 -0.001358992, %v1356_v6  ;;  %v1364_v46 = vmul.f32 -0.00019511016, %v1356_v6  ;;  %vm2547_vm9 = vc.u32 %v2545_v55, %v2541_v1  ;;  %v5962_v14 = vsub.s32 32, %v934_v11 }
 0x222   : > { %v2529_v48 = vadd.s32 %v2528_v40, %v2518_v38  ;;  %v2548_v59 = vsel %vm2547_vm9, 1, %v4761_v60  ;;  %v5965_v28 = vadd.s32 %v2545_v55, %v2541_v1  ;;  %v2542_v24 = vshrl.u32 %v2537_v41, 16 }
 0x223   : > { %v1358_v34 = vadd.f32 0.041655596, %v1357_v35  ;;  %v1365_v26 = vadd.f32 0.008332121, %v1364_v46  ;;  %v2550_v39 = vadd.s32 %v2548_v59, %v2546_v47  ;;  %v2553_v56 = vmul.u32 %v5830_v30, %v2499_v62 }
 0x224   : > { %v5967_v19 = vadd.s32 %v2529_v48, %v2520_v22  ;;  %v5971_v16 = vshrl.u32 %v5912_v32, 5  ;;  %v937_v17 = vshll.u32 %v4756_v8, %v934_v11  ;;  %v938_v7 = vshrl.u32 %v4757_v10, %v5962_v14 }
 0x225   : > { %v1359_v5 = vmul.f32 %v1358_v34, %v1356_v6  ;;  %v1366_v58 = vmul.f32 %v1365_v26, %v1356_v6  ;;  %v2551_v51 = vadd.s32 %v2550_v39, %v2540_v53  ;;  %v940_v9 = vshll.u32 %v4757_v10, %v934_v11 }
 0x226   : > { %v941_v2 = vshrl.u32 %v4758_v13, %v5962_v14  ;;  %vm1373_vm10 = vcmp.lt.s32.totalorder %v5956_v12, 2  ;;  %vm2555_vm11 = vc.u32 %v5967_v19, %v5965_v28  ;;  %v943_v30 = vshll.u32 %v4758_v13, %v934_v11 }
 0x227   : > { %v1360_v41 = vadd.f32 -0.4999988, %v1359_v5  ;;  %v1367_v63 = vadd.f32 -0.16666654, %v1366_v58  ;;  %v2552_v32 = vadd.s32 %v2551_v51, %v2542_v24  ;;  %v944_v37 = vshrl.u32 %v4755_v3, %v5962_v14 }
 0x228   : > { %v946_v20 = vshll.u32 %v4755_v3, %v934_v11  ;;  %v947_v42 = vshrl.u32 %v4759_v18, %v5962_v14  ;;  %v949_v36 = vshll.u32 %v4759_v18, %v934_v11  ;;  %v950_v1 = vshrl.u32 %v4760_v23, %v5962_v14 }
 0x229   : > { %v1361_v54 = vmul.f32 %v1360_v41, %v1356_v6  ;;  %v1368_v38 = vmul.f32 %v1367_v63, %v1356_v6  ;;  %v2556_v45 = vadd.s32 1, %v2552_v32  ;;  %v5991_v50 = vor.u32 %v938_v7, %v937_v17 }
 0x22a   : > { %v5993_v22 = vor.u32 %v941_v2, %v940_v9  ;;  %v948_v52 = vor.u32 %v947_v42, %v946_v20  ;;  %v5995_v55 = vor.u32 %v944_v37, %v943_v30  ;;  %vm952_vm12 = vcmp.lt.s32.totalorder %v5971_v16, 1  ;;  %v3164_v42 = vpop.f32.mrf.mxu0 }
 0x22b   : > { %v1362_v27 = vadd.f32 1.0, %v1361_v54  ;;  %v1369_v40 = vadd.f32 1.0, %v1368_v38  ;;  %vm1377_vm13 = vcmp.eq.s32.totalorder %v5956_v12, 2  ;;  %v2557_v6 = vsel %vm2555_vm11, %v2556_v45, %v2552_v32 }
 0x22c   : > { %v951_v47 = vor.u32 %v950_v1, %v949_v36  ;;  %vm955_vm14 = vcmp.lt.s32.totalorder %v5971_v16, 4  ;;  %v2558_v46 = vadd.s32 %v2557_v6, %v2553_v56  ;;  %vm954_vm15 = vcmp.lt.s32.totalorder %v5971_v16, 3 }
 0x22d   : > { %v1370_v11 = vmul.f32 %v1369_v40, %v5949_v4  ;;  %v1378_v35 = vxor.u32 2147483648, %v1362_v27  ;;  %vm1374_vm0 = vcmp.eq.s32.totalorder %v5956_v12, 0  ;;  %vm953_vm1 = vcmp.lt.s32.totalorder %v5971_v16, 2 }
 0x22e   : > { %v960_v62 = vsel %vm952_vm12, %v5991_v50, %v5993_v22  ;;  %v961_v48 = vsel %vm955_vm14, %v948_v52, 920167782  ;;  %v2559_v26 = vadd.s32 536870912, %v2558_v46  ;;  %v964_v4 = vsel %vm952_vm12, %v5993_v22, %v5995_v55 }
 0x22f   : > { %v1375_v53 = vxor.u32 2147483648, %v1370_v11  ;;  %v1379_v34 = vsel %vm1377_vm13, %v1378_v35, %v1370_v11  ;;  %vm1371_vm2 = vweird.f32 %v5594_v0  ;;  %v962_v59 = vsel %vm954_vm15, %v5995_v55, %v961_v48 }
 0x230   : > { %v965_v24 = vsel %vm955_vm14, %v951_v47, 1326507024  ;;  %v6025_v39 = vshll.u32 %v928_v15, 8  ;;  %v6027_v5 = vshrl.u32 %v2559_v26, 30  ;;  %v963_v58 = vsel %vm953_vm1, %v960_v62, %v962_v59 }
 0x231   : > { %v1376_v56 = vsel %vm1374_vm0, %v1362_v27, %v1375_v53  ;;  %v966_v0 = vsel %vm954_vm15, %v948_v52, %v965_v24  ;;  %v993_v30 = vand.u32 65535, %v963_v58  ;;  %v994_v32 = vshrl.u32 %v963_v58, 16  ;;  %v590_v24 = vld [vmem:[%s4962_s15 + $0x50] sm:$0xff] }
 0x232   : > { %v1380_v17 = vsel %vm1373_vm10, %v1376_v56, %v1379_v34  ;;  %v967_v51 = vsel %vm953_vm1, %v964_v4, %v966_v0  ;;  %v969_v7 = vand.u32 65535, %v6025_v39  ;;  %v970_v61 = vshrl.u32 %v6025_v39, 16 }
 0x233   : > { %v1381_v15 = vsel %vm1371_vm2, nan, %v1380_v17  ;;  %v2561_v9 = vshll.u32 %v6027_v5, 30  ;;  %v971_v2 = vand.u32 65535, %v967_v51  ;;  %v972_v63 = vshrl.u32 %v967_v51, 16 }
 0x234   : > { %v3080_v41 = vadd.f32 1.0, %v1381_v15  ;;  %v936_v1 = vshrl.u32 %v4756_v8, %v5962_v14  ;;  %v995_v40 = vmul.u32 %v993_v30, %v969_v7  ;;  %v996_v6 = vmul.u32 %v994_v32, %v969_v7 }
 0x235   : > { %v2562_v37 = vsub.s32 %v2558_v46, %v2561_v9  ;;  %v975_v20 = vmul.u32 %v971_v2, %v970_v61  ;;  %v973_v54 = vmul.u32 %v971_v2, %v969_v7  ;;  %v974_v38 = vmul.u32 %v972_v63, %v969_v7 }
 0x236   : > { %v3096_v12 = vmul.f32 0.5, %v3080_v41  ;;  %v976_v45 = vmul.u32 %v972_v63, %v970_v61  ;;  %v6043_v47 = vadd.f32 %v5692_v57, %v3164_v42  ;;  %v2554_v11 = vadd.s32 %v5965_v28, %v5967_v19 }
 0x237   : > { %vm2563_vm3 = vcmp.lt.s32.totalorder %v2562_v37, 0  ;;  %v2564_v36 = vsub.s32 0, %v2562_v37  ;;  %v977_v52 = vshll.u32 %v974_v38, 16  ;;  %v979_v27 = vshll.u32 %v975_v20, 16 }
 0x238   : > { %3572 = vperm.xlu1 %4408, %v3096_v12   ;;  %v997_v46 = vmul.u32 %v993_v30, %v970_v61  ;;  %v999_v53 = vshll.u32 %v996_v6, 16  ;;  %v956_v14 = vsel %vm952_vm12, %v936_v1, %v5991_v50  ;;  %v998_v26 = vmul.u32 %v994_v32, %v970_v61 }
 0x239   : > { %v2565_v35 = vsel %vm2563_vm3, %v2564_v36, %v2562_v37  ;;  %vm981_vm4 = vc.u32 %v973_v54, %v977_v52  ;;  %v983_v48 = vadd.s32 %v977_v52, %v973_v54  ;;  %v978_v28 = vshrl.u32 %v974_v38, 16 }
 0x23a   : > { %v2566_v62 = vclz %v2565_v35  ;;  %v982_v34 = vsel %vm981_vm4, 1, %v4761_v60  ;;  %v1001_v4 = vshll.u32 %v997_v46, 16  ;;  %vm1003_vm7 = vc.u32 %v995_v40, %v999_v53 }
 0x23b   : > { %v984_v59 = vadd.s32 %v982_v34, %v976_v45  ;;  %vm985_vm6 = vc.u32 %v983_v48, %v979_v27  ;;  %v1004_v56 = vsel %vm1003_vm7, 1, %v4761_v60  ;;  %v1005_v58 = vadd.s32 %v999_v53, %v995_v40  ;;  %v580_v34 = vld [vmem:[%s4962_s15] sm:$0xff] }
 0x23c   : > { %v4141_v57 = vadd.s32 4294967294, %v2566_v62  ;;  %v986_v19 = vsel %vm985_vm6, 1, %v4761_v60  ;;  %v957_v50 = vsel %vm955_vm14, %v5995_v55, 2102212464  ;;  %v980_v0 = vshrl.u32 %v975_v20, 16 }
 0x23d   : > { %v988_v17 = vadd.s32 %v986_v19, %v984_v59  ;;  %v1006_v7 = vadd.s32 %v1004_v56, %v998_v26  ;;  %vm1007_vm9 = vc.u32 %v1005_v58, %v1001_v4  ;;  %v6057_v61 = vmul.f32 0.62831855, %v590_v24 }
 0x23e   : > { %vm4142_vm8 = vcmp.lt.s32.totalorder %v4141_v57, 0  ;;  %v1000_v41 = vshrl.u32 %v996_v6, 16  ;;  %v958_v63 = vsel %vm954_vm15, %v5993_v22, %v957_v50  ;;  %v1002_v32 = vshrl.u32 %v997_v46, 16 }
 0x23f   : > { %v2569_v51 = vsel %vm4142_vm8, 0, %v4141_v57  ;;  %v989_v30 = vadd.s32 %v988_v17, %v978_v28  ;;  %v1008_v42 = vsel %vm1007_vm9, 1, %v4761_v60  ;;  %v2152_v54 = vand.u32 2147483647, %v6057_v61 }
 0x240   : > { %v2570_v15 = vsub.s32 32, %v2569_v51  ;;  %v2571_v9 = vshll.u32 %v2562_v37, %v2569_v51  ;;  %v2574_v2 = vsub.s32 4294967266, %v2569_v51  ;;  %v1010_v12 = vadd.s32 %v1008_v42, %v1006_v7 }
 0x241   : > { %v990_v38 = vadd.s32 %v989_v30, %v980_v0  ;;  %v1009_v36 = vadd.s32 %v1005_v58, %v1001_v4  ;;  %v2155_v37 = vand.u32 2139095040, %v6057_v61  ;;  %v959_v52 = vsel %vm953_vm1, %v956_v14, %v958_v63 }
 0x242   : > { %v2572_v55 = vshrl.u32 %v2554_v11, %v2570_v15  ;;  %v2575_v20 = vadd.s32 127, %v2574_v2  ;;  %v1011_v22 = vadd.s32 %v1010_v12, %v1000_v41  ;;  %v3226_v27 = vand.u32 2147483647, %v6043_v47 }
 0x243   : > { %v2156_v40 = vshrl.u32 %v2155_v37, 23  ;;  %v2159_v46 = vand.u32 8388607, %v2152_v54  ;;  %v2584_v62 = vsub.s32 4, %v6027_v5  ;;  %v1013_v48 = vmul.u32 %v6025_v39, %v959_v52 }
 0x244   : > { %v2573_v1 = vor.u32 %v2572_v55, %v2571_v9  ;;  %v2576_v45 = vshll.u32 %v2575_v20, 23  ;;  %v1012_v35 = vadd.s32 %v1011_v22, %v1002_v32  ;;  %vm1015_vm10 = vc.u32 %v990_v38, %v1009_v36 }
 0x245   : > { %v4134_v53 = vadd.s32 4294967169, %v2156_v40  ;;  %v3242_v14 = vsub.f32 0.0, %v3226_v27  ;;  %vm2462_vm11 = vcmp.lt.s32.totalorder %v5767_v25, 0  ;;  %v2160_v24 = vor.u32 8388608, %v2159_v46 }
 0x246   : > { %v2577_v6 = vor.u32 4788187, %v2576_v45  ;;  %v2580_v11 = vcvt.s32.f32 %v2573_v1  ;;  %v1016_v16 = vadd.s32 1, %v1012_v35  ;;  %v6074_v28 = vmul.f32 0.62831855, %v580_v34 }
 0x247   : > { %v2162_v4 = vadd.s32 1, %v4134_v53  ;;  %v2585_v19 = vsel %vm2462_vm11, %v2584_v62, %v6027_v5  ;;  %vm6079_vm13 = vcmp.le.f32.partialorder %v2460_v44, 0.7853982  ;;  %v3259_v0 = vmul.f32 1.442695, %v3242_v14 }
 0x248   : > { %v2578_v26 = vand.u32 2147483647, %v2577_v6  ;;  %v1017_v59 = vsel %vm1015_vm10, %v1016_v16, %v1012_v35  ;;  %v2587_v15 = vsel %vm6079_vm13, 0, %v2585_v19  ;;  %v6085_v9 = vshll.u32 %v2160_v24, 8 }
 0x249   : > { %v1018_v56 = vadd.s32 %v1017_v59, %v1013_v48  ;;  %vm2163_vm12 = vcmp.gt.s32.totalorder %v2162_v4, 0  ;;  %v615_v5 = vand.u32 2139095040, %v6074_v28  ;;  %v3210_v41 = vmax.f32 %v6043_v47, 0.0 }
 0x24a   : > { %v2581_v57 = vmul.f32 %v2580_v11, %v2578_v26  ;;  %v2164_v50 = vsel %vm2163_vm12, %v2162_v4, 0  ;;  %4419 = vpow2.f32 %v3259_v0  ;;  %v6100_v32 = vand.u32 3, %v2587_v15 }
 0x24b   : > { %v1019_v17 = vadd.s32 536870912, %v1018_v56  ;;  %v2166_v51 = vand.u32 31, %v2164_v50  ;;  %v6102_v42 = vadd.s32 %v1009_v36, %v990_v38  ;;  %v6106_v37 = vand.u32 65535, %v6085_v9 }
 0x24c   : > { %v2582_v58 = vxor.u32 2147483648, %v2581_v57  ;;  %v616_v1 = vshrl.u32 %v615_v5, 23  ;;  %v6113_v27 = vshrl.u32 %v6085_v9, 16  ;;  %vm2609_vm14 = vcmp.eq.s32.totalorder %v6100_v32, 2 }
 0x24d   : > { %v6093_v2 = vshrl.u32 %v1019_v17, 30  ;;  %v6098_v30 = vsub.s32 32, %v2166_v51  ;;  %v2169_v52 = vshll.u32 %v4756_v8, %v2166_v51  ;;  %v2172_v22 = vshll.u32 %v4757_v10, %v2166_v51 }
 0x24e   : > { %v2583_v7 = vsel %vm2462_vm11, %v2582_v58, %v2581_v57  ;;  %v2175_v6 = vshll.u32 %v4758_v13, %v2166_v51  ;;  %v2178_v53 = vshll.u32 %v4755_v3, %v2166_v51  ;;  %vm2606_vm0 = vcmp.eq.s32.totalorder %v6100_v32, 0 }
 0x24f   : > { %v6091_v44 = vsel %vm6079_vm13, %v5767_v25, %v2583_v7  ;;  %v1021_v55 = vshll.u32 %v6093_v2, 30  ;;  %v2170_v36 = vshrl.u32 %v4757_v10, %v6098_v30  ;;  %v2173_v35 = vshrl.u32 %v4758_v13, %v6098_v30 }
 0x250   : > { %v2588_v63 = vmul.f32 %v6091_v44, %v6091_v44  ;;  %v2176_v46 = vshrl.u32 %v4755_v3, %v6098_v30  ;;  %v2179_v34 = vshrl.u32 %v4759_v18, %v6098_v30  ;;  %v4420_v26 = vpop.eup %4419  ;;  %v6130_v14 = vshrl.u32 %v2164_v50, 5 }
 0x251   : > { %v6108_v45 = vsub.s32 %v1018_v56, %v1021_v55  ;;  %v2181_v4 = vshll.u32 %v4759_v18, %v2166_v51  ;;  %v6133_v57 = vadd.s32 4294967169, %v616_v1  ;;  %vm2605_vm1 = vcmp.lt.s32.totalorder %v6100_v32, 2 }
 0x252   : > { %v2589_v20 = vmul.f32 -0.001358992, %v2588_v63  ;;  %v2596_v12 = vmul.f32 -0.00019511016, %v2588_v63  ;;  %v2182_v56 = vshrl.u32 %v4760_v23, %v6098_v30  ;;  %vm2603_vm2 = vweird.f32 %v5767_v25 }
 0x253   : > { %vm1023_vm15 = vcmp.lt.s32.totalorder %v6108_v45, 0  ;;  %v1024_v11 = vsub.s32 0, %v6108_v45  ;;  %v1044_v39 = vsub.s32 4, %v6093_v2  ;;  %v6140_v58 = vor.u32 %v2170_v36, %v2169_v52 }
 0x254   : > { %v2590_v40 = vadd.f32 0.041655596, %v2589_v20  ;;  %v2597_v38 = vadd.f32 0.008332121, %v2596_v12  ;;  %v6142_v50 = vor.u32 %v2173_v35, %v2172_v22  ;;  %v2177_v0 = vor.u32 %v2176_v46, %v2175_v6 }
 0x255   : > { %v1025_v16 = vsel %vm1023_vm15, %v1024_v11, %v6108_v45  ;;  %v2180_v15 = vor.u32 %v2179_v34, %v2178_v53  ;;  %v3298_v5 = vadd.f32 1.0, %v4420_v26  ;;  %v3301_v55 = vmul.f32 -0.5, %v4420_v26 }
 0x256   : > { %v2591_v62 = vmul.f32 %v2590_v40, %v2588_v63  ;;  %v2598_v48 = vmul.f32 %v2597_v38, %v2588_v63  ;;  %v1026_v19 = vclz %v1025_v16  ;;  %vm2184_vm3 = vcmp.lt.s32.totalorder %v6130_v14, 1 }
 0x257   : > { %vm2185_vm4 = vcmp.lt.s32.totalorder %v6130_v14, 2  ;;  %v2183_v1 = vor.u32 %v2182_v56, %v2181_v4  ;;  %vm922_vm7 = vcmp.lt.s32.totalorder %v5805_v21, 0  ;;  %4421 = vlog2.f32 %v3298_v5 }
 0x258   : > { %v2592_v59 = vadd.f32 -0.4999988, %v2591_v62  ;;  %v2599_v24 = vadd.f32 -0.16666654, %v2598_v48  ;;  %v4111_v7 = vadd.s32 4294967294, %v1026_v19  ;;  %vm2187_vm8 = vcmp.lt.s32.totalorder %v6130_v14, 4 }
 0x259   : > { %v3304_v22 = vand.u32 2147483647, %v4420_v26  ;;  %v3302_v11 = vadd.f32 1.0, %v3301_v55  ;;  %vm2186_vm9 = vcmp.lt.s32.totalorder %v6130_v14, 3  ;;  %v2192_v35 = vsel %vm2184_vm3, %v6140_v58, %v6142_v50 }
 0x25a   : > { %v2593_v17 = vmul.f32 %v2592_v59, %v2588_v63  ;;  %v2600_v51 = vmul.f32 %v2599_v24, %v2588_v63  ;;  %vm4112_vm6 = vcmp.lt.s32.totalorder %v4111_v7, 0  ;;  %vm6163_vm10 = vcmp.le.f32.partialorder %v920_v31, 0.7853982 }
 0x25b   : > { %v1029_v52 = vsel %vm4112_vm6, 0, %v4111_v7  ;;  %v3303_v34 = vmul.f32 %v4420_v26, %v3302_v11  ;;  %vm6167_vm11 = vcmp.lt.f32.partialorder %v3304_v22, 0.0004427343  ;;  %v2193_v4 = vsel %vm2187_vm8, %v2180_v15, 920167782  ;;  %v3688_v11 = vpop.trf.xlu0 }
 0x25c   : > { %v2594_v20 = vadd.f32 1.0, %v2593_v17  ;;  %v2601_v12 = vadd.f32 1.0, %v2600_v51  ;;  %v1030_v38 = vsub.s32 32, %v1029_v52  ;;  %v1031_v36 = vshll.u32 %v6108_v45, %v1029_v52  ;;  %4174 = vmatmul.msk.f32.gmra.mxu2 %vm3702_vm5, %v3688_v11 }
 0x25d   : > { %v1034_v6 = vsub.s32 4294967266, %v1029_v52  ;;  %v2194_v24 = vsel %vm2186_vm9, %v2177_v0, %v2193_v4  ;;  %v2197_v31 = vsel %vm2187_vm8, %v2183_v1, 1326507024  ;;  %v4422_v19 = vpop.eup %4421  ;;  %v1045_v22 = vsel %vm922_vm7, %v1044_v39, %v6093_v2 }
 0x25e   : > { %v2602_v63 = vmul.f32 %v2601_v12, %v6091_v44  ;;  %v2610_v40 = vxor.u32 2147483648, %v2594_v20  ;;  %v1032_v48 = vshrl.u32 %v6102_v42, %v1030_v38  ;;  %v2196_v44 = vsel %vm2184_vm3, %v6142_v50, %v2177_v0 }
 0x25f   : > { %v1035_v53 = vadd.s32 127, %v1034_v6  ;;  %v2195_v17 = vsel %vm2185_vm4, %v2192_v35, %v2194_v24  ;;  %v2198_v51 = vsel %vm2186_vm9, %v2180_v15, %v2197_v31  ;;  %v3300_v55 = vmul.f32 0.6931472, %v4422_v19 }
 0x260   : > { %v2607_v46 = vxor.u32 2147483648, %v2602_v63  ;;  %v2611_v62 = vsel %vm2609_vm14, %v2610_v40, %v2602_v63  ;;  %v1033_v59 = vor.u32 %v1032_v48, %v1031_v36  ;;  %v2168_v25 = vshrl.u32 %v4756_v8, %v6098_v30 }
 0x261   : > { %v1036_v56 = vshll.u32 %v1035_v53, 23  ;;  %v3306_v63 = vsel %vm6167_vm11, %v3303_v34, %v3300_v55  ;;  %v2189_v15 = vsel %vm2187_vm8, %v2177_v0, 2102212464  ;;  %v2225_v6 = vand.u32 65535, %v2195_v17 }
 0x262   : > { %v2608_v42 = vsel %vm2606_vm0, %v2594_v20, %v2607_v46  ;;  %v1040_v5 = vcvt.s32.f32 %v1033_v59  ;;  %v2199_v20 = vsel %vm2185_vm4, %v2196_v44, %v2198_v51  ;;  %v3434_v36 = vadd.f32 %v3306_v63, %v3210_v41 }
 0x263   : > { %v2612_v26 = vsel %vm2605_vm1, %v2608_v42, %v2611_v62  ;;  %v1037_v1 = vor.u32 4788187, %v1036_v56  ;;  %v2203_v52 = vand.u32 65535, %v2199_v20  ;;  %v2204_v32 = vshrl.u32 %v2199_v20, 16 }
 0x264   : > { %v2613_v7 = vsel %vm2603_vm2, nan, %v2612_v26  ;;  %v2226_v46 = vshrl.u32 %v2195_v17, 16  ;;  %v4153_v30 = vadd.f32 -0.6931472, %v3434_v36  ;;  %v612_v48 = vand.u32 2147483647, %v6074_v28 }
 0x265   : > { %v3088_v12 = vadd.f32 1.0, %v2613_v7  ;;  %v1038_v38 = vand.u32 2147483647, %v1037_v1  ;;  %v2205_v35 = vmul.u32 %v2203_v52, %v6106_v37  ;;  %v2206_v2 = vmul.u32 %v2204_v32, %v6106_v37 }
 0x266   : > { %v2207_v39 = vmul.u32 %v2203_v52, %v6113_v27  ;;  %v622_v0 = vadd.s32 1, %v6133_v57  ;;  %v1047_v47 = vsel %vm6163_vm10, 0, %v1045_v22  ;;  %v2208_v41 = vmul.u32 %v2204_v32, %v6113_v27  ;;  %3504 = vmatmul.f32.gmra.mxu1 %v4153_v30 }
 0x267   : > { %v3104_v40 = vmul.f32 0.5, %v3088_v12  ;;  %v1041_v62 = vmul.f32 %v1040_v5, %v1038_v38  ;;  %v2209_v44 = vshll.u32 %v2206_v2, 16  ;;  %v2188_v16 = vsel %vm2184_vm3, %v2168_v25, %v6140_v58 }
 0x268   : > { %v2211_v53 = vshll.u32 %v2207_v39, 16  ;;  %v2190_v4 = vsel %vm2186_vm9, %v6142_v50, %v2189_v15  ;;  %v2227_v57 = vmul.u32 %v2225_v6, %v6106_v37  ;;  %v2228_v59 = vmul.u32 %v2226_v46, %v6106_v37 }
 0x269   : > { %3612 = vperm.xlu2 %4409, %v3104_v40   ;;  %v1042_v34 = vxor.u32 2147483648, %v1041_v62  ;;  %vm2213_vm12 = vc.u32 %v2205_v35, %v2209_v44  ;;  %v2215_v42 = vadd.s32 %v2209_v44, %v2205_v35  ;;  %v2229_v24 = vmul.u32 %v2225_v6, %v6113_v27 }
 0x26a   : > { %v2210_v19 = vshrl.u32 %v2206_v2, 16  ;;  %v2214_v26 = vsel %vm2213_vm12, 1, %v4761_v60  ;;  %v2230_v58 = vmul.u32 %v2226_v46, %v6113_v27  ;;  %v2231_v17 = vshll.u32 %v2228_v59, 16 }
 0x26b   : > { %v1043_v31 = vsel %vm922_vm7, %v1042_v34, %v1041_v62  ;;  %v2216_v56 = vadd.s32 %v2214_v26, %v2208_v41  ;;  %vm2217_vm13 = vc.u32 %v2215_v42, %v2211_v53  ;;  %v6227_v37 = vsel %vm2185_vm4, %v2188_v16, %v2190_v4 }
 0x26c   : > { %v1046_v50 = vsel %vm6163_vm10, %v5805_v21, %v1043_v31  ;;  %v2218_v7 = vsel %vm2217_vm13, 1, %v4761_v60  ;;  %v6232_v5 = vand.u32 8388607, %v612_v48  ;;  %v6234_v55 = vand.u32 3, %v1047_v47 }
 0x26d   : > { %v1048_v51 = vmul.f32 %v1046_v50, %v1046_v50  ;;  %v2220_v27 = vadd.s32 %v2218_v7, %v2216_v56  ;;  %v2233_v20 = vshll.u32 %v2229_v24, 16  ;;  %vm2235_vm14 = vc.u32 %v2227_v57, %v2231_v17 }
 0x26e   : > { %v2212_v1 = vshrl.u32 %v2207_v39, 16  ;;  %v2236_v52 = vsel %vm2235_vm14, 1, %v4761_v60  ;;  %v2237_v14 = vadd.s32 %v2231_v17, %v2227_v57  ;;  %vm623_vm15 = vcmp.gt.s32.totalorder %v622_v0, 0 }
 0x26f   : > { %v1049_v45 = vmul.f32 -0.001358992, %v1048_v51  ;;  %v1056_v12 = vmul.f32 -0.00019511016, %v1048_v51  ;;  %v2221_v32 = vadd.s32 %v2220_v27, %v2210_v19  ;;  %v2238_v22 = vadd.s32 %v2236_v52, %v2230_v58 }
 0x270   : > { %v620_v15 = vor.u32 8388608, %v6232_v5  ;;  %v624_v40 = vsel %vm623_vm15, %v622_v0, 0  ;;  %vm1069_vm0 = vcmp.eq.s32.totalorder %v6234_v55, 2  ;;  %v2232_v38 = vshrl.u32 %v2228_v59, 16 }
 0x271   : > { %v1050_v63 = vadd.f32 0.041655596, %v1049_v45  ;;  %v1057_v25 = vadd.f32 0.008332121, %v1056_v12  ;;  %vm2239_vm1 = vc.u32 %v2237_v14, %v2233_v20  ;;  %v2245_v36 = vmul.u32 %v6085_v9, %v6227_v37 }
 0x272   : > { %v2240_v35 = vsel %vm2239_vm1, 1, %v4761_v60  ;;  %v626_v2 = vand.u32 31, %v624_v40  ;;  %v6242_v39 = vadd.s32 %v2221_v32, %v2212_v1  ;;  %v2234_v46 = vshrl.u32 %v2229_v24, 16 }
 0x273   : > { %v1051_v6 = vmul.f32 %v1050_v63, %v1048_v51  ;;  %v1058_v11 = vmul.f32 %v1057_v25, %v1048_v51  ;;  %v6244_v62 = vadd.s32 %v2237_v14, %v2233_v20  ;;  %v2242_v30 = vadd.s32 %v2240_v35, %v2238_v22 }
 0x274   : > { %vm1065_vm2 = vcmp.lt.s32.totalorder %v6234_v55, 2  ;;  %v6247_v41 = vshrl.u32 %v624_v40, 5  ;;  %v6249_v44 = vsub.s32 32, %v626_v2  ;;  %vm1063_vm3 = vweird.f32 %v5805_v21 }
 0x275   : > { %v1052_v47 = vadd.f32 -0.4999988, %v1051_v6  ;;  %v1059_v0 = vadd.f32 -0.16666654, %v1058_v11  ;;  %v2243_v9 = vadd.s32 %v2242_v30, %v2232_v38  ;;  %v629_v53 = vshll.u32 %v4756_v8, %v626_v2 }
 0x276   : > { %v632_v34 = vshll.u32 %v4757_v10, %v626_v2  ;;  %v635_v16 = vshll.u32 %v4758_v13, %v626_v2  ;;  %v630_v42 = vshrl.u32 %v4757_v10, %v6249_v44  ;;  %v638_v59 = vshll.u32 %v4755_v3, %v626_v2 }
 0x277   : > { %v1053_v4 = vmul.f32 %v1052_v47, %v1048_v51  ;;  %v1060_v57 = vmul.f32 %v1059_v0, %v1048_v51  ;;  %v2244_v24 = vadd.s32 %v2243_v9, %v2234_v46  ;;  %v633_v31 = vshrl.u32 %v4758_v13, %v6249_v44 }
 0x278   : > { %v636_v19 = vshrl.u32 %v4755_v3, %v6249_v44  ;;  %v639_v26 = vshrl.u32 %v4759_v18, %v6249_v44  ;;  %vm2247_vm4 = vc.u32 %v6242_v39, %v6244_v62  ;;  %vm644_vm6 = vcmp.lt.s32.totalorder %v6247_v41, 1 }
 0x279   : > { %v1054_v58 = vadd.f32 1.0, %v1053_v4  ;;  %v1061_v56 = vadd.f32 1.0, %v1060_v57  ;;  %v2248_v17 = vadd.s32 1, %v2244_v24  ;;  %v631_v51 = vor.u32 %v630_v42, %v629_v53 }
 0x27a   : > { %v6267_v37 = vor.u32 %v633_v31, %v632_v34  ;;  %v641_v7 = vshll.u32 %v4759_v18, %v626_v2  ;;  %v640_v20 = vor.u32 %v639_v26, %v638_v59  ;;  %v642_v45 = vshrl.u32 %v4760_v23, %v6249_v44  ;;  %v6310_v59 = vld [vmem:[%s7320_s6] ss:$0 sm:$0xff] }
 0x27b   : > { %v1062_v5 = vmul.f32 %v1061_v56, %v1046_v50  ;;  %v1070_v27 = vxor.u32 2147483648, %v1054_v58  ;;  %vm1066_vm7 = vcmp.eq.s32.totalorder %v6234_v55, 0  ;;  %v2249_v12 = vsel %vm2247_vm4, %v2248_v17, %v2244_v24  ;;  %v3167_v55 = vpop.f32.mrf.mxu0 }
 0x27c   : > { %v637_v1 = vor.u32 %v636_v19, %v635_v16  ;;  %vm647_vm8 = vcmp.lt.s32.totalorder %v6247_v41, 4  ;;  %v2250_v14 = vadd.s32 %v2249_v12, %v2245_v36  ;;  %vm646_vm9 = vcmp.lt.s32.totalorder %v6247_v41, 3 }
 0x27d   : > { %v1067_v52 = vxor.u32 2147483648, %v1062_v5  ;;  %v1071_v32 = vsel %vm1069_vm0, %v1070_v27, %v1062_v5  ;;  %v643_v22 = vor.u32 %v642_v45, %v641_v7  ;;  %vm645_vm10 = vcmp.lt.s32.totalorder %v6247_v41, 2 }
 0x27e   : > { %v652_v50 = vsel %vm644_vm6, %v631_v51, %v6267_v37  ;;  %v6281_v63 = vshll.u32 %v620_v15, 8  ;;  %v2251_v40 = vadd.s32 536870912, %v2250_v14  ;;  %v653_v38 = vsel %vm647_vm8, %v640_v20, 920167782 }
 0x27f   : > { %v1068_v25 = vsel %vm1066_vm7, %v1054_v58, %v1067_v52  ;;  %v654_v36 = vsel %vm646_vm9, %v637_v1, %v653_v38  ;;  %v656_v11 = vsel %vm644_vm6, %v6267_v37, %v637_v1  ;;  %v657_v46 = vsel %vm647_vm8, %v643_v22, 1326507024 }
 0x280   : > { %v1072_v6 = vsel %vm1065_vm2, %v1068_v25, %v1071_v32  ;;  %v6294_v15 = vshrl.u32 %v2251_v40, 30  ;;  %v655_v2 = vsel %vm645_vm10, %v652_v50, %v654_v36  ;;  %v658_v47 = vsel %vm646_vm9, %v640_v20, %v657_v46 }
 0x281   : > { %v1073_v35 = vsel %vm1063_vm3, nan, %v1072_v6  ;;  %v661_v0 = vand.u32 65535, %v6281_v63  ;;  %v662_v9 = vshrl.u32 %v6281_v63, 16  ;;  %v659_v53 = vsel %vm645_vm10, %v656_v11, %v658_v47 }
 0x282   : > { %v3078_v30 = vadd.f32 1.0, %v1073_v35  ;;  %v2253_v21 = vshll.u32 %v6294_v15, 30  ;;  %v685_v34 = vand.u32 65535, %v655_v2  ;;  %v663_v4 = vand.u32 65535, %v659_v53 }
 0x283   : > { %v664_v57 = vshrl.u32 %v659_v53, 16  ;;  %v686_v42 = vshrl.u32 %v655_v2, 16  ;;  %v6313_v24 = vadd.f32 %v6310_v59, %v3167_v55  ;;  %v628_v19 = vshrl.u32 %v4756_v8, %v6249_v44 }
 0x284   : > { %v3094_v16 = vmul.f32 0.5, %v3078_v30  ;;  %v2254_v31 = vsub.s32 %v2250_v14, %v2253_v21  ;;  %v665_v26 = vmul.u32 %v663_v4, %v661_v0  ;;  %v667_v56 = vmul.u32 %v663_v4, %v662_v9 }
 0x285   : > { %v666_v58 = vmul.u32 %v664_v57, %v661_v0  ;;  %v689_v17 = vmul.u32 %v685_v34, %v662_v9  ;;  %v687_v5 = vmul.u32 %v685_v34, %v661_v0  ;;  %v688_v27 = vmul.u32 %v686_v42, %v661_v0 }
 0x286   : > { %3562 = vperm.xlu1 %4408, %v3094_v16   ;;  %vm2255_vm11 = vcmp.lt.s32.totalorder %v2254_v31, 0  ;;  %v2256_v7 = vsub.s32 0, %v2254_v31  ;;  %v649_v20 = vsel %vm647_vm8, %v637_v1, 2102212464  ;;  %v668_v45 = vmul.u32 %v664_v57, %v662_v9 }
 0x287   : > { %v669_v12 = vshll.u32 %v666_v58, 16  ;;  %v671_v52 = vshll.u32 %v667_v56, 16  ;;  %v648_v44 = vsel %vm644_vm6, %v628_v19, %v631_v51  ;;  %v690_v14 = vmul.u32 %v686_v42, %v662_v9  ;;  %v588_v51 = vld [vmem:[%s4962_s15 + $0x40] sm:$0xff]  ;;  %v585_v42 = vld [vmem:[%s4962_s15 + $0x28] sm:$0xff] }
 0x288   : > { %v2257_v32 = vsel %vm2255_vm11, %v2256_v7, %v2254_v31  ;;  %v691_v22 = vshll.u32 %v688_v27, 16  ;;  %v693_v40 = vshll.u32 %v689_v17, 16  ;;  %v650_v38 = vsel %vm646_vm9, %v6267_v37, %v649_v20 }
 0x289   : > { %v2258_v50 = vclz %v2257_v32  ;;  %vm673_vm12 = vc.u32 %v665_v26, %v669_v12  ;;  %v675_v25 = vadd.s32 %v669_v12, %v665_v26  ;;  %v670_v2 = vshrl.u32 %v666_v58, 16 }
 0x28a   : > { %v674_v1 = vsel %vm673_vm12, 1, %v4761_v60  ;;  %vm695_vm13 = vc.u32 %v687_v5, %v691_v22  ;;  %v697_v6 = vadd.s32 %v691_v22, %v687_v5  ;;  %v2246_v30 = vadd.s32 %v6244_v62, %v6242_v39 }
 0x28b   : > { %v4135_v36 = vadd.s32 4294967294, %v2258_v50  ;;  %v676_v11 = vadd.s32 %v674_v1, %v668_v45  ;;  %vm677_vm14 = vc.u32 %v675_v25, %v671_v52  ;;  %v696_v35 = vsel %vm695_vm13, 1, %v4761_v60 }
 0x28c   : > { %v678_v46 = vsel %vm677_vm14, 1, %v4761_v60  ;;  %v698_v55 = vadd.s32 %v696_v35, %v690_v14  ;;  %vm699_vm15 = vc.u32 %v697_v6, %v693_v40  ;;  %v672_v37 = vshrl.u32 %v667_v56, 16 }
 0x28d   : > { %vm4136_vm0 = vcmp.lt.s32.totalorder %v4135_v36, 0  ;;  %v680_v47 = vadd.s32 %v678_v46, %v676_v11  ;;  %v692_v9 = vshrl.u32 %v688_v27, 16  ;;  %v700_v21 = vsel %vm699_vm15, 1, %v4761_v60 }
 0x28e   : > { %v2261_v0 = vsel %vm4136_vm0, 0, %v4135_v36  ;;  %v6331_v53 = vmul.f32 0.62831855, %v588_v51  ;;  %v651_v57 = vsel %vm645_vm10, %v648_v44, %v650_v38  ;;  %v694_v26 = vshrl.u32 %v689_v17, 16 }
 0x28f   : > { %v2262_v34 = vsub.s32 32, %v2261_v0  ;;  %v2263_v16 = vshll.u32 %v2254_v31, %v2261_v0  ;;  %v2266_v4 = vsub.s32 4294967266, %v2261_v0  ;;  %v681_v19 = vadd.s32 %v680_v47, %v670_v2 }
 0x290   : > { %v701_v58 = vadd.s32 %v697_v6, %v693_v40  ;;  %v702_v39 = vadd.s32 %v700_v21, %v698_v55  ;;  %v1844_v7 = vand.u32 2147483647, %v6331_v53  ;;  %v1847_v5 = vand.u32 2139095040, %v6331_v53  ;;  %v3170_v6 = vpop.f32.mrf.mxu0 }
 0x291   : > { %v2264_v62 = vshrl.u32 %v2246_v30, %v2262_v34  ;;  %v2267_v56 = vadd.s32 127, %v2266_v4  ;;  %v3227_v27 = vand.u32 2147483647, %v6313_v24  ;;  %v682_v20 = vadd.s32 %v681_v19, %v672_v37 }
 0x292   : > { %v703_v45 = vadd.s32 %v702_v39, %v692_v9  ;;  %v6339_v31 = vmul.f32 0.62831855, %v585_v42  ;;  %v2276_v52 = vsub.s32 4, %v6294_v15  ;;  %v1848_v32 = vshrl.u32 %v1847_v5, 23 }
 0x293   : > { %v2265_v12 = vor.u32 %v2264_v62, %v2263_v16  ;;  %v2268_v41 = vshll.u32 %v2267_v56, 23  ;;  %v705_v44 = vmul.u32 %v6281_v63, %v651_v57  ;;  %vm707_vm1 = vc.u32 %v682_v20, %v701_v58 }
 0x294   : > { %v704_v17 = vadd.s32 %v703_v45, %v694_v26  ;;  %v1851_v14 = vand.u32 8388607, %v1844_v7  ;;  %v4128_v25 = vadd.s32 4294967169, %v1848_v32  ;;  %v1385_v40 = vand.u32 2139095040, %v6339_v31 }
 0x295   : > { %v2269_v22 = vor.u32 4788187, %v2268_v41  ;;  %v2272_v50 = vcvt.s32.f32 %v2265_v12  ;;  %v3243_v38 = vsub.f32 0.0, %v3227_v27  ;;  %vm2154_vm2 = vcmp.lt.s32.totalorder %v6057_v61, 0 }
 0x296   : > { %v708_v1 = vadd.s32 1, %v704_v17  ;;  %v1854_v11 = vadd.s32 1, %v4128_v25  ;;  %v2277_v63 = vsel %vm2154_vm2, %v2276_v52, %v6294_v15  ;;  %v1852_v51 = vor.u32 8388608, %v1851_v14 }
 0x297   : > { %v2270_v36 = vand.u32 2147483647, %v2269_v22  ;;  %v1386_v55 = vshrl.u32 %v1385_v40, 23  ;;  %v3261_v30 = vmul.f32 1.442695, %v3243_v38  ;;  %v6351_v37 = vadd.f32 %v6310_v59, %v3170_v6 }
 0x298   : > { %v709_v35 = vsel %vm707_vm1, %v708_v1, %v704_v17  ;;  %vm1855_vm3 = vcmp.gt.s32.totalorder %v1854_v11, 0  ;;  %vm2153_vm4 = vcmp.le.f32.partialorder %v2152_v54, 0.7853982  ;;  %v6355_v16 = vshll.u32 %v1852_v51, 8 }
 0x299   : > { %v2273_v2 = vmul.f32 %v2272_v50, %v2270_v36  ;;  %v710_v46 = vadd.s32 %v709_v35, %v705_v44  ;;  %v1856_v47 = vsel %vm1855_vm3, %v1854_v11, 0  ;;  %v2279_v34 = vsel %vm2153_vm4, 0, %v2277_v63 }
 0x29a   : > { %v1858_v21 = vand.u32 31, %v1856_v47  ;;  %v3211_v15 = vmax.f32 %v6313_v24, 0.0  ;;  %v4119_v42 = vadd.s32 4294967169, %v1386_v55  ;;  %4423 = vpow2.f32 %v3261_v30 }
 0x29b   : > { %v2274_v0 = vxor.u32 2147483648, %v2273_v2  ;;  %v711_v9 = vadd.s32 536870912, %v710_v46  ;;  %v3228_v19 = vand.u32 2147483647, %v6351_v37  ;;  %v6368_v62 = vand.u32 3, %v2279_v34 }
 0x29c   : > { %v6364_v54 = vsub.s32 32, %v1858_v21  ;;  %vm614_vm6 = vcmp.lt.s32.totalorder %v6074_v28, 0  ;;  %v706_v5 = vadd.s32 %v701_v58, %v682_v20  ;;  %v6372_v27 = vand.u32 65535, %v6355_v16 }
 0x29d   : > { %v2275_v4 = vsel %vm2154_vm2, %v2274_v0, %v2273_v2  ;;  %v712_v57 = vshrl.u32 %v711_v9, 30  ;;  %v6375_v45 = vshrl.u32 %v6355_v16, 16  ;;  %v1382_v12 = vand.u32 2147483647, %v6339_v31 }
 0x29e   : > { %v6362_v26 = vsel %vm2153_vm4, %v6057_v61, %v2275_v4  ;;  %v6380_v17 = vadd.s32 1, %v4119_v42  ;;  %v1861_v14 = vshll.u32 %v4756_v8, %v1858_v21  ;;  %v1862_v58 = vshrl.u32 %v4757_v10, %v6364_v54 }
 0x29f   : > { %v2280_v39 = vmul.f32 %v6362_v26, %v6362_v26  ;;  %v713_v56 = vshll.u32 %v712_v57, 30  ;;  %v736_v44 = vsub.s32 4, %v712_v57  ;;  %v1864_v20 = vshll.u32 %v4757_v10, %v1858_v21 }
 0x2a0   : > { %v4424_v40 = vpop.eup %4423  ;;  %vm2301_vm8 = vcmp.eq.s32.totalorder %v6368_v62, 2  ;;  %v1865_v38 = vshrl.u32 %v4758_v13, %v6364_v54  ;;  %v1867_v1 = vshll.u32 %v4758_v13, %v1858_v21  ;;  %v1868_v6 = vshrl.u32 %v4755_v3, %v6364_v54 }
 0x2a1   : > { %v2281_v41 = vmul.f32 -0.001358992, %v2280_v39  ;;  %v2288_v52 = vmul.f32 -0.00019511016, %v2280_v39  ;;  %v6378_v32 = vsub.s32 %v710_v46, %v713_v56  ;;  %v1870_v36 = vshll.u32 %v4755_v3, %v1858_v21 }
 0x2a2   : > { %v1871_v51 = vshrl.u32 %v4759_v18, %v6364_v54  ;;  %vm2298_vm9 = vcmp.eq.s32.totalorder %v6368_v62, 0  ;;  %v6399_v46 = vshrl.u32 %v1856_v47, 5  ;;  %v1873_v55 = vshll.u32 %v4759_v18, %v1858_v21 }
 0x2a3   : > { %v2282_v22 = vadd.f32 0.041655596, %v2281_v41  ;;  %v2289_v50 = vadd.f32 0.008332121, %v2288_v52  ;;  %vm715_vm7 = vcmp.lt.s32.totalorder %v6378_v32, 0  ;;  %v716_v25 = vsub.s32 0, %v6378_v32 }
 0x2a4   : > { %v1874_v30 = vshrl.u32 %v4760_v23, %v6364_v54  ;;  %vm2297_vm10 = vcmp.lt.s32.totalorder %v6368_v62, 2  ;;  %v6407_v34 = vsel %vm614_vm6, %v736_v44, %v712_v57  ;;  %v6409_v4 = vor.u32 %v1862_v58, %v1861_v14 }
 0x2a5   : > { %v2283_v11 = vmul.f32 %v2282_v22, %v2280_v39  ;;  %v2290_v63 = vmul.f32 %v2289_v50, %v2280_v39  ;;  %v717_v35 = vsel %vm715_vm7, %v716_v25, %v6378_v32  ;;  %vm2295_vm11 = vweird.f32 %v6057_v61 }
 0x2a6   : > { %v718_v2 = vclz %v717_v35  ;;  %v3307_v47 = vadd.f32 1.0, %v4424_v40  ;;  %v3310_v56 = vmul.f32 -0.5, %v4424_v40  ;;  %v6412_v41 = vor.u32 %v1865_v38, %v1864_v20 }
 0x2a7   : > { %v2284_v0 = vadd.f32 -0.4999988, %v2283_v11  ;;  %v2291_v9 = vadd.f32 -0.16666654, %v2290_v63  ;;  %v6414_v22 = vor.u32 %v1868_v6, %v1867_v1  ;;  %v1872_v50 = vor.u32 %v1871_v51, %v1870_v36 }
 0x2a8   : > { %v4105_v42 = vadd.s32 4294967294, %v718_v2  ;;  %4425 = vlog2.f32 %v3307_v47  ;;  %v1875_v25 = vor.u32 %v1874_v30, %v1873_v55  ;;  %vm1876_vm13 = vcmp.lt.s32.totalorder %v6399_v46, 1 }
 0x2a9   : > { %v2285_v21 = vmul.f32 %v2284_v0, %v2280_v39  ;;  %v2292_v52 = vmul.f32 %v2291_v9, %v2280_v39  ;;  %v3311_v58 = vadd.f32 1.0, %v3310_v56  ;;  %vm1879_vm14 = vcmp.lt.s32.totalorder %v6399_v46, 4 }
 0x2aa   : > { %vm4106_vm12 = vcmp.lt.s32.totalorder %v4105_v42, 0  ;;  %v3313_v38 = vand.u32 2147483647, %v4424_v40  ;;  %vm1878_vm15 = vcmp.lt.s32.totalorder %v6399_v46, 3  ;;  %vm1877_vm0 = vcmp.lt.s32.totalorder %v6399_v46, 2 }
 0x2ab   : > { %v2286_v57 = vadd.f32 1.0, %v2285_v21  ;;  %v2293_v44 = vadd.f32 1.0, %v2292_v52  ;;  %v721_v14 = vsel %vm4106_vm12, 0, %v4105_v42  ;;  %v1884_v36 = vsel %vm1876_vm13, %v6409_v4, %v6412_v41 }
 0x2ac   : > { %v722_v11 = vsub.s32 32, %v721_v14  ;;  %v723_v63 = vshll.u32 %v6378_v32, %v721_v14  ;;  %v726_v35 = vsub.s32 4294967266, %v721_v14  ;;  %v3312_v2 = vmul.f32 %v4424_v40, %v3311_v58 }
 0x2ad   : > { %v2294_v39 = vmul.f32 %v2293_v44, %v6362_v26  ;;  %v2302_v20 = vxor.u32 2147483648, %v2286_v57  ;;  %v1885_v26 = vsel %vm1879_vm14, %v1872_v50, 920167782  ;;  %v1888_v9 = vsel %vm1876_vm13, %v6412_v41, %v6414_v22 }
 0x2ae   : > { %v724_v1 = vshrl.u32 %v706_v5, %v722_v11  ;;  %v727_v6 = vadd.s32 127, %v726_v35  ;;  %v4426_v55 = vpop.eup %4425  ;;  %v1886_v5 = vsel %vm1878_vm15, %v6414_v22, %v1885_v26  ;;  %vm3314_vm1 = vcmp.lt.f32.partialorder %v3313_v38, 0.0004427343 }
 0x2af   : > { %v2299_v51 = vxor.u32 2147483648, %v2294_v39  ;;  %v2303_v32 = vsel %vm2301_vm8, %v2302_v20, %v2294_v39  ;;  %v3309_v47 = vmul.f32 0.6931472, %v4426_v55  ;;  %v1889_v40 = vsel %vm1879_vm14, %v1875_v25, 1326507024 }
 0x2b0   : > { %v725_v30 = vor.u32 %v724_v1, %v723_v63  ;;  %v728_v0 = vshll.u32 %v727_v6, 23  ;;  %v1890_v44 = vsel %vm1878_vm15, %v1872_v50, %v1889_v40  ;;  %v6455_v39 = vsub.f32 0.0, %v3228_v19  ;;  %v3689_v50 = vpop.trf.xlu0 }
 0x2b1   : > { %v2300_v42 = vsel %vm2298_vm9, %v2286_v57, %v2299_v51  ;;  %v3315_v58 = vsel %vm3314_vm1, %v3312_v2, %v3309_v47  ;;  %v1887_v57 = vsel %vm1877_vm0, %v1884_v36, %v1886_v5  ;;  %v1891_v11 = vsel %vm1877_vm0, %v1888_v9, %v1890_v44  ;;  %4175 = vmatmul.msk.f32.gmra.mxu2 %vm3702_vm5, %v3689_v50 }
 0x2b2   : > { %v2304_v56 = vsel %vm2297_vm10, %v2300_v42, %v2303_v32  ;;  %v729_v21 = vor.u32 4788187, %v728_v0  ;;  %v732_v52 = vcvt.s32.f32 %v725_v30  ;;  %v3435_v62 = vadd.f32 %v3315_v58, %v3211_v15 }
 0x2b3   : > { %v2305_v14 = vsel %vm2295_vm11, nan, %v2304_v56  ;;  %v1895_v35 = vand.u32 65535, %v1891_v11  ;;  %vm6459_vm2 = vcmp.le.f32.partialorder %v612_v48, 0.7853982  ;;  %v1896_v20 = vshrl.u32 %v1891_v11, 16 }
 0x2b4   : > { %v3086_v63 = vadd.f32 1.0, %v2305_v14  ;;  %v730_v25 = vand.u32 2147483647, %v729_v21  ;;  %v1917_v38 = vand.u32 65535, %v1887_v57  ;;  %v4154_v36 = vadd.f32 -0.6931472, %v3435_v62 }
 0x2b5   : > { %v1918_v51 = vshrl.u32 %v1887_v57, 16  ;;  %v739_v24 = vsel %vm6459_vm2, 0, %v6407_v34  ;;  %v1897_v15 = vmul.u32 %v1895_v35, %v6372_v27  ;;  %v1898_v48 = vmul.u32 %v1896_v20, %v6372_v27 }
 0x2b6   : > { %v3102_v1 = vmul.f32 0.5, %v3086_v63  ;;  %v733_v6 = vmul.f32 %v732_v52, %v730_v25  ;;  %v1899_v19 = vmul.u32 %v1895_v35, %v6375_v45  ;;  %3507 = vmatmul.f32.gmra.mxu1 %v4154_v36  ;;  %v1860_v2 = vshrl.u32 %v4756_v8, %v6364_v54 }
 0x2b7   : > { %v6474_v26 = vand.u32 8388607, %v1382_v12  ;;  %vm1393_vm3 = vcmp.gt.s32.totalorder %v6380_v17, 0  ;;  %v1881_v34 = vsel %vm1879_vm14, %v6414_v22, 2102212464  ;;  %v1900_v55 = vmul.u32 %v1896_v20, %v6375_v45 }
 0x2b8   : > { %3602 = vperm.xlu2 %4409, %v3102_v1   ;;  %v734_v32 = vxor.u32 2147483648, %v733_v6  ;;  %v1901_v30 = vshll.u32 %v1898_v48, 16  ;;  %v1903_v0 = vshll.u32 %v1899_v19, 16  ;;  %v6483_v9 = vand.u32 3, %v739_v24 }
 0x2b9   : > { %v1920_v54 = vmul.u32 %v1918_v51, %v6372_v27  ;;  %v1921_v42 = vmul.u32 %v1917_v38, %v6375_v45  ;;  %v1919_v40 = vmul.u32 %v1917_v38, %v6372_v27  ;;  %v1902_v21 = vshrl.u32 %v1898_v48, 16 }
 0x2ba   : > { %v735_v5 = vsel %vm614_vm6, %v734_v32, %v733_v6  ;;  %vm1905_vm4 = vc.u32 %v1897_v15, %v1901_v30  ;;  %v1907_v22 = vadd.s32 %v1901_v30, %v1897_v15  ;;  %v1922_v58 = vmul.u32 %v1918_v51, %v6375_v45 }
 0x2bb   : > { %v6490_v47 = vsel %vm6459_vm2, %v6074_v28, %v735_v5  ;;  %v1906_v52 = vsel %vm1905_vm4, 1, %v4761_v60  ;;  %v1923_v44 = vshll.u32 %v1920_v54, 16  ;;  %v1925_v57 = vshll.u32 %v1921_v42, 16 }
 0x2bc   : > { %v740_v56 = vmul.f32 %v6490_v47, %v6490_v47  ;;  %v1908_v14 = vadd.s32 %v1906_v52, %v1900_v55  ;;  %vm1909_vm6 = vc.u32 %v1907_v22, %v1903_v0  ;;  %v1880_v25 = vsel %vm1876_vm13, %v1860_v2, %v6409_v4 }
 0x2bd   : > { %v1910_v27 = vsel %vm1909_vm6, 1, %v4761_v60  ;;  %v1882_v62 = vsel %vm1878_vm15, %v6412_v41, %v1881_v34  ;;  %vm1927_vm7 = vc.u32 %v1919_v40, %v1923_v44  ;;  %v1929_v61 = vadd.s32 %v1923_v44, %v1919_v40 }
 0x2be   : > { %v741_v11 = vmul.f32 -0.001358992, %v740_v56  ;;  %v748_v63 = vmul.f32 -0.00019511016, %v740_v56  ;;  %v1912_v35 = vadd.s32 %v1910_v27, %v1908_v14  ;;  %v1904_v38 = vshrl.u32 %v1899_v19, 16 }
 0x2bf   : > { %v1928_v45 = vsel %vm1927_vm7, 1, %v4761_v60  ;;  %vm761_vm8 = vcmp.eq.s32.totalorder %v6483_v9, 2  ;;  %v1924_v6 = vshrl.u32 %v1920_v54, 16  ;;  %vm1931_vm9 = vc.u32 %v1929_v61, %v1925_v57 }
 0x2c0   : > { %v742_v50 = vadd.f32 0.041655596, %v741_v11  ;;  %v749_v20 = vadd.f32 0.008332121, %v748_v63  ;;  %v1913_v1 = vadd.s32 %v1912_v35, %v1902_v21  ;;  %v1930_v36 = vadd.s32 %v1928_v45, %v1922_v58 }
 0x2c1   : > { %v1883_v24 = vsel %vm1877_vm0, %v1880_v25, %v1882_v62  ;;  %v1932_v41 = vsel %vm1931_vm9, 1, %v4761_v60  ;;  %vm758_vm10 = vcmp.eq.s32.totalorder %v6483_v9, 0  ;;  %v1926_v15 = vshrl.u32 %v1921_v42, 16 }
 0x2c2   : > { %v743_v4 = vmul.f32 %v742_v50, %v740_v56  ;;  %v750_v51 = vmul.f32 %v749_v20, %v740_v56  ;;  %v6510_v48 = vadd.s32 %v1929_v61, %v1925_v57  ;;  %v1934_v19 = vadd.s32 %v1932_v41, %v1930_v36  ;;  %v3173_v41 = vpop.f32.mrf.mxu0 }
 0x2c3   : > { %v1394_v32 = vsel %vm1393_vm3, %v6380_v17, 0  ;;  %vm757_vm11 = vcmp.lt.s32.totalorder %v6483_v9, 2  ;;  %v6516_v55 = vadd.s32 %v1913_v1, %v1904_v38  ;;  %v1937_v0 = vmul.u32 %v6355_v16, %v1883_v24 }
 0x2c4   : > { %v744_v2 = vadd.f32 -0.4999988, %v743_v4  ;;  %v751_v34 = vadd.f32 -0.16666654, %v750_v51  ;;  %v1396_v46 = vand.u32 31, %v1394_v32  ;;  %v1935_v30 = vadd.s32 %v1934_v19, %v1924_v6 }
 0x2c5   : > { %v1390_v5 = vor.u32 8388608, %v6474_v26  ;;  %v6520_v54 = vshrl.u32 %v1394_v32, 5  ;;  %vm1939_vm12 = vc.u32 %v6516_v55, %v6510_v48  ;;  %vm755_vm13 = vweird.f32 %v6074_v28 }
 0x2c6   : > { %v745_v42 = vmul.f32 %v744_v2, %v740_v56  ;;  %v752_v22 = vmul.f32 %v751_v34, %v740_v56  ;;  %v1397_v40 = vsub.s32 32, %v1396_v46  ;;  %v1399_v21 = vshll.u32 %v4756_v8, %v1396_v46 }
 0x2c7   : > { %v1936_v17 = vadd.s32 %v1935_v30, %v1926_v15  ;;  %v1402_v52 = vshll.u32 %v4757_v10, %v1396_v46  ;;  %v1405_v44 = vshll.u32 %v4758_v13, %v1396_v46  ;;  %v1408_v14 = vshll.u32 %v4755_v3, %v1396_v46 }
 0x2c8   : > { %v746_v58 = vadd.f32 1.0, %v745_v42  ;;  %v753_v57 = vadd.f32 1.0, %v752_v22  ;;  %v1400_v16 = vshrl.u32 %v4757_v10, %v1397_v40  ;;  %v1403_v56 = vshrl.u32 %v4758_v13, %v1397_v40 }
 0x2c9   : > { %v1940_v26 = vadd.s32 1, %v1936_v17  ;;  %v1406_v11 = vshrl.u32 %v4755_v3, %v1397_v40  ;;  %v1409_v63 = vshrl.u32 %v4759_v18, %v1397_v40  ;;  %v1411_v35 = vshll.u32 %v4759_v18, %v1396_v46 }
 0x2ca   : > { %v754_v25 = vmul.f32 %v753_v57, %v6490_v47  ;;  %v762_v27 = vxor.u32 2147483648, %v746_v58  ;;  %v1401_v62 = vor.u32 %v1400_v16, %v1399_v21  ;;  %v1404_v50 = vor.u32 %v1403_v56, %v1402_v52 }
 0x2cb   : > { %v1941_v61 = vsel %vm1939_vm12, %v1940_v26, %v1936_v17  ;;  %v1407_v20 = vor.u32 %v1406_v11, %v1405_v44  ;;  %v1410_v38 = vor.u32 %v1409_v63, %v1408_v14  ;;  %v1412_v36 = vshrl.u32 %v4760_v23, %v1397_v40 }
 0x2cc   : > { %v759_v45 = vxor.u32 2147483648, %v754_v25  ;;  %v763_v1 = vsel %vm761_vm8, %v762_v27, %v754_v25  ;;  %v1942_v6 = vadd.s32 %v1941_v61, %v1937_v0  ;;  %vm1414_vm14 = vcmp.lt.s32.totalorder %v6520_v54, 1 }
 0x2cd   : > { %vm1416_vm15 = vcmp.lt.s32.totalorder %v6520_v54, 3  ;;  %vm1417_vm0 = vcmp.lt.s32.totalorder %v6520_v54, 4  ;;  %v3263_v47 = vmul.f32 1.442695, %v6455_v39  ;;  %v1413_v24 = vor.u32 %v1412_v36, %v1411_v35 }
 0x2ce   : > { %v760_v4 = vsel %vm758_vm10, %v746_v58, %v759_v45  ;;  %v1943_v51 = vadd.s32 536870912, %v1942_v6  ;;  %vm1415_vm1 = vcmp.lt.s32.totalorder %v6520_v54, 2  ;;  %v1423_v28 = vsel %vm1417_vm0, %v1410_v38, 920167782  ;;  %v583_v58 = vld [vmem:[%s4962_s15 + $0x18] sm:$0xff] }
 0x2cf   : > { %v764_v15 = vsel %vm757_vm11, %v760_v4, %v763_v1  ;;  %v6549_v19 = vshll.u32 %v1390_v5, 8  ;;  %v1422_v39 = vsel %vm1414_vm14, %v1401_v62, %v1404_v50  ;;  %v1424_v34 = vsel %vm1416_vm15, %v1407_v20, %v1423_v28 }
 0x2d0   : > { %v765_v32 = vsel %vm755_vm13, nan, %v764_v15  ;;  %v6551_v2 = vshrl.u32 %v1943_v51, 30  ;;  %v1426_v9 = vsel %vm1414_vm14, %v1404_v50, %v1407_v20  ;;  %4427 = vpow2.f32 %v3263_v47 }
 0x2d1   : > { %v3076_v46 = vadd.f32 1.0, %v765_v32  ;;  %v6560_v30 = vadd.f32 %v6310_v59, %v3173_v41  ;;  %v1427_v5 = vsel %vm1417_vm0, %v1413_v24, 1326507024  ;;  %v1425_v22 = vsel %vm1415_vm1, %v1422_v39, %v1424_v34 }
 0x2d2   : > { %v1945_v0 = vshll.u32 %v6551_v2, 30  ;;  %v1428_v21 = vsel %vm1416_vm15, %v1410_v38, %v1427_v5  ;;  %v1431_v17 = vand.u32 65535, %v6549_v19  ;;  %v3212_v52 = vmax.f32 %v6351_v37, 0.0 }
 0x2d3   : > { %v3092_v42 = vmul.f32 0.5, %v3076_v46  ;;  %v1429_v14 = vsel %vm1415_vm1, %v1426_v9, %v1428_v21  ;;  %v1398_v57 = vshrl.u32 %v4756_v8, %v1397_v40  ;;  %v1432_v16 = vshrl.u32 %v6549_v19, 16 }
 0x2d4   : > { %v6571_v44 = vsub.s32 %v1942_v6, %v1945_v0  ;;  %v1433_v26 = vand.u32 65535, %v1429_v14  ;;  %v1434_v56 = vshrl.u32 %v1429_v14, 16  ;;  %v1455_v63 = vand.u32 65535, %v1425_v22 }
 0x2d5   : > { %3552 = vperm.xlu1 %4408, %v3092_v42   ;;  %v1456_v25 = vshrl.u32 %v1425_v22, 16  ;;  %v3229_v27 = vand.u32 2147483647, %v6560_v30  ;;  %v1419_v35 = vsel %vm1417_vm0, %v1407_v20, 2102212464  ;;  %v1938_v40 = vadd.s32 %v6510_v48, %v6516_v55 }
 0x2d6   : > { %vm1947_vm2 = vcmp.lt.s32.totalorder %v6571_v44, 0  ;;  %v1948_v11 = vsub.s32 0, %v6571_v44  ;;  %v1436_v61 = vmul.u32 %v1434_v56, %v1431_v17  ;;  %v6583_v38 = vmul.f32 0.62831855, %v583_v58  ;;  %v4428_v45 = vpop.eup %4427 }
 0x2d7   : > { %v1435_v6 = vmul.u32 %v1433_v26, %v1431_v17  ;;  %v6588_v36 = vmul.u32 %v1456_v25, %v1431_v17  ;;  %v6592_v4 = vsel %vm1414_vm14, %v1398_v57, %v1401_v62  ;;  %v1437_v51 = vmul.u32 %v1433_v26, %v1432_v16 }
 0x2d8   : > { %v1949_v1 = vsel %vm1947_vm2, %v1948_v11, %v6571_v44  ;;  %v1439_v24 = vshll.u32 %v1436_v61, 16  ;;  %v1968_v20 = vsub.s32 4, %v6551_v2  ;;  %v1420_v41 = vsel %vm1416_vm15, %v1404_v50, %v1419_v35 }
 0x2d9   : > { %v1950_v47 = vclz %v1949_v1  ;;  %v1457_v15 = vmul.u32 %v1455_v63, %v1431_v17  ;;  %v1461_v48 = vshll.u32 %v6588_v36, 16  ;;  %v3316_v28 = vadd.f32 1.0, %v4428_v45 }
 0x2da   : > { %v3319_v32 = vmul.f32 -0.5, %v4428_v45  ;;  %v1438_v39 = vmul.u32 %v1434_v56, %v1432_v16  ;;  %v1440_v34 = vshrl.u32 %v1436_v61, 16  ;;  %vm1443_vm3 = vc.u32 %v1435_v6, %v1439_v24 }
 0x2db   : > { %v4129_v55 = vadd.s32 4294967294, %v1950_v47  ;;  %v1459_v46 = vmul.u32 %v1455_v63, %v1432_v16  ;;  %v1460_v9 = vmul.u32 %v1456_v25, %v1432_v16  ;;  %4429 = vlog2.f32 %v3316_v28 }
 0x2dc   : > { %v1441_v62 = vshll.u32 %v1437_v51, 16  ;;  %v1445_v0 = vadd.s32 %v1439_v24, %v1435_v6  ;;  %v3322_v42 = vand.u32 2147483647, %v4428_v45  ;;  %v1444_v22 = vsel %vm1443_vm3, 1, %v4761_v60 }
 0x2dd   : > { %vm4130_vm4 = vcmp.lt.s32.totalorder %v4129_v55, 0  ;;  %vm1465_vm6 = vc.u32 %v1457_v15, %v1461_v48  ;;  %v3320_v14 = vadd.f32 1.0, %v3319_v32  ;;  %v1442_v58 = vshrl.u32 %v1437_v51, 16 }
 0x2de   : > { %v1953_v5 = vsel %vm4130_vm4, 0, %v4129_v55  ;;  %v1446_v57 = vadd.s32 %v1444_v22, %v1438_v39  ;;  %v1462_v26 = vshrl.u32 %v6588_v36, 16  ;;  %v1463_v56 = vshll.u32 %v1459_v46, 16 }
 0x2df   : > { %v1954_v50 = vsub.s32 32, %v1953_v5  ;;  %v1955_v21 = vshll.u32 %v6571_v44, %v1953_v5  ;;  %v1958_v17 = vsub.s32 4294967266, %v1953_v5  ;;  %vm1447_vm7 = vc.u32 %v1445_v0, %v1441_v62  ;;  %v3176_v5 = vpop.f32.mrf.mxu0 }
 0x2e0   : > { %v1466_v63 = vsel %vm1465_vm6, 1, %v4761_v60  ;;  %vm6602_vm8 = vcmp.lt.f32.partialorder %v3322_v42, 0.0004427343  ;;  %v1448_v35 = vsel %vm1447_vm7, 1, %v4761_v60  ;;  %v1467_v61 = vadd.s32 %v1461_v48, %v1457_v15 }
 0x2e1   : > { %v1956_v16 = vshrl.u32 %v1938_v40, %v1954_v50  ;;  %v1959_v11 = vadd.s32 127, %v1958_v17  ;;  %v1468_v44 = vadd.s32 %v1466_v63, %v1460_v9  ;;  %v4430_v1 = vpop.eup %4429  ;;  %v3321_v51 = vmul.f32 %v4428_v45, %v3320_v14  ;;  %v581_v63 = vld [vmem:[%s4962_s15 + $0x8] sm:$0xff] }
 0x2e2   : > { %v1450_v24 = vadd.s32 %v1448_v35, %v1446_v57  ;;  %v3318_v36 = vmul.f32 0.6931472, %v4430_v1  ;;  %vm1469_vm9 = vc.u32 %v1467_v61, %v1463_v56  ;;  %v1074_v40 = vand.u32 2147483647, %v6583_v38 }
 0x2e3   : > { %v1957_v6 = vor.u32 %v1956_v16, %v1955_v21  ;;  %v1960_v47 = vshll.u32 %v1959_v11, 23  ;;  %v1077_v55 = vand.u32 2139095040, %v6583_v38  ;;  %v1470_v62 = vsel %vm1469_vm9, 1, %v4761_v60  ;;  %v3690_v21 = vpop.trf.xlu0 }
 0x2e4   : > { %v1451_v39 = vadd.s32 %v1450_v24, %v1440_v34  ;;  %v3324_v15 = vsel %vm6602_vm8, %v3321_v51, %v3318_v36  ;;  %v1464_v48 = vshrl.u32 %v1459_v46, 16  ;;  %v1472_v9 = vadd.s32 %v1470_v62, %v1468_v44  ;;  %4176 = vmatmul.msk.f32.gmra.mxu2 %vm3702_vm5, %v3690_v21 }
 0x2e5   : > { %v1961_v28 = vor.u32 4788187, %v1960_v47  ;;  %v1964_v32 = vcvt.s32.f32 %v1957_v6  ;;  %v1078_v0 = vshrl.u32 %v1077_v55, 23  ;;  %v3436_v42 = vadd.f32 %v3324_v15, %v3212_v52 }
 0x2e6   : > { %v1452_v22 = vadd.s32 %v1451_v39, %v1442_v58  ;;  %v1471_v50 = vadd.s32 %v1467_v61, %v1463_v56  ;;  %v1421_v34 = vsel %vm1415_vm1, %v6592_v4, %v1420_v41  ;;  %v1473_v17 = vadd.s32 %v1472_v9, %v1462_v26 }
 0x2e7   : > { %v1962_v45 = vand.u32 2147483647, %v1961_v28  ;;  %v4113_v14 = vadd.s32 4294967169, %v1078_v0  ;;  %v1081_v57 = vand.u32 8388607, %v1074_v40  ;;  %v3245_v46 = vsub.f32 0.0, %v3229_v27 }
 0x2e8   : > { %vm1846_vm10 = vcmp.lt.s32.totalorder %v6331_v53, 0  ;;  %v4155_v37 = vadd.f32 -0.6931472, %v3436_v42  ;;  %v6624_v52 = vadd.f32 %v6310_v59, %v3176_v5  ;;  %v1474_v4 = vadd.s32 %v1473_v17, %v1464_v48 }
 0x2e9   : > { %v1965_v16 = vmul.f32 %v1964_v32, %v1962_v45  ;;  %v1969_v54 = vsel %vm1846_vm10, %v1968_v20, %v6551_v2  ;;  %v1084_v41 = vadd.s32 1, %v4113_v14  ;;  %vm6633_vm11 = vcmp.le.f32.partialorder %v1844_v7, 0.7853982 }
 0x2ea   : > { %3510 = vmatmul.f32.gmra.mxu1 %v4155_v37  ;;  %v1475_v26 = vmul.u32 %v6549_v19, %v1421_v34  ;;  %vm1477_vm12 = vc.u32 %v1452_v22, %v1471_v50  ;;  %v1478_v59 = vadd.s32 1, %v1474_v4  ;;  %v1082_v56 = vor.u32 8388608, %v1081_v57 }
 0x2eb   : > { %v1966_v58 = vxor.u32 2147483648, %v1965_v16  ;;  %vm1085_vm13 = vcmp.gt.s32.totalorder %v1084_v41, 0  ;;  %v1971_v2 = vsel %vm6633_vm11, 0, %v1969_v54  ;;  %v3265_v7 = vmul.f32 1.442695, %v3245_v46 }
 0x2ec   : > { %v1086_v20 = vsel %vm1085_vm13, %v1084_v41, 0  ;;  %v1479_v35 = vsel %vm1477_vm12, %v1478_v59, %v1474_v4  ;;  %v3230_v19 = vand.u32 2147483647, %v6624_v52  ;;  %v6647_v6 = vand.u32 3, %v1971_v2 }
 0x2ed   : > { %v1967_v11 = vsel %vm1846_vm10, %v1966_v58, %v1965_v16  ;;  %v1088_v61 = vand.u32 31, %v1086_v20  ;;  %v1480_v1 = vadd.s32 %v1479_v35, %v1475_v26  ;;  %v6649_v47 = vshll.u32 %v1082_v56, 8 }
 0x2ee   : > { %v1970_v25 = vsel %vm6633_vm11, %v6331_v53, %v1967_v11  ;;  %v6651_v51 = vmul.f32 0.62831855, %v581_v63  ;;  %v3213_v28 = vmax.f32 %v6560_v30, 0.0  ;;  %4431 = vpow2.f32 %v3265_v7 }
 0x2ef   : > { %v1972_v44 = vmul.f32 %v1970_v25, %v1970_v25  ;;  %v1481_v55 = vadd.s32 536870912, %v1480_v1  ;;  %v6654_v32 = vsub.s32 32, %v1088_v61  ;;  %v6656_v39 = vsub.f32 0.0, %v3230_v19 }
 0x2f0   : > { %vm1993_vm14 = vcmp.eq.s32.totalorder %v6647_v6, 2  ;;  %v6661_v9 = vadd.s32 %v1471_v50, %v1452_v22  ;;  %v6663_v0 = vshrl.u32 %v1086_v20, 5  ;;  %v6666_v5 = vand.u32 65535, %v6649_v47 }
 0x2f1   : > { %v1973_v24 = vmul.f32 -0.001358992, %v1972_v44  ;;  %v1980_v36 = vmul.f32 -0.00019511016, %v1972_v44  ;;  %v6658_v48 = vshrl.u32 %v1481_v55, 30  ;;  %v769_v45 = vand.u32 2139095040, %v6651_v51 }
 0x2f2   : > { %v1091_v17 = vshll.u32 %v4756_v8, %v1088_v61  ;;  %vm1990_vm15 = vcmp.eq.s32.totalorder %v6647_v6, 0  ;;  %v1092_v14 = vshrl.u32 %v4757_v10, %v6654_v32  ;;  %v1094_v22 = vshll.u32 %v4757_v10, %v1088_v61 }
 0x2f3   : > { %v1974_v62 = vadd.f32 0.041655596, %v1973_v24  ;;  %v1981_v15 = vadd.f32 0.008332121, %v1980_v36  ;;  %v1483_v34 = vshll.u32 %v6658_v48, 30  ;;  %v1100_v50 = vshll.u32 %v4755_v3, %v1088_v61 }
 0x2f4   : > { %v1101_v57 = vshrl.u32 %v4759_v18, %v6654_v32  ;;  %vm1989_vm0 = vcmp.lt.s32.totalorder %v6647_v6, 2  ;;  %v1097_v54 = vshll.u32 %v4758_v13, %v1088_v61  ;;  %v6682_v4 = vpop.eup %4431  ;;  %vm1987_vm1 = vweird.f32 %v6331_v53 }
 0x2f5   : > { %v1975_v42 = vmul.f32 %v1974_v62, %v1972_v44  ;;  %v1982_v21 = vmul.f32 %v1981_v15, %v1972_v44  ;;  %v6679_v37 = vsub.s32 %v1480_v1, %v1483_v34  ;;  %v1095_v41 = vshrl.u32 %v4758_v13, %v6654_v32 }
 0x2f6   : > { %v1098_v27 = vshrl.u32 %v4755_v3, %v6654_v32  ;;  %v1103_v58 = vshll.u32 %v4759_v18, %v1088_v61  ;;  %v1104_v26 = vshrl.u32 %v4760_v23, %v6654_v32  ;;  %v6694_v2 = vor.u32 %v1092_v14, %v1091_v17 }
 0x2f7   : > { %v1976_v46 = vadd.f32 -0.4999988, %v1975_v42  ;;  %v1983_v16 = vadd.f32 -0.16666654, %v1982_v21  ;;  %vm1485_vm2 = vcmp.lt.s32.totalorder %v6679_v37, 0  ;;  %v1486_v11 = vsub.s32 0, %v6679_v37 }
 0x2f8   : > { %v1102_v20 = vor.u32 %v1101_v57, %v1100_v50  ;;  %v6697_v63 = vshrl.u32 %v6649_v47, 16  ;;  %v766_v7 = vand.u32 2147483647, %v6651_v51  ;;  %vm1384_vm3 = vcmp.lt.s32.totalorder %v6339_v31, 0 }
 0x2f9   : > { %v1977_v59 = vmul.f32 %v1976_v46, %v1972_v44  ;;  %v1984_v56 = vmul.f32 %v1983_v16, %v1972_v44  ;;  %v1487_v61 = vsel %vm1485_vm2, %v1486_v11, %v6679_v37  ;;  %vm1109_vm4 = vcmp.lt.s32.totalorder %v6663_v0, 4 }
 0x2fa   : > { %v1488_v44 = vclz %v1487_v61  ;;  %v6703_v1 = vor.u32 %v1095_v41, %v1094_v22  ;;  %v1099_v24 = vor.u32 %v1098_v27, %v1097_v54  ;;  %v1105_v36 = vor.u32 %v1104_v26, %v1103_v58 }
 0x2fb   : > { %v1978_v35 = vadd.f32 1.0, %v1977_v59  ;;  %v1985_v19 = vadd.f32 1.0, %v1984_v56  ;;  %v1506_v15 = vsub.s32 4, %v6658_v48  ;;  %vm1106_vm6 = vcmp.lt.s32.totalorder %v6663_v0, 1 }
 0x2fc   : > { %v4120_v42 = vadd.s32 4294967294, %v1488_v44  ;;  %v3325_v21 = vadd.f32 1.0, %v6682_v4  ;;  %vm1108_vm7 = vcmp.lt.s32.totalorder %v6663_v0, 3  ;;  %v1115_v34 = vsel %vm1109_vm4, %v1102_v20, 920167782 }
 0x2fd   : > { %v1986_v55 = vmul.f32 %v1985_v19, %v1970_v25  ;;  %v1994_v62 = vxor.u32 2147483648, %v1978_v35  ;;  %v3328_v22 = vmul.f32 -0.5, %v6682_v4  ;;  %vm1107_vm8 = vcmp.lt.s32.totalorder %v6663_v0, 2 }
 0x2fe   : > { %vm4121_vm9 = vcmp.lt.s32.totalorder %v4120_v42, 0  ;;  %4433 = vlog2.f32 %v3325_v21  ;;  %v1114_v25 = vsel %vm1106_vm6, %v6694_v2, %v6703_v1  ;;  %v1119_v50 = vsel %vm1109_vm4, %v1105_v36, 1326507024 }
 0x2ff   : > { %v1991_v17 = vxor.u32 2147483648, %v1986_v55  ;;  %v1995_v14 = vsel %vm1993_vm14, %v1994_v62, %v1986_v55  ;;  %vm6725_vm10 = vcmp.le.f32.partialorder %v1382_v12, 0.7853982  ;;  %v1491_v16 = vsel %vm4121_vm9, 0, %v4120_v42 }
 0x300   : > { %v3331_v54 = vand.u32 2147483647, %v6682_v4  ;;  %v1116_v41 = vsel %vm1108_vm7, %v1099_v24, %v1115_v34  ;;  %v1492_v58 = vsub.s32 32, %v1491_v16  ;;  %v1493_v26 = vshll.u32 %v6679_v37, %v1491_v16 }
 0x301   : > { %v1992_v57 = vsel %vm1990_vm15, %v1978_v35, %v1991_v17  ;;  %v1496_v59 = vsub.s32 4294967266, %v1491_v16  ;;  %v3329_v12 = vadd.f32 1.0, %v3328_v22  ;;  %v1090_v11 = vshrl.u32 %v4756_v8, %v6654_v32 }
 0x302   : > { %v1996_v27 = vsel %vm1989_vm0, %v1992_v57, %v1995_v14  ;;  %v1118_v35 = vsel %vm1106_vm6, %v6703_v1, %v1099_v24  ;;  %v1494_v61 = vshrl.u32 %v6661_v9, %v1492_v58  ;;  %v1507_v37 = vsel %vm1384_vm3, %v1506_v15, %v6658_v48  ;;  %v3691_v58 = vpop.trf.xlu0 }
 0x303   : > { %v1997_v56 = vsel %vm1987_vm1, nan, %v1996_v27  ;;  %v1497_v6 = vadd.s32 127, %v1496_v59  ;;  %vm6746_vm11 = vcmp.lt.f32.partialorder %v3331_v54, 0.0004427343  ;;  %v1111_v53 = vsel %vm1109_vm4, %v1099_v24, 2102212464  ;;  %4177 = vmatmul.msk.f32.gmra.mxu2 %vm3702_vm5, %v3691_v58 }
 0x304   : > { %v3084_v19 = vadd.f32 1.0, %v1997_v56  ;;  %v1117_v32 = vsel %vm1107_vm8, %v1114_v25, %v1116_v41  ;;  %v1120_v36 = vsel %vm1108_vm7, %v1102_v20, %v1119_v50  ;;  %v4434_v55 = vpop.eup %4433  ;;  %v1495_v62 = vor.u32 %v1494_v61, %v1493_v26 }
 0x305   : > { %v1498_v42 = vshll.u32 %v1497_v6, 23  ;;  %v1121_v48 = vsel %vm1107_vm8, %v1118_v35, %v1120_v36  ;;  %v3327_v15 = vmul.f32 0.6931472, %v4434_v55  ;;  %v3330_v21 = vmul.f32 %v6682_v4, %v3329_v12 }
 0x306   : > { %v3100_v9 = vmul.f32 0.5, %v3084_v19  ;;  %v1125_v34 = vand.u32 65535, %v1121_v48  ;;  %v1126_v17 = vshrl.u32 %v1121_v48, 16  ;;  %v1502_v14 = vcvt.s32.f32 %v1495_v62 }
 0x307   : > { %v1499_v24 = vor.u32 4788187, %v1498_v42  ;;  %v1147_v22 = vand.u32 65535, %v1117_v32  ;;  %v1148_v25 = vshrl.u32 %v1117_v32, 16  ;;  %v3333_v20 = vsel %vm6746_vm11, %v3330_v21, %v3327_v15 }
 0x308   : > { %3592 = vperm.xlu2 %4409, %v3100_v9   ;;  %v1127_v50 = vmul.u32 %v1125_v34, %v6666_v5  ;;  %v1128_v57 = vmul.u32 %v1126_v17, %v6666_v5  ;;  %v1129_v16 = vmul.u32 %v1125_v34, %v6697_v63  ;;  %v1509_v4 = vsel %vm6725_vm10, 0, %v1507_v37 }
 0x309   : > { %v1500_v54 = vand.u32 2147483647, %v1499_v24  ;;  %v3437_v41 = vadd.f32 %v3333_v20, %v3213_v28  ;;  %v770_v27 = vshrl.u32 %v769_v45, 23  ;;  %v1110_v26 = vsel %vm1106_vm6, %v1090_v11, %v6694_v2 }
 0x30a   : > { %v1130_v59 = vmul.u32 %v1126_v17, %v6697_v63  ;;  %v1131_v56 = vshll.u32 %v1128_v57, 16  ;;  %v1133_v12 = vshll.u32 %v1129_v16, 16  ;;  %v1112_v61 = vsel %vm1108_vm7, %v6703_v1, %v1111_v53 }
 0x30b   : > { %v1503_v35 = vmul.f32 %v1502_v14, %v1500_v54  ;;  %v4156_v19 = vadd.f32 -0.6931472, %v3437_v41  ;;  %v1150_v30 = vmul.u32 %v1148_v25, %v6666_v5  ;;  %v1149_v45 = vmul.u32 %v1147_v22, %v6666_v5 }
 0x30c   : > { %vm1135_vm12 = vc.u32 %v1127_v50, %v1131_v56  ;;  %v1137_v28 = vadd.s32 %v1131_v56, %v1127_v50  ;;  %v1151_v2 = vmul.u32 %v1147_v22, %v6697_v63  ;;  %v1132_v6 = vshrl.u32 %v1128_v57, 16  ;;  %v6800_v22 = vpop.f32.mrf.mxu0 }
 0x30d   : > { %v1504_v11 = vxor.u32 2147483648, %v1503_v35  ;;  %3513 = vmatmul.f32.gmra.mxu1 %v4156_v19  ;;  %v1136_v37 = vsel %vm1135_vm12, 1, %v4761_v60  ;;  %v4107_v44 = vadd.s32 4294967169, %v770_v27  ;;  %v1152_v1 = vmul.u32 %v1148_v25, %v6697_v63 }
 0x30e   : > { %v1138_v32 = vadd.s32 %v1136_v37, %v1130_v59  ;;  %vm1139_vm13 = vc.u32 %v1137_v28, %v1133_v12  ;;  %v1153_v53 = vshll.u32 %v1150_v30, 16  ;;  %v6787_v55 = vsel %vm1107_vm8, %v1110_v26, %v1112_v61 }
 0x30f   : > { %v1505_v36 = vsel %vm1384_vm3, %v1504_v11, %v1503_v35  ;;  %v1140_v5 = vsel %vm1139_vm13, 1, %v4761_v60  ;;  %v1155_v9 = vshll.u32 %v1151_v2, 16  ;;  %v1134_v42 = vshrl.u32 %v1129_v16, 16 }
 0x310   : > { %v6793_v62 = vsel %vm6725_vm10, %v6339_v31, %v1505_v36  ;;  %v1142_v48 = vadd.s32 %v1140_v5, %v1138_v32  ;;  %vm1157_vm14 = vc.u32 %v1149_v45, %v1153_v53  ;;  %v6797_v15 = vand.u32 3, %v1509_v4 }
 0x311   : > { %v1510_v63 = vmul.f32 %v6793_v62, %v6793_v62  ;;  %v1158_v0 = vsel %vm1157_vm14, 1, %v4761_v60  ;;  %v1159_v21 = vadd.s32 %v1153_v53, %v1149_v45  ;;  %v1154_v17 = vshrl.u32 %v1150_v30, 16 }
 0x312   : > { %v1143_v34 = vadd.s32 %v1142_v48, %v1132_v6  ;;  %v1160_v24 = vadd.s32 %v1158_v0, %v1152_v1  ;;  %v776_v14 = vadd.s32 1, %v4107_v44  ;;  %v1156_v20 = vshrl.u32 %v1151_v2, 16 }
 0x313   : > { %v1511_v46 = vmul.f32 -0.001358992, %v1510_v63  ;;  %v1518_v25 = vmul.f32 -0.00019511016, %v1510_v63  ;;  %vm1161_vm15 = vc.u32 %v1159_v21, %v1155_v9  ;;  %v6805_v16 = vadd.s32 %v1159_v21, %v1155_v9 }
 0x314   : > { %v6802_v50 = vadd.s32 %v1143_v34, %v1134_v42  ;;  %v1162_v57 = vsel %vm1161_vm15, 1, %v4761_v60  ;;  %vm777_vm0 = vcmp.gt.s32.totalorder %v776_v14, 0  ;;  %v3267_v58 = vmul.f32 1.442695, %v6656_v39  ;;  %v3182_v48 = vpop.f32.mrf.mxu0 }
 0x315   : > { %v1512_v54 = vadd.f32 0.041655596, %v1511_v46  ;;  %v1519_v4 = vadd.f32 0.008332121, %v1518_v25  ;;  %v1164_v41 = vadd.s32 %v1162_v57, %v1160_v24  ;;  %v778_v27 = vsel %vm777_vm0, %v776_v14, 0 }
 0x316   : > { %v1167_v26 = vmul.u32 %v6649_v47, %v6787_v55  ;;  %v773_v59 = vand.u32 8388607, %v766_v7  ;;  %v780_v56 = vand.u32 31, %v778_v27  ;;  %vm1169_vm1 = vc.u32 %v6802_v50, %v6805_v16 }
 0x317   : > { %v1513_v12 = vmul.f32 %v1512_v54, %v1510_v63  ;;  %v1520_v35 = vmul.f32 %v1519_v4, %v1510_v63  ;;  %v1165_v19 = vadd.s32 %v1164_v41, %v1154_v17  ;;  %vm1528_vm2 = vcmp.eq.s32.totalorder %v6797_v15, 0 }
 0x318   : > { %v6815_v61 = vshrl.u32 %v778_v27, 5  ;;  %v781_v30 = vsub.s32 32, %v780_v56  ;;  %v783_v39 = vshll.u32 %v4756_v8, %v780_v56  ;;  %v786_v28 = vshll.u32 %v4757_v10, %v780_v56 }
 0x319   : > { %v1514_v47 = vadd.f32 -0.4999988, %v1513_v12  ;;  %v1521_v45 = vadd.f32 -0.16666654, %v1520_v35  ;;  %vm1527_vm3 = vcmp.lt.s32.totalorder %v6797_v15, 2  ;;  %v1166_v2 = vadd.s32 %v1165_v19, %v1156_v20 }
 0x31a   : > { %v789_v11 = vshll.u32 %v4758_v13, %v780_v56  ;;  %v784_v6 = vshrl.u32 %v4757_v10, %v781_v30  ;;  %v787_v37 = vshrl.u32 %v4758_v13, %v781_v30  ;;  %v790_v44 = vshrl.u32 %v4755_v3, %v781_v30 }
 0x31b   : > { %v792_v32 = vshll.u32 %v4755_v3, %v780_v56  ;;  %v1515_v1 = vmul.f32 %v1514_v47, %v1510_v63  ;;  %v1522_v53 = vmul.f32 %v1521_v45, %v1510_v63  ;;  %v1170_v36 = vadd.s32 1, %v1166_v2 }
 0x31c   : > { %v793_v55 = vshrl.u32 %v4759_v18, %v781_v30  ;;  %vm1531_vm4 = vcmp.eq.s32.totalorder %v6797_v15, 2  ;;  %v774_v5 = vor.u32 8388608, %v773_v59  ;;  %v6827_v9 = vor.u32 %v784_v6, %v783_v39 }
 0x31d   : > { %v795_v42 = vshll.u32 %v4759_v18, %v780_v56  ;;  %v1516_v0 = vadd.f32 1.0, %v1515_v1  ;;  %v1523_v21 = vadd.f32 1.0, %v1522_v53  ;;  %v1171_v34 = vsel %vm1169_vm1, %v1170_v36, %v1166_v2 }
 0x31e   : > { %v788_v17 = vor.u32 %v787_v37, %v786_v28  ;;  %v1172_v24 = vadd.s32 %v1171_v34, %v1167_v26  ;;  %v794_v63 = vor.u32 %v793_v55, %v792_v32  ;;  %v796_v14 = vshrl.u32 %v4760_v23, %v781_v30  ;;  %v6867_v28 = vld [vmem:[%s7320_s6] ss:$0 sm:$0xff]  ;;  %v3185_v32 = vpop.f32.mrf.mxu0 }
 0x31f   : > { %vm798_vm6 = vcmp.lt.s32.totalorder %v6815_v61, 1  ;;  %v1524_v46 = vmul.f32 %v1523_v21, %v6793_v62  ;;  %v1532_v25 = vxor.u32 2147483648, %v1516_v0  ;;  %v791_v20 = vor.u32 %v790_v44, %v789_v11 }
 0x320   : > { %vm801_vm7 = vcmp.lt.s32.totalorder %v6815_v61, 4  ;;  %v1173_v57 = vadd.s32 536870912, %v1172_v24  ;;  %v797_v54 = vor.u32 %v796_v14, %v795_v42  ;;  %vm800_vm8 = vcmp.lt.s32.totalorder %v6815_v61, 3 }
 0x321   : > { %v6838_v4 = vshll.u32 %v774_v5, 8  ;;  %v1529_v41 = vxor.u32 2147483648, %v1524_v46  ;;  %v1533_v27 = vsel %vm1531_vm4, %v1532_v25, %v1524_v46  ;;  %vm799_vm9 = vcmp.lt.s32.totalorder %v6815_v61, 2 }
 0x322   : > { %v806_v62 = vsel %vm798_vm6, %v6827_v9, %v788_v17  ;;  %vm1525_vm10 = vweird.f32 %v6339_v31  ;;  %v6847_v26 = vshrl.u32 %v1173_v57, 30  ;;  %v807_v59 = vsel %vm801_vm7, %v794_v63, 920167782 }
 0x323   : > { %4435 = vpow2.f32 %v3267_v58  ;;  %v1530_v56 = vsel %vm1528_vm2, %v1516_v0, %v1529_v41  ;;  %v808_v12 = vsel %vm800_vm8, %v791_v20, %v807_v59  ;;  %v811_v35 = vsel %vm801_vm7, %v797_v54, 1326507024 }
 0x324   : > { %v1534_v19 = vsel %vm1527_vm3, %v1530_v56, %v1533_v27  ;;  %v1175_v31 = vshll.u32 %v6847_v26, 30  ;;  %v809_v39 = vsel %vm799_vm9, %v806_v62, %v808_v12  ;;  %v810_v58 = vsel %vm798_vm6, %v788_v17, %v791_v20 }
 0x325   : > { %v6871_v47 = vadd.f32 %v6867_v28, %v6800_v22  ;;  %v1535_v45 = vsel %vm1525_vm10, nan, %v1534_v19  ;;  %v812_v15 = vsel %vm800_vm8, %v794_v63, %v811_v35  ;;  %v815_v2 = vand.u32 65535, %v6838_v4 }
 0x326   : > { %v6877_v11 = vadd.f32 %v6867_v28, %v3182_v48  ;;  %v3081_v6 = vadd.f32 1.0, %v1535_v45  ;;  %v6879_v37 = vsub.s32 %v1172_v24, %v1175_v31  ;;  %v782_v44 = vshrl.u32 %v4756_v8, %v781_v30 }
 0x327   : > { %v813_v1 = vsel %vm799_vm9, %v810_v58, %v812_v15  ;;  %v816_v22 = vshrl.u32 %v6838_v4, 16  ;;  %v839_v53 = vand.u32 65535, %v809_v39  ;;  %v840_v36 = vshrl.u32 %v809_v39, 16 }
 0x328   : > { %v3097_v55 = vmul.f32 0.5, %v3081_v6  ;;  %vm1177_vm11 = vcmp.lt.s32.totalorder %v6879_v37, 0  ;;  %v1178_v5 = vsub.s32 0, %v6879_v37  ;;  %v817_v42 = vand.u32 65535, %v813_v1 }
 0x329   : > { %v4436_v48 = vpop.eup %4435  ;;  %v3214_v0 = vmax.f32 %v6624_v52, 0.0  ;;  %v803_v30 = vsel %vm801_vm7, %v791_v20, 2102212464  ;;  %v818_v21 = vshrl.u32 %v813_v1, 16  ;;  %v6890_v34 = vmul.u32 %v840_v36, %v815_v2 }
 0x32a   : > { %v3231_v24 = vand.u32 2147483647, %v6871_v47  ;;  %v3232_v63 = vand.u32 2147483647, %v6877_v11  ;;  %3577 = vperm.xlu2 %4409, %v3097_v55   ;;  %v6895_v14 = vadd.f32 %v6867_v28, %v3185_v32  ;;  %v1179_v46 = vsel %vm1177_vm11, %v1178_v5, %v6879_v37  ;;  %v587_v32 = vld [vmem:[%s4962_s15 + $0x38] sm:$0xff] }
 0x32b   : > { %v1168_v25 = vadd.s32 %v6805_v16, %v6802_v50  ;;  %v1180_v57 = vclz %v1179_v46  ;;  %v820_v54 = vmul.u32 %v818_v21, %v815_v2  ;;  %v6900_v41 = vmul.u32 %v817_v42, %v816_v22 }
 0x32c   : > { %v802_v20 = vsel %vm798_vm6, %v782_v44, %v6827_v9  ;;  %v804_v27 = vsel %vm800_vm8, %v788_v17, %v803_v30  ;;  %v819_v62 = vmul.u32 %v817_v42, %v815_v2  ;;  %v841_v59 = vmul.u32 %v839_v53, %v815_v2 }
 0x32d   : > { %v4114_v56 = vadd.s32 4294967294, %v1180_v57  ;;  %v3334_v12 = vadd.f32 1.0, %v4436_v48  ;;  %v6907_v35 = vmul.u32 %v839_v53, %v816_v22  ;;  %v845_v19 = vshll.u32 %v6890_v34, 16 }
 0x32e   : > { %v3337_v50 = vmul.f32 -0.5, %v4436_v48  ;;  %v822_v16 = vmul.u32 %v818_v21, %v816_v22  ;;  %v823_v31 = vshll.u32 %v820_v54, 16  ;;  %v844_v39 = vmul.u32 %v840_v36, %v816_v22 }
 0x32f   : > { %vm4115_vm12 = vcmp.lt.s32.totalorder %v4114_v56, 0  ;;  %4437 = vlog2.f32 %v3334_v12  ;;  %v825_v9 = vshll.u32 %v6900_v41, 16  ;;  %v826_v58 = vshrl.u32 %v6900_v41, 16 }
 0x330   : > { %v1183_v17 = vsel %vm4115_vm12, 0, %v4114_v56  ;;  %v3340_v45 = vand.u32 2147483647, %v4436_v48  ;;  %vm827_vm13 = vc.u32 %v819_v62, %v823_v31  ;;  %v846_v15 = vshrl.u32 %v6890_v34, 16 }
 0x331   : > { %v1184_v2 = vsub.s32 32, %v1183_v17  ;;  %v1185_v6 = vshll.u32 %v6879_v37, %v1183_v17  ;;  %v1188_v44 = vsub.s32 4294967266, %v1183_v17  ;;  %vm849_vm14 = vc.u32 %v841_v59, %v845_v19 }
 0x332   : > { %v3338_v1 = vadd.f32 1.0, %v3337_v50  ;;  %v824_v53 = vshrl.u32 %v820_v54, 16  ;;  %v828_v22 = vsel %vm827_vm13, 1, %v4761_v60  ;;  %v847_v36 = vshll.u32 %v6907_v35, 16 }
 0x333   : > { %v1186_v55 = vshrl.u32 %v1168_v25, %v1184_v2  ;;  %v1189_v5 = vadd.s32 127, %v1188_v44  ;;  %v829_v42 = vadd.s32 %v823_v31, %v819_v62  ;;  %v830_v30 = vadd.s32 %v828_v22, %v822_v16  ;;  %v3692_v44 = vpop.trf.xlu0 }
 0x334   : > { %vm6917_vm15 = vcmp.lt.f32.partialorder %v3340_v45, 0.0004427343  ;;  %v850_v34 = vsel %vm849_vm14, 1, %v4761_v60  ;;  %v851_v37 = vadd.s32 %v845_v19, %v841_v59  ;;  %v6922_v46 = vmul.f32 0.62831855, %v587_v32  ;;  %4178 = vmatmul.msk.f32.gmra.mxu2 %vm3702_vm5, %v3692_v44 }
 0x335   : > { %v4438_v57 = vpop.eup %4437  ;;  %v1187_v41 = vor.u32 %v1186_v55, %v1185_v6  ;;  %v1190_v54 = vshll.u32 %v1189_v5, 23  ;;  %vm831_vm0 = vc.u32 %v829_v42, %v825_v9  ;;  %v852_v56 = vadd.s32 %v850_v34, %v844_v39 }
 0x336   : > { %v3336_v12 = vmul.f32 0.6931472, %v4438_v57  ;;  %v3339_v50 = vmul.f32 %v4436_v48, %v3338_v1  ;;  %v832_v25 = vsel %vm831_vm0, 1, %v4761_v60  ;;  %vm853_vm1 = vc.u32 %v851_v37, %v847_v36 }
 0x337   : > { %v1191_v62 = vor.u32 4788187, %v1190_v54  ;;  %v1194_v16 = vcvt.s32.f32 %v1187_v41  ;;  %v834_v31 = vadd.s32 %v832_v25, %v830_v30  ;;  %v854_v17 = vsel %vm853_vm1, 1, %v4761_v60 }
 0x338   : > { %v3342_v59 = vsel %vm6917_vm15, %v3339_v50, %v3336_v12  ;;  %v848_v19 = vshrl.u32 %v6907_v35, 16  ;;  %v856_v45 = vadd.s32 %v854_v17, %v852_v56  ;;  %v1693_v2 = vand.u32 2139095040, %v6922_v46 }
 0x339   : > { %v3233_v39 = vand.u32 2147483647, %v6895_v14  ;;  %v1192_v9 = vand.u32 2147483647, %v1191_v62  ;;  %v3438_v48 = vadd.f32 %v3342_v59, %v3214_v0  ;;  %v835_v6 = vadd.s32 %v834_v31, %v824_v53 }
 0x33a   : > { %v805_v32 = vsel %vm799_vm9, %v802_v20, %v804_v27  ;;  %v855_v1 = vadd.s32 %v851_v37, %v847_v36  ;;  %v857_v22 = vadd.s32 %v856_v45, %v846_v15  ;;  %v1694_v55 = vshrl.u32 %v1693_v2, 23 }
 0x33b   : > { %v1195_v5 = vmul.f32 %v1194_v16, %v1192_v9  ;;  %v1198_v35 = vsub.s32 4, %v6847_v26  ;;  %v4157_v42 = vadd.f32 -0.6931472, %v3438_v48  ;;  %v836_v30 = vadd.s32 %v835_v6, %v826_v58 }
 0x33c   : > { %vm1076_vm2 = vcmp.lt.s32.totalorder %v6583_v38, 0  ;;  %v858_v21 = vadd.s32 %v857_v22, %v848_v19  ;;  %v4125_v52 = vadd.s32 4294967169, %v1694_v55  ;;  %v3247_v0 = vsub.f32 0.0, %v3231_v24 }
 0x33d   : > { %vm6942_vm3 = vcmp.le.f32.partialorder %v1074_v40, 0.7853982  ;;  %v1196_v20 = vxor.u32 2147483648, %v1195_v5  ;;  %3516 = vmatmul.f32.gmra.mxu1 %v4157_v42  ;;  %v859_v27 = vmul.u32 %v6838_v4, %v805_v32  ;;  %v3248_v58 = vsub.f32 0.0, %v3232_v63 }
 0x33e   : > { %vm861_vm4 = vc.u32 %v836_v30, %v855_v1  ;;  %v862_v15 = vadd.s32 1, %v858_v21  ;;  %v1700_v53 = vadd.s32 1, %v4125_v52  ;;  %v3249_v36 = vsub.f32 0.0, %v3233_v39 }
 0x33f   : > { %v1197_v34 = vsel %vm1076_vm2, %v1196_v20, %v1195_v5  ;;  %v1199_v24 = vsel %vm1076_vm2, %v1198_v35, %v6847_v26  ;;  %v1690_v57 = vand.u32 2147483647, %v6922_v46  ;;  %v3269_v56 = vmul.f32 1.442695, %v3247_v0 }
 0x340   : > { %v1200_v40 = vsel %vm6942_vm3, %v6583_v38, %v1197_v34  ;;  %v863_v37 = vsel %vm861_vm4, %v862_v15, %v858_v21  ;;  %vm1701_vm6 = vcmp.gt.s32.totalorder %v1700_v53, 0  ;;  %v3271_v63 = vmul.f32 1.442695, %v3248_v58 }
 0x341   : > { %v1202_v41 = vmul.f32 %v1200_v40, %v1200_v40  ;;  %v864_v4 = vadd.s32 %v863_v37, %v859_v27  ;;  %v1702_v54 = vsel %vm1701_vm6, %v1700_v53, 0  ;;  %v1201_v12 = vsel %vm6942_vm3, 0, %v1199_v24 }
 0x342   : > { %v3273_v26 = vmul.f32 1.442695, %v3249_v36  ;;  %v1697_v16 = vand.u32 8388607, %v1690_v57  ;;  %v1704_v31 = vand.u32 31, %v1702_v54  ;;  %4439 = vpow2.f32 %v3269_v56 }
 0x343   : > { %v1203_v50 = vmul.f32 -0.001358992, %v1202_v41  ;;  %v1210_v25 = vmul.f32 -0.00019511016, %v1202_v41  ;;  %v865_v62 = vadd.s32 536870912, %v864_v4  ;;  %v1218_v45 = vand.u32 3, %v1201_v12 }
 0x344   : > { %4441 = vpow2.f32 %v3271_v63  ;;  %v3215_v48 = vmax.f32 %v6871_v47, 0.0  ;;  %v3216_v6 = vmax.f32 %v6877_v11, 0.0  ;;  %v6963_v44 = vsub.s32 32, %v1704_v31 }
 0x345   : > { %v1204_v17 = vadd.f32 0.041655596, %v1203_v50  ;;  %v1211_v59 = vadd.f32 0.008332121, %v1210_v25  ;;  %v6958_v19 = vshrl.u32 %v865_v62, 30  ;;  %4443 = vpow2.f32 %v3273_v26 }
 0x346   : > { %v1698_v5 = vor.u32 8388608, %v1697_v16  ;;  %vm1217_vm7 = vweird.f32 %v6583_v38  ;;  %vm1219_vm8 = vcmp.lt.s32.totalorder %v1218_v45, 2  ;;  %vm1220_vm9 = vcmp.eq.s32.totalorder %v1218_v45, 0 }
 0x347   : > { %v1205_v2 = vmul.f32 %v1204_v17, %v1202_v41  ;;  %v1212_v39 = vmul.f32 %v1211_v59, %v1202_v41  ;;  %v867_v9 = vshll.u32 %v6958_v19, 30  ;;  %vm1223_vm10 = vcmp.eq.s32.totalorder %v1218_v45, 2 }
 0x348   : > { %v860_v35 = vadd.s32 %v855_v1, %v836_v30  ;;  %v4440_v0 = vpop.eup %4439  ;;  %v1710_v61 = vshll.u32 %v4757_v10, %v1704_v31  ;;  %v1711_v20 = vshrl.u32 %v4758_v13, %v6963_v44  ;;  %v1713_v27 = vshll.u32 %v4758_v13, %v1704_v31 }
 0x349   : > { %v1206_v32 = vadd.f32 -0.4999988, %v1205_v2  ;;  %v1213_v22 = vadd.f32 -0.16666654, %v1212_v39  ;;  %v6965_v55 = vsub.s32 %v864_v4, %v867_v9  ;;  %v1714_v58 = vshrl.u32 %v4755_v3, %v6963_v44 }
 0x34a   : > { %v6976_v15 = vpop.eup %4441  ;;  %v6979_v36 = vshll.u32 %v1698_v5, 8  ;;  %v6983_v37 = vshrl.u32 %v1702_v54, 5  ;;  %v1720_v13 = vshrl.u32 %v4760_v23, %v6963_v44  ;;  %v1707_v63 = vshll.u32 %v4756_v8, %v1704_v31 }
 0x34b   : > { %v1207_v42 = vmul.f32 %v1206_v32, %v1202_v41  ;;  %v1214_v21 = vmul.f32 %v1213_v22, %v1202_v41  ;;  %vm869_vm11 = vcmp.lt.s32.totalorder %v6965_v55, 0  ;;  %v870_v52 = vsub.s32 0, %v6965_v55  ;;  %v6981_v34 = vpop.eup %4443 }
 0x34c   : > { %v1719_v41 = vshll.u32 %v4759_v18, %v1704_v31  ;;  %v1716_v12 = vshll.u32 %v4755_v3, %v1704_v31  ;;  %v3343_v25 = vadd.f32 1.0, %v4440_v0  ;;  %v6990_v62 = vor.u32 %v1711_v20, %v1710_v61 }
 0x34d   : > { %v1208_v1 = vadd.f32 1.0, %v1207_v42  ;;  %v1215_v30 = vadd.f32 1.0, %v1214_v21  ;;  %v871_v53 = vsel %vm869_vm11, %v870_v52, %v6965_v55  ;;  %v6992_v26 = vor.u32 %v1714_v58, %v1713_v27 }
 0x34e   : > { %v872_v24 = vclz %v871_v53  ;;  %v3346_v17 = vmul.f32 -0.5, %v4440_v0  ;;  %v1717_v59 = vshrl.u32 %v4759_v18, %v6963_v44  ;;  %4445 = vlog2.f32 %v3343_v25 }
 0x34f   : > { %v1216_v4 = vmul.f32 %v1215_v30, %v1200_v40  ;;  %v1224_v56 = vxor.u32 2147483648, %v1208_v1  ;;  %v1721_v23 = vor.u32 %v1720_v13, %v1719_v41  ;;  %vm1722_vm13 = vcmp.lt.s32.totalorder %v6983_v37, 1 }
 0x350   : > { %v4108_v50 = vadd.s32 4294967294, %v872_v24  ;;  %v3349_v31 = vand.u32 2147483647, %v4440_v0  ;;  %vm1725_vm14 = vcmp.lt.s32.totalorder %v6983_v37, 4  ;;  %v3347_v22 = vadd.f32 1.0, %v3346_v17  ;;  %v3693_v17 = vpop.trf.xlu0 }
 0x351   : > { %v1221_v16 = vxor.u32 2147483648, %v1216_v4  ;;  %v1225_v54 = vsel %vm1223_vm10, %v1224_v56, %v1216_v4  ;;  %v1708_v5 = vshrl.u32 %v4757_v10, %v6963_v44  ;;  %v1718_v42 = vor.u32 %v1717_v59, %v1716_v12  ;;  %4179 = vmatmul.msk.f32.gmra.mxu2 %vm3702_vm5, %v3693_v17 }
 0x352   : > { %vm4109_vm12 = vcmp.lt.s32.totalorder %v4108_v50, 0  ;;  %vm1724_vm15 = vcmp.lt.s32.totalorder %v6983_v37, 3  ;;  %vm7007_vm0 = vcmp.lt.f32.partialorder %v3349_v31, 0.0004427343  ;;  %vm1723_vm1 = vcmp.lt.s32.totalorder %v6983_v37, 2 }
 0x353   : > { %v1222_v3 = vsel %vm1220_vm9, %v1208_v1, %v1221_v16  ;;  %v875_v40 = vsel %vm4109_vm12, 0, %v4108_v50  ;;  %v1734_v38 = vsel %vm1722_vm13, %v6990_v62, %v6992_v26  ;;  %v1735_v10 = vsel %vm1725_vm14, %v1721_v23, 1326507024 }
 0x354   : > { %v1226_v2 = vsel %vm1219_vm8, %v1222_v3, %v1225_v54  ;;  %v876_v39 = vsub.s32 32, %v875_v40  ;;  %v877_v9 = vshll.u32 %v6965_v55, %v875_v40  ;;  %v880_v32 = vsub.s32 4294967266, %v875_v40  ;;  %v4446_v55 = vpop.eup %4445 }
 0x355   : > { %v1227_v18 = vsel %vm1217_vm7, nan, %v1226_v2  ;;  %v3352_v58 = vadd.f32 1.0, %v6976_v15  ;;  %v3345_v1 = vmul.f32 0.6931472, %v4446_v55  ;;  %v3348_v30 = vmul.f32 %v4440_v0, %v3347_v22 }
 0x356   : > { %v3079_v21 = vadd.f32 1.0, %v1227_v18  ;;  %v878_v52 = vshrl.u32 %v860_v35, %v876_v39  ;;  %v881_v61 = vadd.s32 127, %v880_v32  ;;  %v3355_v53 = vmul.f32 -0.5, %v6976_v15 }
 0x357   : > { %v1736_v24 = vsel %vm1724_vm15, %v1718_v42, %v1735_v10  ;;  %4447 = vlog2.f32 %v3352_v58  ;;  %vm768_vm2 = vcmp.lt.s32.totalorder %v6651_v51, 0  ;;  %v3351_v56 = vsel %vm7007_vm0, %v3348_v30, %v3345_v1 }
 0x358   : > { %v3095_v20 = vmul.f32 0.5, %v3079_v21  ;;  %v879_v35 = vor.u32 %v878_v52, %v877_v9  ;;  %v882_v27 = vshll.u32 %v881_v61, 23  ;;  %v1737_v4 = vsel %vm1723_vm1, %v1734_v38, %v1736_v24 }
 0x359   : > { %v7027_v12 = vor.u32 %v1708_v5, %v1707_v63  ;;  %v7030_v0 = vand.u32 65535, %v6979_v36  ;;  %v3439_v25 = vadd.f32 %v3351_v56, %v3215_v48  ;;  %v3356_v16 = vadd.f32 1.0, %v3355_v53  ;;  %v7043_v48 = vpop.f32.mrf.mxu0 }
 0x35a   : > { %3567 = vperm.xlu2 %4409, %v3095_v20   ;;  %v883_v41 = vor.u32 4788187, %v882_v27  ;;  %v886_v13 = vcvt.s32.f32 %v879_v35  ;;  %v1731_v54 = vsel %vm1725_vm14, %v1718_v42, 920167782  ;;  %v3361_v59 = vadd.f32 1.0, %v6981_v34 }
 0x35b   : > { %v7038_v23 = vshrl.u32 %v6979_v36, 16  ;;  %v1741_v3 = vand.u32 65535, %v1737_v4  ;;  %v1742_v63 = vshrl.u32 %v1737_v4, 16  ;;  %v4158_v31 = vadd.f32 -0.6931472, %v3439_v25 }
 0x35c   : > { %v884_v50 = vand.u32 2147483647, %v883_v41  ;;  %v3358_v2 = vand.u32 2147483647, %v6976_v15  ;;  %v3364_v47 = vmul.f32 -0.5, %v6981_v34  ;;  %v890_v39 = vsub.s32 4, %v6958_v19 }
 0x35d   : > { %4449 = vlog2.f32 %v3361_v59  ;;  %v1730_v9 = vsel %vm1722_vm13, %v7027_v12, %v6990_v62  ;;  %v1732_v32 = vsel %vm1724_vm15, %v6992_v26, %v1731_v54  ;;  %v4448_v18 = vpop.eup %4447  ;;  %v3217_v22 = vmax.f32 %v6895_v14, 0.0  ;;  %3519 = vmatmul.f32.gmra.mxu1 %v4158_v31 }
 0x35e   : > { %v887_v40 = vmul.f32 %v886_v13, %v884_v50  ;;  %vm7056_vm3 = vcmp.le.f32.partialorder %v766_v7, 0.7853982  ;;  %v3357_v21 = vmul.f32 %v6976_v15, %v3356_v16  ;;  %v3354_v52 = vmul.f32 0.6931472, %v4448_v18 }
 0x35f   : > { %v1743_v61 = vmul.u32 %v1741_v3, %v7030_v0  ;;  %v7063_v45 = vmul.u32 %v1742_v63, %v7030_v0  ;;  %v7066_v38 = vmul.u32 %v1741_v3, %v7038_v23  ;;  %vm3359_vm4 = vcmp.lt.f32.partialorder %v3358_v2, 0.0004427343 }
 0x360   : > { %v888_v42 = vxor.u32 2147483648, %v887_v40  ;;  %v3365_v7 = vadd.f32 1.0, %v3364_v47  ;;  %v1733_v10 = vsel %vm1723_vm1, %v1730_v9, %v1732_v32  ;;  %v891_v15 = vsel %vm768_vm2, %v890_v39, %v6958_v19  ;;  %v3694_v19 = vpop.trf.xlu0 }
 0x361   : > { %v3360_v20 = vsel %vm3359_vm4, %v3357_v21, %v3354_v52  ;;  %v1747_v35 = vshll.u32 %v7063_v45, 16  ;;  %v3367_v1 = vand.u32 2147483647, %v6981_v34  ;;  %v1749_v30 = vshll.u32 %v7066_v38, 16  ;;  %4180 = vmatmul.msk.f32.gmra.mxu2 %vm3702_vm5, %v3694_v19  ;;  %v7093_v3 = vpop.f32.mrf.mxu0 }
 0x362   : > { %v889_v14 = vsel %vm768_vm2, %v888_v42, %v887_v40  ;;  %v3440_v58 = vadd.f32 %v3360_v20, %v3216_v6  ;;  %v1746_v24 = vmul.u32 %v1742_v63, %v7038_v23  ;;  %v1764_v13 = vshrl.u32 %v1733_v10, 16 }
 0x363   : > { %v7078_v55 = vsel %vm7056_vm3, %v6651_v51, %v889_v14  ;;  %v4450_v53 = vpop.eup %4449  ;;  %vm1751_vm6 = vc.u32 %v1743_v61, %v1747_v35  ;;  %v1753_v41 = vadd.s32 %v1747_v35, %v1743_v61  ;;  %v3366_v50 = vmul.f32 %v6981_v34, %v3365_v7 }
 0x364   : > { %v894_v27 = vmul.f32 %v7078_v55, %v7078_v55  ;;  %v1763_v25 = vand.u32 65535, %v1733_v10  ;;  %v4159_v11 = vadd.f32 -0.6931472, %v3440_v58  ;;  %v3363_v6 = vmul.f32 0.6931472, %v4450_v53 }
 0x365   : > { %v1752_v16 = vsel %vm1751_vm6, 1, %v4761_v60  ;;  %vm1755_vm7 = vc.u32 %v1753_v41, %v1749_v30  ;;  %vm3368_vm8 = vcmp.lt.f32.partialorder %v3367_v1, 0.0004427343  ;;  %v893_v59 = vsel %vm7056_vm3, 0, %v891_v15 }
 0x366   : > { %v895_v4 = vmul.f32 -0.001358992, %v894_v27  ;;  %v902_v56 = vmul.f32 -0.00019511016, %v894_v27  ;;  %3522 = vmatmul.f32.gmra.mxu1 %v4159_v11  ;;  %v3369_v63 = vsel %vm3368_vm8, %v3366_v50, %v3363_v6  ;;  %v1754_v40 = vadd.s32 %v1752_v16, %v1746_v24 }
 0x367   : > { %v1766_v31 = vmul.u32 %v1764_v13, %v7030_v0  ;;  %v3441_v47 = vadd.f32 %v3369_v63, %v3217_v22  ;;  %v1756_v39 = vsel %vm1755_vm7, 1, %v4761_v60  ;;  %v1706_v9 = vshrl.u32 %v4756_v8, %v6963_v44 }
 0x368   : > { %v896_v54 = vadd.f32 0.041655596, %v895_v4  ;;  %v903_v17 = vadd.f32 0.008332121, %v902_v56  ;;  %v1765_v32 = vmul.u32 %v1763_v25, %v7030_v0  ;;  %v1767_v18 = vmul.u32 %v1763_v25, %v7038_v23  ;;  %v3695_v14 = vpop.trf.xlu0 }
 0x369   : > { %v1769_v5 = vshll.u32 %v1766_v31, 16  ;;  %v910_v52 = vand.u32 3, %v893_v59  ;;  %v4160_v61 = vadd.f32 -0.6931472, %v3441_v47  ;;  %v1748_v7 = vshrl.u32 %v7063_v45, 16  ;;  %4181 = vmatmul.msk.f32.gmra.mxu2 %vm3702_vm5, %v3695_v14  ;;  %v3194_v24 = vpop.f32.mrf.mxu0 }
 0x36a   : > { %v897_v34 = vmul.f32 %v896_v54, %v894_v27  ;;  %v904_v2 = vmul.f32 %v903_v17, %v894_v27  ;;  %v1758_v10 = vadd.s32 %v1756_v39, %v1754_v40  ;;  %v1771_v15 = vshll.u32 %v1767_v18, 16 }
 0x36b   : > { %v1768_v35 = vmul.u32 %v1764_v13, %v7038_v23  ;;  %v7106_v8 = vadd.f32 %v6867_v28, %v7043_v48  ;;  %v1726_v44 = vsel %vm1722_vm13, %v1706_v9, %v7027_v12  ;;  %vm1773_vm9 = vc.u32 %v1765_v32, %v1769_v5 }
 0x36c   : > { %v898_v42 = vadd.f32 -0.4999988, %v897_v34  ;;  %v905_v21 = vadd.f32 -0.16666654, %v904_v2  ;;  %v1775_v0 = vadd.s32 %v1769_v5, %v1765_v32  ;;  %vm915_vm10 = vcmp.eq.s32.totalorder %v910_v52, 2 }
 0x36d   : > { %v1750_v23 = vshrl.u32 %v7066_v38, 16  ;;  %v1759_v1 = vadd.s32 %v1758_v10, %v1748_v7  ;;  %v1774_v48 = vsel %vm1773_vm9, 1, %v4761_v60  ;;  %v1770_v12 = vshrl.u32 %v1766_v31, 16 }
 0x36e   : > { %v899_v22 = vmul.f32 %v898_v42, %v894_v27  ;;  %v906_v20 = vmul.f32 %v905_v21, %v894_v27  ;;  %v1727_v27 = vsel %vm1725_vm14, %v6992_v26, 2102212464  ;;  %3525 = vmatmul.f32.gmra.mxu1 %v4160_v61  ;;  %vm1777_vm11 = vc.u32 %v1775_v0, %v1771_v15 }
 0x36f   : > { %v1776_v19 = vadd.s32 %v1774_v48, %v1768_v35  ;;  %vm911_vm12 = vcmp.lt.s32.totalorder %v910_v52, 2  ;;  %vm912_vm13 = vcmp.eq.s32.totalorder %v910_v52, 0  ;;  %v1728_v41 = vsel %vm1724_vm15, %v6990_v62, %v1727_v27 }
 0x370   : > { %v900_v58 = vadd.f32 1.0, %v899_v22  ;;  %v907_v45 = vadd.f32 1.0, %v906_v20  ;;  %v1778_v26 = vsel %vm1777_vm11, 1, %v4761_v60  ;;  %v1772_v4 = vshrl.u32 %v1767_v18, 16 }
 0x371   : > { %v1780_v56 = vadd.s32 %v1778_v26, %v1776_v19  ;;  %vm909_vm14 = vweird.f32 %v6651_v51  ;;  %v1779_v50 = vadd.s32 %v1775_v0, %v1771_v15  ;;  %v1729_v11 = vsel %vm1723_vm1, %v1726_v44, %v1728_v41  ;;  %v3197_v34 = vpop.f32.mrf.mxu0 }
 0x372   : > { %v908_v30 = vmul.f32 %v907_v45, %v7078_v55  ;;  %v916_v53 = vxor.u32 2147483648, %v900_v58  ;;  %v1760_v55 = vadd.s32 %v1759_v1, %v1750_v23  ;;  %v3234_v16 = vand.u32 2147483647, %v7106_v8 }
 0x373   : > { %v1781_v6 = vadd.s32 %v1780_v56, %v1770_v12  ;;  %v1783_v59 = vmul.u32 %v6979_v36, %v1729_v11  ;;  %v7130_v31 = vadd.f32 %v6867_v28, %v7093_v3  ;;  %v7134_v9 = vadd.f32 %v6867_v28, %v3194_v24 }
 0x374   : > { %v913_v13 = vxor.u32 2147483648, %v908_v30  ;;  %v917_v38 = vsel %vm915_vm10, %v916_v53, %v908_v30  ;;  %vm1785_vm15 = vc.u32 %v1760_v55, %v1779_v50  ;;  %v3250_v40 = vsub.f32 0.0, %v3234_v16 }
 0x375   : > { %v1782_v60 = vadd.s32 %v1781_v6, %v1772_v4  ;;  %v3235_v39 = vand.u32 2147483647, %v7130_v31  ;;  %v7137_v36 = vadd.f32 %v6867_v28, %v3197_v34  ;;  %v3236_v3 = vand.u32 2147483647, %v7134_v9 }
 0x376   : > { %v914_v25 = vsel %vm912_vm13, %v900_v58, %v913_v13  ;;  %v3275_v47 = vmul.f32 1.442695, %v3250_v40  ;;  %v1784_v27 = vadd.s32 %v1779_v50, %v1760_v55  ;;  %v3218_v55 = vmax.f32 %v7106_v8, 0.0 }
 0x377   : > { %v918_v62 = vsel %vm911_vm12, %v914_v25, %v917_v38  ;;  %v1786_v63 = vadd.s32 1, %v1782_v60  ;;  %v3251_v5 = vsub.f32 0.0, %v3235_v39  ;;  %v3237_v21 = vand.u32 2147483647, %v7137_v36 }
 0x378   : > { %v919_v54 = vsel %vm909_vm14, nan, %v918_v62  ;;  %4451 = vpow2.f32 %v3275_v47  ;;  %v3252_v14 = vsub.f32 0.0, %v3236_v3  ;;  %v3696_v47 = vpop.trf.xlu0  ;;  %vm1692_vm3 = vcmp.lt.s32.totalorder %v6922_v46, 0 }
 0x379   : > { %v3077_v17 = vadd.f32 1.0, %v919_v54  ;;  %v1787_v37 = vsel %vm1785_vm15, %v1786_v63, %v1782_v60  ;;  %v3277_v61 = vmul.f32 1.442695, %v3251_v5  ;;  %v3253_v10 = vsub.f32 0.0, %v3237_v21  ;;  %v3200_v63 = vpop.f32.mrf.mxu0  ;;  %4182 = vmatmul.msk.f32.gmra.mxu2 %vm3702_vm5, %v3696_v47 }
 0x37a   : > { %v1788_v2 = vadd.s32 %v1787_v37, %v1783_v59  ;;  %v3279_v35 = vmul.f32 1.442695, %v3252_v14  ;;  %v7149_v59 = vpop.permute.xlu1 %3627  ;;  %v7154_v34 = vadd.f32 %v6867_v28, %v3200_v63  ;;  %vm7163_vm4 = vcmp.le.f32.partialorder %v1690_v57, 0.7853982 }
 0x37b   : > { %v3093_v51 = vmul.f32 0.5, %v3077_v17  ;;  %4453 = vpow2.f32 %v3277_v61  ;;  %v3281_v44 = vmul.f32 1.442695, %v3253_v10  ;;  %vm1833_vm12 = vweird.f32 %v6922_v46 }
 0x37c   : > { %v1789_v32 = vadd.s32 536870912, %v1788_v2  ;;  %v3238_v61 = vand.u32 2147483647, %v7154_v34 }
 0x37d   : > { %3557 = vperm.xlu2 %4409, %v3093_v51  }
 0x37e   : > { %v7139_v18 = vshrl.u32 %v1789_v32, 30  ;;  %v4452_v15 = vpop.eup %4451  ;;  %v7156_v32 = vpop.permute.xlu2 %3617  ;;  %v3254_v57 = vsub.f32 0.0, %v3238_v61 }
 0x37f   : > { %v3370_v58 = vadd.f32 1.0, %v4452_v15  ;;  %v3373_v45 = vmul.f32 -0.5, %v4452_v15  ;;  %v3376_v41 = vand.u32 2147483647, %v4452_v15 }
 0x380   : > { %v1791_v42 = vshll.u32 %v7139_v18, 30 }
 0x381   : > { %4455 = vlog2.f32 %v3370_v58  ;;  %v4454_v53 = vpop.eup %4453  ;;  %v3374_v12 = vadd.f32 1.0, %v3373_v45  ;;  %vm3377_vm2 = vcmp.lt.f32.partialorder %v3376_v41, 0.0004427343  ;;  %v3283_v58 = vmul.f32 1.442695, %v3254_v57 }
 0x382   : > { %v1792_v52 = vsub.s32 %v1788_v2, %v1791_v42  ;;  %4457 = vpow2.f32 %v3279_v35  ;;  %v3379_v4 = vadd.f32 1.0, %v4454_v53  ;;  %v3382_v11 = vmul.f32 -0.5, %v4454_v53 }
 0x383   : > { %4459 = vpow2.f32 %v3281_v44  ;;  %v3375_v25 = vmul.f32 %v4452_v15, %v3374_v12  ;;  %v3385_v39 = vand.u32 2147483647, %v4454_v53  ;;  %v3219_v15 = vmax.f32 %v7130_v31, 0.0 }
 0x384   : > { %vm1793_vm0 = vcmp.lt.s32.totalorder %v1792_v52, 0  ;;  %v1794_v7 = vsub.s32 0, %v1792_v52  ;;  %4461 = vlog2.f32 %v3379_v4  ;;  %v3383_v40 = vadd.f32 1.0, %v3382_v11 }
 0x385   : > { %vm3386_vm6 = vcmp.lt.f32.partialorder %v3385_v39, 0.0004427343 }
 0x386   : > { %v1795_v22 = vsel %vm1793_vm0, %v1794_v7, %v1792_v52  ;;  %v3384_v7 = vmul.f32 %v4454_v53, %v3383_v40  ;;  %v7193_v41 = vpop.permute.xlu2 %3612 }
 0x387   : > { %v1796_v20 = vclz %v1795_v22  ;;  %v4456_v26 = vpop.eup %4455 }
 0x388   : > { %v7144_v56 = vpop.eup %4457  ;;  %v3372_v50 = vmul.f32 0.6931472, %v4456_v26 }
 0x389   : > { %v4126_v0 = vadd.s32 4294967294, %v1796_v20  ;;  %v7147_v6 = vpop.eup %4459  ;;  %v3388_v51 = vadd.f32 1.0, %v7144_v56  ;;  %v3391_v5 = vmul.f32 -0.5, %v7144_v56  ;;  %v3394_v10 = vand.u32 2147483647, %v7144_v56 }
 0x38a   : > { %v3378_v54 = vsel %vm3377_vm2, %v3375_v25, %v3372_v50  ;;  %v3397_v8 = vadd.f32 1.0, %v7147_v6  ;;  %v4462_v3 = vpop.eup %4461  ;;  %v3403_v4 = vand.u32 2147483647, %v7147_v6 }
 0x38b   : > { %vm4127_vm1 = vcmp.lt.s32.totalorder %v4126_v0, 0  ;;  %v3442_v17 = vadd.f32 %v3378_v54, %v3218_v55  ;;  %4463 = vlog2.f32 %v3388_v51  ;;  %v3381_v14 = vmul.f32 0.6931472, %v4462_v3 }
 0x38c   : > { %v1799_v23 = vsel %vm4127_vm1, 0, %v4126_v0  ;;  %4465 = vlog2.f32 %v3397_v8  ;;  %v3392_v44 = vadd.f32 1.0, %v3391_v5  ;;  %vm7186_vm7 = vcmp.lt.f32.partialorder %v3394_v10, 0.0004427343 }
 0x38d   : > { %v1800_v1 = vsub.s32 32, %v1799_v23  ;;  %v1801_v48 = vshll.u32 %v1792_v52, %v1799_v23  ;;  %v1804_v30 = vsub.s32 4294967266, %v1799_v23  ;;  %v4161_v2 = vadd.f32 -0.6931472, %v3442_v17 }
 0x38e   : > { %v1814_v52 = vsub.s32 4, %v7139_v18  ;;  %v3387_v35 = vsel %vm3386_vm6, %v3384_v7, %v3381_v14  ;;  %4467 = vpow2.f32 %v3283_v58  ;;  %v3220_v55 = vmax.f32 %v7134_v9, 0.0  ;;  %v7216_v10 = vpop.permute.xlu2 %3602 }
 0x38f   : > { %v1802_v19 = vshrl.u32 %v1784_v27, %v1800_v1  ;;  %v1805_v24 = vadd.s32 127, %v1804_v30  ;;  %3528 = vmatmul.f32.gmra.mxu1 %v4161_v2  ;;  %v3443_v45 = vadd.f32 %v3387_v35, %v3219_v15  ;;  %v3400_v27 = vmul.f32 -0.5, %v7147_v6  ;;  %v7184_v1 = vpop.permute.xlu1 %3622 }
 0x390   : > { %v1815_v23 = vsel %vm1692_vm3, %v1814_v52, %v7139_v18  ;;  %vm7205_vm8 = vcmp.lt.f32.partialorder %v3403_v4, 0.0004427343  ;;  %v3221_v15 = vmax.f32 %v7137_v36, 0.0 }
 0x391   : > { %v1803_v13 = vor.u32 %v1802_v19, %v1801_v48  ;;  %v1806_v38 = vshll.u32 %v1805_v24, 23  ;;  %v4464_v31 = vpop.eup %4463  ;;  %v3203_v48 = vpop.f32.mrf.mxu0  ;;  %v3401_v11 = vadd.f32 1.0, %v3400_v27 }
 0x392   : > { %v7191_v19 = vadd.f32 %v6867_v28, %v3203_v48  ;;  %v3697_v24 = vpop.trf.xlu0  ;;  %v4466_v26 = vpop.eup %4465  ;;  %v3390_v18 = vmul.f32 0.6931472, %v4464_v31 }
 0x393   : > { %v1807_v16 = vor.u32 4788187, %v1806_v38  ;;  %v1810_v62 = vcvt.s32.f32 %v1803_v13  ;;  %v4162_v13 = vadd.f32 -0.6931472, %v3443_v45  ;;  %4183 = vmatmul.msk.f32.gmra.mxu2 %vm3702_vm5, %v3697_v24  ;;  %v3393_v38 = vmul.f32 %v7144_v56, %v3392_v44 }
 0x394   : > { %v3399_v56 = vmul.f32 0.6931472, %v4466_v26  ;;  %v4468_v51 = vpop.eup %4467 }
 0x395   : > { %v1808_v60 = vand.u32 2147483647, %v1807_v16  ;;  %v1817_v16 = vsel %vm7163_vm4, 0, %v1815_v23  ;;  %v3396_v54 = vsel %vm7186_vm7, %v3393_v38, %v3390_v18  ;;  %v3409_v44 = vmul.f32 -0.5, %v4468_v51 }
 0x396   : > { %v3444_v63 = vadd.f32 %v3396_v54, %v3220_v55  ;;  %v1834_v47 = vand.u32 3, %v1817_v16  ;;  %v3412_v24 = vand.u32 2147483647, %v4468_v51  ;;  %v7229_v4 = vpop.permute.xlu2 %3592 }
 0x397   : > { %v1811_v37 = vmul.f32 %v1810_v62, %v1808_v60  ;;  %v3239_v62 = vand.u32 2147483647, %v7191_v19  ;;  %3531 = vmatmul.f32.gmra.mxu1 %v4162_v13  ;;  %v7209_v5 = vpop.permute.xlu1 %3607  ;;  %v3410_v48 = vadd.f32 1.0, %v3409_v44 }
 0x398   : > { %v4163_v42 = vadd.f32 -0.6931472, %v3444_v63  ;;  %vm1839_vm9 = vcmp.eq.s32.totalorder %v1834_v47, 2  ;;  %vm1835_vm10 = vcmp.lt.s32.totalorder %v1834_v47, 2  ;;  %vm1836_vm11 = vcmp.eq.s32.totalorder %v1834_v47, 0 }
 0x399   : > { %v1812_v21 = vxor.u32 2147483648, %v1811_v37  ;;  %v3255_v40 = vsub.f32 0.0, %v3239_v62  ;;  %v3206_v3 = vpop.f32.mrf.mxu0  ;;  %v3222_v62 = vmax.f32 %v7154_v34, 0.0  ;;  %vm3413_vm13 = vcmp.lt.f32.partialorder %v3412_v24, 0.0004427343 }
 0x39a   : > { %v7212_v14 = vadd.f32 %v6867_v28, %v3206_v3  ;;  %v3698_v7 = vpop.trf.xlu0 }
 0x39b   : > { %v1813_v22 = vsel %vm1692_vm3, %v1812_v21, %v1811_v37  ;;  %v3402_v37 = vmul.f32 %v7147_v6, %v3401_v11  ;;  %v3285_v39 = vmul.f32 1.442695, %v3255_v40  ;;  %v3406_v21 = vadd.f32 1.0, %v4468_v51  ;;  %4184 = vmatmul.msk.f32.gmra.mxu2 %vm3702_vm5, %v3698_v7 }
 0x39c   : > { %v7176_v20 = vsel %vm7163_vm4, %v6922_v46, %v1813_v22  ;;  %v3240_v35 = vand.u32 2147483647, %v7212_v14  ;;  %v3411_v11 = vmul.f32 %v4468_v51, %v3410_v48 }
 0x39d   : > { %v1818_v0 = vmul.f32 %v7176_v20, %v7176_v20  ;;  %v3405_v6 = vsel %vm7205_vm8, %v3402_v37, %v3399_v56  ;;  %4469 = vpow2.f32 %v3285_v39 }
 0x39e   : > { %v3445_v28 = vadd.f32 %v3405_v6, %v3221_v15  ;;  %4471 = vlog2.f32 %v3406_v21  ;;  %v3256_v27 = vsub.f32 0.0, %v3240_v35  ;;  %v3223_v21 = vmax.f32 %v7191_v19, 0.0 }
 0x39f   : > { %v1819_v53 = vmul.f32 -0.001358992, %v1818_v0  ;;  %v1826_v12 = vmul.f32 -0.00019511016, %v1818_v0  ;;  %3534 = vmatmul.f32.gmra.mxu1 %v4163_v42 }
 0x3a0   : > { %v3287_v23 = vmul.f32 1.442695, %v3256_v27  ;;  %v3224_v27 = vmax.f32 %v7212_v14, 0.0 }
 0x3a1   : > { %v1820_v50 = vadd.f32 0.041655596, %v1819_v53  ;;  %v1827_v25 = vadd.f32 0.008332121, %v1826_v12  ;;  %v7225_v53 = vpop.permute.xlu1 %3597  ;;  %v4164_v12 = vadd.f32 -0.6931472, %v3445_v28 }
 0x3a2   : > { %4473 = vpow2.f32 %v3287_v23  ;;  %v3699_v13 = vpop.trf.xlu0 }
 0x3a3   : > { %v1821_v60 = vmul.f32 %v1820_v50, %v1818_v0  ;;  %v1828_v17 = vmul.f32 %v1827_v25, %v1818_v0  ;;  %v4470_v30 = vpop.eup %4469  ;;  %4185 = vmatmul.msk.f32.gmra.mxu2 %vm3702_vm5, %v3699_v13  ;;  %v7231_v50 = vpop.f32.mrf.mxu2 }
 0x3a4   : > { %v3415_v18 = vadd.f32 1.0, %v4470_v30  ;;  %v3418_v55 = vmul.f32 -0.5, %v4470_v30 }
 0x3a5   : > { %v1822_v8 = vadd.f32 -0.4999988, %v1821_v60  ;;  %v1829_v9 = vadd.f32 -0.16666654, %v1828_v17 }
 0x3a6   : > { %4475 = vlog2.f32 %v3415_v18  ;;  %v3419_v56 = vadd.f32 1.0, %v3418_v55 }
 0x3a7   : > { %v1823_v52 = vmul.f32 %v1822_v8, %v1818_v0  ;;  %v1830_v61 = vmul.f32 %v1829_v9, %v1818_v0  ;;  %v7221_v0 = vpop.f32.mrf.mxu1  ;;  %3537 = vmatmul.f32.gmra.mxu1 %v4164_v12  ;;  %v3421_v8 = vand.u32 2147483647, %v4470_v30 }
 0x3a8   : > { %v3420_v3 = vmul.f32 %v4470_v30, %v3419_v56 }
 0x3a9   : > { %v1824_v22 = vadd.f32 1.0, %v1823_v52  ;;  %v1831_v57 = vadd.f32 1.0, %v1830_v61  ;;  %v7234_v9 = vpop.permute.xlu1 %3582  ;;  %vm3422_vm14 = vcmp.lt.f32.partialorder %v3421_v8, 0.0004427343  ;;  %v3578_v61 = vpop.permute.xlu2 %3577 }
 0x3aa   : > { %v3700_v51 = vpop.trf.xlu0 }
 0x3ab   : > { %v1832_v58 = vmul.f32 %v1831_v57, %v7176_v20  ;;  %v1840_v45 = vxor.u32 2147483648, %v1824_v22  ;;  %v4472_v20 = vpop.eup %4471  ;;  %4186 = vmatmul.msk.f32.gmra.mxu2 %vm3702_vm5, %v3700_v51  ;;  %v3771_v42 = vpop.f32.mrf.mxu2 }
 0x3ac   : > { %v3408_v46 = vmul.f32 0.6931472, %v4472_v20  ;;  %v4474_v40 = vpop.eup %4473 }
 0x3ad   : > { %v1837_v36 = vxor.u32 2147483648, %v1832_v58  ;;  %v1841_v31 = vsel %vm1839_vm9, %v1840_v45, %v1832_v58  ;;  %v3424_v2 = vadd.f32 1.0, %v4474_v40  ;;  %v4476_v47 = vpop.eup %4475  ;;  %v3427_v39 = vmul.f32 -0.5, %v4474_v40 }
 0x3ae   : > { %v3414_v60 = vsel %vm3413_vm13, %v3411_v11, %v3408_v46  ;;  %v3417_v34 = vmul.f32 0.6931472, %v4476_v47 }
 0x3af   : > { %v1838_v26 = vsel %vm1836_vm11, %v1824_v22, %v1837_v36  ;;  %v3505_v54 = vpop.f32.mrf.mxu1  ;;  %v3446_v63 = vadd.f32 %v3414_v60, %v3222_v62  ;;  %4477 = vlog2.f32 %v3424_v2  ;;  %v3428_v15 = vadd.f32 1.0, %v3427_v39 }
 0x3b0   : > { %v1842_v38 = vsel %vm1835_vm10, %v1838_v26, %v1841_v31  ;;  %v3423_v52 = vsel %vm3422_vm14, %v3420_v3, %v3417_v34  ;;  %v3430_v22 = vand.u32 2147483647, %v4474_v40  ;;  %v7243_v31 = vld [vmem:[%s7322_s8] ss:$0 sm:$0xff] }
 0x3b1   : > { %v1843_v25 = vsel %vm1833_vm12, nan, %v1842_v38  ;;  %v4165_v37 = vadd.f32 -0.6931472, %v3446_v63  ;;  %v3447_v6 = vadd.f32 %v3423_v52, %v3223_v21  ;;  %v3573_v35 = vpop.permute.xlu1 %3572  ;;  %v3429_v45 = vmul.f32 %v4474_v40, %v3428_v15 }
 0x3b2   : > { %v3083_v16 = vadd.f32 1.0, %v1843_v25  ;;  %v3701_v28 = vpop.trf.xlu0  ;;  %vm3431_vm15 = vcmp.lt.f32.partialorder %v3430_v22, 0.0004427343  ;;  %v3503_v46 = vadd.f32 %v7243_v31, %v7221_v0  ;;  %v3506_v56 = vadd.f32 %v7243_v31, %v3505_v54 }
 0x3b3   : > { %3540 = vmatmul.f32.gmra.mxu1 %v4165_v37  ;;  %v4166_v44 = vadd.f32 -0.6931472, %v3447_v6  ;;  %4187 = vmatmul.msk.f32.gmra.mxu2 %vm3702_vm5, %v3701_v28  ;;  %v3774_v19 = vpop.f32.mrf.mxu2 }
 0x3b4   : > { %v3099_v17 = vmul.f32 0.5, %v3083_v16  ;;  %v3568_v24 = vpop.permute.xlu2 %3567 }
 0x3b5   : > { %v4478_v57 = vpop.eup %4477 }
 0x3b6   : > { %3587 = vperm.xlu0 %4410, %v3099_v17   ;;  %v3426_v58 = vmul.f32 0.6931472, %v4478_v57 }
 0x3b7   : > { %v3508_v7 = vpop.f32.mrf.mxu1 }
 0x3b8   : > { %v3432_v36 = vsel %vm3431_vm15, %v3429_v45, %v3426_v58  ;;  %v3509_v30 = vadd.f32 %v7243_v31, %v3508_v7 }
 0x3b9   : > { %v3448_v23 = vadd.f32 %v3432_v36, %v3224_v27  ;;  %v3563_v14 = vpop.permute.xlu1 %3562 }
 0x3ba   : > { %v3632_v18 = vmul.f32 %v3563_v14, %v3509_v30 }
 0x3bb   : > { %3543 = vmatmul.f32.gmra.mxu1 %v4166_v44  ;;  %v4167_v13 = vadd.f32 -0.6931472, %v3448_v23  ;;  %v3777_v20 = vpop.f32.mrf.mxu2 }
 0x3bc   : > { %v7247_v38 = vmul.f32 %v3774_v19, %v3632_v18 }
 0x3bf   : > { %v3511_v48 = vpop.f32.mrf.mxu1 }
 0x3c0   : > { %v3512_v12 = vadd.f32 %v7243_v31, %v3511_v48 }
 0x3c1   : > { %v3553_v62 = vpop.permute.xlu1 %3552 }
 0x3c2   : > { %v3633_v26 = vmul.f32 %v3568_v24, %v3512_v12  ;;  %v3630_v60 = vmul.f32 %v3553_v62, %v3503_v46 }
 0x3c3   : > { %3546 = vmatmul.f32.gmra.mxu1 %v4167_v13  ;;  %v3780_v17 = vpop.f32.mrf.mxu2 }
 0x3c4   : > { %v7249_v55 = vmul.f32 %v3777_v20, %v3633_v26  ;;  %v7255_v63 = vmul.f32 %v7231_v50, %v3630_v60 }
 0x3c7   : > { %v3514_v25 = vpop.f32.mrf.mxu1 }
 0x3c8   : > { %v3515_v11 = vadd.f32 %v7243_v31, %v3514_v25 }
 0x3ca   : > { %v3634_v16 = vmul.f32 %v3573_v35, %v3515_v11 }
 0x3cb   : > { %v3783_v39 = vpop.f32.mrf.mxu2 }
 0x3cc   : > { %v7258_v40 = vmul.f32 %v3780_v17, %v3634_v16 }
 0x3cf   : > { %v3517_v8 = vpop.f32.mrf.mxu1 }
 0x3d0   : > { %v3518_v37 = vadd.f32 %v7243_v31, %v3517_v8 }
 0x3d2   : > { %v3635_v51 = vmul.f32 %v3578_v61, %v3518_v37 }
 0x3d3   : > { %v3786_v52 = vpop.f32.mrf.mxu2 }
 0x3d4   : > { %v3821_v34 = vmul.f32 %v3783_v39, %v3635_v51 }
 0x3d7   : > { %v3558_v2 = vpop.permute.xlu2 %3557 }
 0x3d8   : > { %v3631_v47 = vmul.f32 %v3558_v2, %v3506_v56 }
 0x3da   : > { %v7261_v0 = vmul.f32 %v3771_v42, %v3631_v47  ;;  %v3520_v3 = vpop.f32.mrf.mxu1 }
 0x3db   : > { %v3521_v21 = vadd.f32 %v7243_v31, %v3520_v3  ;;  %v3789_v6 = vpop.f32.mrf.mxu2 }
 0x3dd   : > { %v3636_v50 = vmul.f32 %v7234_v9, %v3521_v21 }
 0x3df   : > { %v3822_v7 = vmul.f32 %v3786_v52, %v3636_v50 }
 0x3e3   : > { %v3523_v54 = vpop.f32.mrf.mxu1 }
 0x3e4   : > { %v3792_v35 = vpop.f32.mrf.mxu2  ;;  %v3524_v45 = vadd.f32 %v7243_v31, %v3523_v54 }
 0x3eb   : > { %v3526_v15 = vpop.f32.mrf.mxu1 }
 0x3ec   : > { %v3527_v22 = vadd.f32 %v7243_v31, %v3526_v15  ;;  %v3795_v44 = vpop.f32.mrf.mxu2 }
 0x3ee   : > { %v3638_v57 = vmul.f32 %v7229_v4, %v3527_v22 }
 0x3f0   : > { %v3824_v61 = vmul.f32 %v3792_v35, %v3638_v57 }
 0x3fc   : > { %v3798_v58 = vpop.f32.mrf.mxu2 }
 0x40c   : > { %v3529_v42 = vpop.f32.mrf.mxu1 }
 0x40d   : > { %v3530_v2 = vadd.f32 %v7243_v31, %v3529_v42 }
 0x414   : > { %v3532_v28 = vpop.f32.mrf.mxu1 }
 0x415   : > { %v3533_v56 = vadd.f32 %v7243_v31, %v3532_v28 }
 0x416   : > { %v3801_v36 = vpop.f32.mrf.mxu2 }
 0x41c   : > { %v3535_v27 = vpop.f32.mrf.mxu1 }
 0x41d   : > { %v3536_v62 = vadd.f32 %v7243_v31, %v3535_v27 }
 0x41e   : > { %v3804_v30 = vpop.f32.mrf.mxu2 }
 0x41f   : > { %v3641_v47 = vmul.f32 %v7209_v5, %v3536_v62  ;;  %v4414_v5 = vld [vmem:[%s442_s5 + $0x1] ss:$0 sm:$0xff] }
 0x420   : > { %vm3833_vm5 = vcmp.eq.s32.totalorder %v4971_v29, %v4414_v5  ;;  %vm3834_vm0 = vcmp.eq.s32.totalorder %v4977_v33, %v4414_v5  ;;  %vm3835_vm1 = vcmp.eq.s32.totalorder %v4984_v43, %v4414_v5  ;;  %vm3836_vm2 = vcmp.eq.s32.totalorder %v4989_v49, %v4414_v5  ;;  %v3848_v33 = vld [vmem:[#allocation3 + $0x10] sm:$0xff] }
 0x421   : > { %v3827_v39 = vmul.f32 %v3801_v36, %v3641_v47 }
 0x424   : > { %v3538_v48 = vpop.f32.mrf.mxu1 }
 0x425   : > { %v3539_v46 = vadd.f32 %v7243_v31, %v3538_v48 }
 0x426   : > { %v3807_v24 = vpop.f32.mrf.mxu2 }
 0x427   : > { %v3642_v8 = vmul.f32 %v7193_v41, %v3539_v46 }
 0x428   : > { %v3588_v19 = vpop.permute.xlu0 %3587 }
 0x429   : > { %v3637_v9 = vmul.f32 %v3588_v19, %v3524_v45 }
 0x42b   : > { %v3823_v23 = vmul.f32 %v3789_v6, %v3637_v9 }
 0x42e   : > { %v3810_v14 = vpop.f32.mrf.mxu2 }
 0x430   : > { %v3541_v12 = vpop.f32.mrf.mxu1 }
 0x431   : > { %v3542_v18 = vadd.f32 %v7243_v31, %v3541_v12 }
 0x433   : > { %v3643_v60 = vmul.f32 %v7156_v32, %v3542_v18  ;;  %v3639_v32 = vmul.f32 %v7225_v53, %v3530_v2  ;;  %v3845_v53 = vld [vmem:[#allocation3] sm:$0xff] }
 0x435   : > { %v3829_v51 = vmul.f32 %v3807_v24, %v3643_v60  ;;  %v3825_v41 = vmul.f32 %v3795_v44, %v3639_v32 }
 0x436   : > { %v3813_v25 = vpop.f32.mrf.mxu2 }
 0x438   : > { %v3544_v26 = vpop.f32.mrf.mxu1 }
 0x439   : > { %v3545_v4 = vadd.f32 %v7243_v31, %v3544_v26 }
 0x43b   : > { %v3644_v11 = vmul.f32 %v7184_v1, %v3545_v4  ;;  %v3640_v1 = vmul.f32 %v7216_v10, %v3533_v56  ;;  %v4762_v10 = vmov 1.0  }
 0x43d   : > { %v3830_v37 = vmul.f32 %v3810_v14, %v3644_v11  ;;  %v3826_v3 = vmul.f32 %v3798_v58, %v3640_v1 }
 0x440   : > { %v3547_v13 = vpop.f32.mrf.mxu1 }
 0x441   : > { %v3548_v20 = vadd.f32 %v7243_v31, %v3547_v13 }
 0x443   : > { %v3645_v16 = vmul.f32 %v7149_v59, %v3548_v20  ;;  %v3828_v59 = vmul.f32 %v3804_v30, %v3642_v8 }
 0x445   : > { %v3831_v17 = vmul.f32 %v3813_v25, %v3645_v16 }
 0x447   : > { %3849 = vmatpush.msra.mxu3 %v3831_v17 }
 0x449   : > { %3850 = vmatpush.msra.mxu3 %v3830_v37 }
 0x44b   : > { %3851 = vmatpush.msra.mxu3 %v3829_v51 }
 0x44d   : > { %3852 = vmatpush.msra.mxu3 %v3828_v59 }
 0x44f   : > { %3853 = vmatpush.msra.mxu3 %v3827_v39 }
 0x451   : > { %3854 = vmatpush.msra.mxu3 %v3826_v3 }
 0x453   : > { %3855 = vmatpush.msra.mxu3 %v3825_v41 }
 0x455   : > { %3856 = vmatpush.msra.mxu3 %v3824_v61 }
 0x457   : > { %3857 = vmatpush.msra.mxu3 %v3823_v23 }
 0x459   : > { %3858 = vmatpush.msra.mxu3 %v3822_v7 }
 0x45b   : > { %3859 = vmatpush.msra.mxu3 %v3821_v34 }
 0x45d   : > { %3860 = vmatpush.msra.mxu3 %v7258_v40 }
 0x45f   : > { %3861 = vmatpush.msra.mxu3 %v7249_v55  ;;  %v3846_v55 = vld [vmem:[#allocation3 + $0x18] sm:$0xff] }
 0x461   : > { %3862 = vmatpush.msra.mxu3 %v7247_v38 }
 0x463   : > { %3863 = vmatpush.msra.mxu3 %v7261_v0 }
 0x465   : > { %3864 = vmatpush.msra.mxu3 %v7255_v63  ;;  %v3847_v63 = vld [vmem:[#allocation3 + $0x8] sm:$0xff] }
 0x466   : > { %4192 = vmatmul.msk.f32.vlgmr.msra.gmra.mxu3 %vm3833_vm5, %v4762_v10 }
 0x46e   : > { %4193 = vmatmul.msk.f32.gmra.mxu3 %vm3834_vm0, %v4762_v10 }
 0x476   : > { %4194 = vmatmul.msk.f32.gmra.mxu3 %vm3835_vm1, %v4762_v10 }
 0x47e   : > { %4195 = vmatmul.msk.f32.gmra.mxu3 %vm3836_vm2, %v4762_v10 }
 0x4e9   : > { %v3866_v31 = vpop.f32.mrf.mxu3 }
 0x4ea   : > { %v3878_v38 = vadd.f32 %v3866_v31, %v3845_v53 }
 0x4ec   : > { %3882 = vst [vmem:[#allocation3] sm:$0xff] %v3878_v38 }
 0x4f1   : > { %v3869_v40 = vpop.f32.mrf.mxu3 }
 0x4f2   : > { %v3879_v29 = vadd.f32 %v3869_v40, %v3846_v55 }
 0x4f4   : > { %3883 = vst [vmem:[#allocation3 + $0x18] sm:$0xff] %v3879_v29 }
 0x4f9   : > { %v3872_v0 = vpop.f32.mrf.mxu3 }
 0x4fa   : > { %v3880_v34 = vadd.f32 %v3872_v0, %v3847_v63 }
 0x4fc   : > { %3884 = vst [vmem:[#allocation3 + $0x8] sm:$0xff] %v3880_v34 }
 0x500   : > { %3889 = sbr.rel (%p4196_p1) target bundleno = 1453 (0x5ad), region = 96 }
 0x501   : > { %v3875_v21 = vpop.f32.mrf.mxu3 }
 0x502   : > { %v3881_v50 = vadd.f32 %v3875_v21, %v3848_v33 }
 0x504   : > { %3885 = vst [vmem:[#allocation3 + $0x10] sm:$0xff] %v3881_v50 }
 0x505   : > { %v3909_v43 = vld [vmem:[#allocation13 + $0x78] sm:$0xff]  ;;  %v3908_v49 = vld [vmem:[#allocation13 + $0x70] sm:$0xff]  ;;  %v3907_v52 = vld [vmem:[#allocation13 + $0x68] sm:$0xff] }
 0x506   : > { %4250 = vmatpush.msra.mxu2 %v3909_v43  ;;  %4251 = vmatpush.msra.mxu3 %v3909_v43  ;;  %v3906_v7 = vld [vmem:[#allocation13 + $0x60] sm:$0xff]  ;;  %v3905_v54 = vld [vmem:[#allocation13 + $0x58] sm:$0xff]  ;;  %v3904_v6 = vld [vmem:[#allocation13 + $0x50] sm:$0xff] }
 0x507   : > { %3914 = vmatpush.msra.mxu0 %v3909_v43  ;;  %4249 = vmatpush.msra.mxu1 %v3909_v43  ;;  %v3903_v15 = vld [vmem:[#allocation13 + $0x48] sm:$0xff]  ;;  %v3902_v22 = vld [vmem:[#allocation13 + $0x40] sm:$0xff]  ;;  %v3901_v57 = vld [vmem:[#allocation13 + $0x38] sm:$0xff] }
 0x508   : > { %4253 = vmatpush.msra.mxu2 %v3908_v49  ;;  %4254 = vmatpush.msra.mxu3 %v3908_v49  ;;  %v3900_v35 = vld [vmem:[#allocation13 + $0x30] sm:$0xff]  ;;  %v3899_v61 = vld [vmem:[#allocation13 + $0x28] sm:$0xff]  ;;  %v3898_v42 = vld [vmem:[#allocation13 + $0x20] sm:$0xff] }
 0x509   : > { %3915 = vmatpush.msra.mxu0 %v3908_v49  ;;  %4252 = vmatpush.msra.mxu1 %v3908_v49  ;;  %v3897_v44 = vld [vmem:[#allocation13 + $0x18] sm:$0xff]  ;;  %v3896_v28 = vld [vmem:[#allocation13 + $0x10] sm:$0xff]  ;;  %v3895_v58 = vld [vmem:[#allocation13 + $0x8] sm:$0xff] }
 0x50a   : > { %4256 = vmatpush.msra.mxu2 %v3907_v52  ;;  %4257 = vmatpush.msra.mxu3 %v3907_v52  ;;  %v3894_v45 = vld [vmem:[#allocation13] sm:$0xff]  ;;  %v3891_v36 = vld [vmem:[#allocation3 + $0x18] sm:$0xff]  ;;  %v4481_v23 = vld [vmem:[%s7324_s10] ss:$0 sm:$0xff] }
 0x50b   : > { %3916 = vmatpush.msra.mxu0 %v3907_v52  ;;  %4255 = vmatpush.msra.mxu1 %v3907_v52  ;;  %v3892_v27 = vld [vmem:[#allocation3 + $0x8] sm:$0xff]  ;;  %v3893_v19 = vld [vmem:[#allocation3 + $0x10] sm:$0xff]  ;;  %v3890_v9 = vld [vmem:[#allocation3] sm:$0xff] }
 0x50c   : > { %4259 = vmatpush.msra.mxu2 %v3906_v7  ;;  %4260 = vmatpush.msra.mxu3 %v3906_v7 }
 0x50d   : > { %3917 = vmatpush.msra.mxu0 %v3906_v7  ;;  %4258 = vmatpush.msra.mxu1 %v3906_v7 }
 0x50e   : > { %4262 = vmatpush.msra.mxu2 %v3905_v54  ;;  %4263 = vmatpush.msra.mxu3 %v3905_v54 }
 0x50f   : > { %3918 = vmatpush.msra.mxu0 %v3905_v54  ;;  %4261 = vmatpush.msra.mxu1 %v3905_v54 }
 0x510   : > { %4265 = vmatpush.msra.mxu2 %v3904_v6  ;;  %4266 = vmatpush.msra.mxu3 %v3904_v6 }
 0x511   : > { %3919 = vmatpush.msra.mxu0 %v3904_v6  ;;  %4264 = vmatpush.msra.mxu1 %v3904_v6 }
 0x512   : > { %4268 = vmatpush.msra.mxu2 %v3903_v15  ;;  %4269 = vmatpush.msra.mxu3 %v3903_v15 }
 0x513   : > { %3920 = vmatpush.msra.mxu0 %v3903_v15  ;;  %4267 = vmatpush.msra.mxu1 %v3903_v15 }
 0x514   : > { %4271 = vmatpush.msra.mxu2 %v3902_v22  ;;  %4272 = vmatpush.msra.mxu3 %v3902_v22 }
 0x515   : > { %3921 = vmatpush.msra.mxu0 %v3902_v22  ;;  %4270 = vmatpush.msra.mxu1 %v3902_v22 }
 0x516   : > { %4274 = vmatpush.msra.mxu2 %v3901_v57  ;;  %4275 = vmatpush.msra.mxu3 %v3901_v57 }
 0x517   : > { %3922 = vmatpush.msra.mxu0 %v3901_v57  ;;  %4273 = vmatpush.msra.mxu1 %v3901_v57 }
 0x518   : > { %4277 = vmatpush.msra.mxu2 %v3900_v35  ;;  %4278 = vmatpush.msra.mxu3 %v3900_v35 }
 0x519   : > { %3923 = vmatpush.msra.mxu0 %v3900_v35  ;;  %4276 = vmatpush.msra.mxu1 %v3900_v35 }
 0x51a   : > { %4280 = vmatpush.msra.mxu2 %v3899_v61  ;;  %4281 = vmatpush.msra.mxu3 %v3899_v61 }
 0x51b   : > { %3924 = vmatpush.msra.mxu0 %v3899_v61  ;;  %4279 = vmatpush.msra.mxu1 %v3899_v61 }
 0x51c   : > { %4283 = vmatpush.msra.mxu2 %v3898_v42  ;;  %4284 = vmatpush.msra.mxu3 %v3898_v42 }
 0x51d   : > { %3925 = vmatpush.msra.mxu0 %v3898_v42  ;;  %4282 = vmatpush.msra.mxu1 %v3898_v42 }
 0x51e   : > { %4286 = vmatpush.msra.mxu2 %v3897_v44  ;;  %4287 = vmatpush.msra.mxu3 %v3897_v44 }
 0x51f   : > { %3926 = vmatpush.msra.mxu0 %v3897_v44  ;;  %4285 = vmatpush.msra.mxu1 %v3897_v44 }
 0x520   : > { %4289 = vmatpush.msra.mxu2 %v3896_v28  ;;  %4290 = vmatpush.msra.mxu3 %v3896_v28 }
 0x521   : > { %3927 = vmatpush.msra.mxu0 %v3896_v28  ;;  %4288 = vmatpush.msra.mxu1 %v3896_v28 }
 0x522   : > { %4292 = vmatpush.msra.mxu2 %v3895_v58  ;;  %4293 = vmatpush.msra.mxu3 %v3895_v58 }
 0x523   : > { %3928 = vmatpush.msra.mxu0 %v3895_v58  ;;  %4291 = vmatpush.msra.mxu1 %v3895_v58 }
 0x524   : > { %4295 = vmatpush.msra.mxu2 %v3894_v45  ;;  %4296 = vmatpush.msra.mxu3 %v3894_v45 }
 0x525   : > { %3936 = vmatmul.f32.vlgmr.msra.gmra.mxu2 %v3892_v27  ;;  %3939 = vmatmul.f32.vlgmr.msra.gmra.mxu3 %v3893_v19 }
 0x526   : > { %3929 = vmatpush.msra.mxu0 %v3894_v45  ;;  %4294 = vmatpush.msra.mxu1 %v3894_v45 }
 0x527   : > { %3930 = vmatmul.f32.vlgmr.msra.gmra.mxu0 %v3890_v9  ;;  %3933 = vmatmul.f32.vlgmr.msra.gmra.mxu1 %v3891_v36 }
 0x5a4   : > { %v3931_v48 = vpop.f32.mrf.mxu0  ;;  %v3934_v30 = vpop.f32.mrf.mxu1 }
 0x5a5   : > { %v3932_v12 = vadd.f32 %v4481_v23, %v3931_v48  ;;  %v3935_v24 = vadd.f32 %v4481_v23, %v3934_v30 }
 0x5a7   : > { %3943 = vst [vmem:[#allocation15] sm:$0xff] %v3932_v12 }
 0x5a8   : > { %3944 = vst [vmem:[#allocation15 + $0x8] sm:$0xff] %v3935_v24  ;;  %v3937_v26 = vpop.f32.mrf.mxu2  ;;  %v3940_v14 = vpop.f32.mrf.mxu3 }
 0x5a9   : > { %v3938_v4 = vadd.f32 %v4481_v23, %v3937_v26  ;;  %v3941_v13 = vadd.f32 %v4481_v23, %v3940_v14 }
 0x5ab   : > { %3945 = vst [vmem:[#allocation15 + $0x10] sm:$0xff] %v3938_v4 }
 0x5ac   : > { %3946 = vst [vmem:[#allocation15 + $0x18] sm:$0xff] %v3941_v13 }
 0x5ad PF: > { %p4354_p3 = scmp.eq.s32.totalorder %s4847_s21, 2  ;;  %s4763_s4 = smov [#allocation15]  }
 0x5ae   : > { %s3952_s16 = sshll.u32 %s4763_s4, 4  ;;  %s3954_s28 = sshll.u32 %s7325_s11, 4  ;;  %s3953_s16 = int_to_ptr.vmem [resolvable:$true] %s3952_s16  ;;  %s3955_s28 = int_to_ptr.hbm [resolvable:$true] %s3954_s28 }
 0x5af   : > { %s4764_s29 = smov 128   ;;  %s4765_s20 = smov 8  }
 0x5b0   : > { %4320 = dma.vmem_to_hbm [thread:$0]  (%p4354_p3), %s3953_s16, 512, %s3955_s28, [#allocation6], %s4764_s29, %s4764_s29, %s4765_s20  }
 0x5b1   : > { %4727 = dma.done.wait (%p4354_p3), [#allocation6], 512  }
 0x5b2   : > { %4729 = vsyncadd (%p4354_p3), [#allocation6], 4294966784 }
 0x5b3 PF: > { %p25_p11 = scmp.ge.s32.totalorder %s4891_s22, 5   ;;  %s7380_s17 = smov %s4736_s18 }
 0x5b4   : > { %s7381_s18 = smov %s4740_s19  ;;  %s7382_s19 = smov %s4902_s13 }
 0x5b5   : > { %s7383_s20 = smov %s4891_s22  ;;  %27 = sbr.rel (!%p25_p11) target bundleno = 11 (0xb), region = 136 }
 0x5ba   :  { %3971 = vsyncpa [#allocation5], 1 }
 0x5bb   :  { %3973 = vsyncpa [#allocation5 + $0x1], 1 }
 0x5bc   :  { %3974 = vsyncpa [#allocation8], 1 }
 0x5bd   :  { %3976 = vsyncpa [#allocation8 + $0x1], 1 }
 0x5be   :  { %3977 = vsyncpa [#allocation11], 1 }
 0x5bf   :  { %3978 = vsyncpa [#allocation14], 1 }
 0x5c0   :  { %3979 = vsyncpa [#allocation6], 1 }
 0x5c1   :  { %3981 = vsyncpa [#allocation6 + $0x1], 1 }

</bundles_post_ra>
